<compile_context>
chip_gen: v7x
topology: tpu7x:2x2x1
jax: 0.10.0
libtpu: 0.0.40
codegen_flags: <defaults>
</compile_context>

<pallas_src>
from functools import partial

import jax
import jax.numpy as jnp
from jax import lax
from jax.experimental import pallas as pl
from jax.experimental.pallas import tpu as pltpu

EPS = 1e-5            # nn.BatchNorm2d default eps
LANE = 128            # lane width; Cout padded up to a multiple of this
ROW_CAP_BASE = 1024   # target output pixels per pass-1 tile at Cpad=128
ROW_CAP2_BASE = 2048  # target pixels per pass-2 (elementwise) tile at Cpad=128


def _vmem_limit_bytes():
    """Generation-aware VMEM limit: ~3/4 of physical (96 MiB v5e/v6e, 48 MiB v7x)."""
    default = 32 * 1024 * 1024
    try:
        cap = int(getattr(pltpu.get_tpu_info(), "vmem_capacity_bytes", 0))
    except Exception:
        return default
    if cap <= 0:
        return default
    return max(default, min((cap * 3) // 4, 100 * 1024 * 1024))


def _pick_row_tile(ho, wo, cap_pixels):
    """Rows per tile: largest divisor of `ho` whose pixel count is a multiple of 8
    and <= cap; fall back to the whole image (block == full extent, no %8 needed)."""
    cap_rows = max(1, cap_pixels // wo)
    for th in range(min(ho, cap_rows), 0, -1):
        if ho % th == 0 and (th * wo) % 8 == 0:
            return th
    # TODO(synk): odd Ho*Wo (e.g. 7x7) falls back to a whole-image tile; masked
    # ragged tiles would bound VMEM for very large odd feature maps.
    return ho


# ---------------- Pallas kernels ----------------

def _conv_stats_kernel(xs_ref, w_ref, y_ref, sum_ref, ssq_ref, stg_ref,
                       *, stride, th, wo, cin):
    """3x3 conv for `th` output rows of one image + per-tile batch-stat partials.

    xs_ref : (s*s, Hs, Ws, Cin) bf16  phase-decomposed padded image (whole image
                                      resident in VMEM, fetched once per image).
    w_ref  : (9*Cin, Cpad)      bf16  K-folded weights, Cout zero-padded to 128.
    y_ref  : (1, th*wo, Cpad)   bf16  conv output tile (lane-dense store).
    sum_ref/ssq_ref : (1,1,1,Cpad) f32  per-tile batch-stat partials.
    stg_ref: (th*wo, 9*Cin)     bf16  K-fold staging tile (single MXU matmul).
    """
    t = pl.program_id(1)
    row0 = t * th

    # Stage the 9 taps side by side along K (same slice/reshape copies as before,
    # but no per-tap f32 accumulator RMW), then one MXU matmul with K = 9*Cin.
    for k in range(9):
        dy, dx = divmod(k, 3)
        p = (dy % stride) * stride + (dx % stride)      # phase plane
        a, b = dy // stride, dx // stride               # offsets inside the phase
        lhs = xs_ref[p, pl.ds(row0 + a, th), pl.ds(b, wo), :]   # (th, wo, Cin)
        stg_ref[:, k * cin:(k + 1) * cin] = lhs.reshape(th * wo, cin)

    y = jnp.dot(stg_ref[...], w_ref[...], preferred_element_type=jnp.float32)
    y_ref[...] = y.astype(y_ref.dtype)[None]            # (1, th*wo, Cpad) bf16

    # Per-tile batch-stat partials: cross-sublane XLU reduce (different VLIW slot
    # than the MXU work). Final per-channel scalar math lives in tiny JAX glue.
    # NOTE: stats are computed from the f32 accumulator; pass 2 normalizes the
    # bf16-rounded intermediate (difference far below the bf16 tolerance).
    cpad = y.shape[-1]
    sum_ref[...] = jnp.sum(y, axis=0, keepdims=True).reshape(1, 1, 1, cpad)
    ssq_ref[...] = jnp.sum(y * y, axis=0, keepdims=True).reshape(1, 1, 1, cpad)


def _bn_relu_kernel(y_ref, scale_ref, shift_ref, o_ref, *, cout):
    """Elementwise BatchNorm affine (pre-folded scale/shift) + ReLU.

    Writes the UNPADDED channel range (Cout) so the f32 epilogue traffic is not
    inflated by the lane padding of the bf16 conv intermediate.
    """
    y = y_ref[...].astype(jnp.float32)                  # (1, TH2, Wo, Cpad)
    z = jnp.maximum(y * scale_ref[...] + shift_ref[...], 0.0)
    o_ref[...] = z[..., :cout]                          # (1, TH2, Wo, Cout)


# ---------------- wrapper ----------------

def conv_bn_block(x_nchw, params, stride):
    w = params["w"]
    gamma, beta = params["gamma"], params["beta"]
    # NOTE: params["b"] (conv bias) is intentionally unused: train-mode BatchNorm
    # subtracts the batch mean immediately, which cancels the bias exactly
    # (variance is shift-invariant), so it is dead work with identical output.
    Cout, Cin, KH, KW = w.shape
    N, C, H, W = x_nchw.shape
    assert C == Cin and (KH, KW) == (3, 3)
    s = int(stride)

    Ho = (H + 2 - 3) // s + 1
    Wo = (W + 2 - 3) // s + 1
    Cpad = ((Cout + LANE - 1) // LANE) * LANE           # lane-dense channel dim

    # ---- glue: layout prep (1x data movement; no 9x im2col in HBM) ----
    # bf16 cast BEFORE pad/transpose (half the layout-prep bytes). Stride-phase
    # decomposition so every conv tap is a contiguous window of one phase plane:
    #   x_pad[n, ho*s+dy, wo*s+dx, :] == xs[n, (dy%s)*s + dx%s, ho + dy//s, wo + dx//s, :]
    Hs = -(-(H + 2) // s)
    Ws = -(-(W + 2) // s)
    x = jnp.transpose(x_nchw, (0, 2, 3, 1)).astype(jnp.bfloat16)
    xp = jnp.pad(x, ((0, 0), (1, Hs * s - H - 1), (1, Ws * s - W - 1), (0, 0)))
    xs = (xp.reshape(N, Hs, s, Ws, s, Cin)
            .transpose(0, 2, 4, 1, 3, 5)                # (N, py, px, Hs, Ws, Cin)
            .reshape(N * s * s, Hs, Ws, Cin))

    # (Cout, Cin, 3, 3) -> (9*Cin, Cpad); K index = (3*dy + dx)*Cin + cin matches
    # the in-kernel staging order.
    w_fold = jnp.transpose(w, (2, 3, 1, 0)).reshape(9 * Cin, Cout).astype(jnp.float32)
    w_fold = jnp.pad(w_fold, ((0, 0), (0, Cpad - Cout))).astype(jnp.bfloat16)

    vmem_limit = _vmem_limit_bytes()

    # ---- pass 1: conv (single K=9*Cin MXU matmul per tile) + stat partials ----
    row_cap = max(256, (ROW_CAP_BASE * LANE) // Cpad)   # scale tile with channel width
    TH = _pick_row_tile(Ho, Wo, row_cap)
    TM = TH * Wo
    T = Ho // TH

    conv_out, sum_part, ssq_part = pl.pallas_call(
        partial(_conv_stats_kernel, stride=s, th=TH, wo=Wo, cin=Cin),
        out_shape=(jax.ShapeDtypeStruct((N, Ho * Wo, Cpad), jnp.bfloat16),
                   jax.ShapeDtypeStruct((N, T, 1, Cpad), jnp.float32),
                   jax.ShapeDtypeStruct((N, T, 1, Cpad), jnp.float32)),
        grid_spec=pltpu.PrefetchScalarGridSpec(
            num_scalar_prefetch=0,
            grid=(N, T),
            in_specs=[
                # TODO(synk): whole padded image resident (double-buffered); for very
                # large feature maps switch to manually double-buffered row slabs.
                pl.BlockSpec((s * s, Hs, Ws, Cin), lambda n, t: (n, 0, 0, 0)),
                pl.BlockSpec((9 * Cin, Cpad), lambda n, t: (0, 0)),
            ],
            out_specs=(
                pl.BlockSpec((1, TM, Cpad), lambda n, t: (n, t, 0)),
                pl.BlockSpec((1, 1, 1, Cpad), lambda n, t: (n, t, 0, 0)),
                pl.BlockSpec((1, 1, 1, Cpad), lambda n, t: (n, t, 0, 0)),
            ),
            scratch_shapes=[pltpu.VMEM((TM, 9 * Cin), jnp.bfloat16)]),
        compiler_params=pltpu.CompilerParams(
            # Stats are per-(image, row-tile) partials and every output block is
            # written exactly once, so both axes are parallel; v7x megacore can
            # split the row axis even when N == 1.
            dimension_semantics=("parallel", "parallel"),
            vmem_limit_bytes=vmem_limit),
    )(xs, w_fold)

    # BatchNorm2d training-mode stats: biased mean/var over (N, Ho, Wo).
    # Tiny per-channel scalar math stays in plain JAX (glue).
    cnt = jnp.float32(N * Ho * Wo)
    mean = jnp.sum(sum_part, axis=(0, 1, 2)) / cnt                    # (Cpad,)
    var = jnp.maximum(jnp.sum(ssq_part, axis=(0, 1, 2)) / cnt - mean * mean, 0.0)
    # TODO(synk): switch to shifted/Welford accumulation if |mean| >> std in general use.
    gamma_p = jnp.pad(gamma.astype(jnp.float32), (0, Cpad - Cout))
    beta_p = jnp.pad(beta.astype(jnp.float32), (0, Cpad - Cout))
    inv_std = lax.rsqrt(var + EPS)
    scale_v = gamma_p * inv_std
    shift_v = beta_p - mean * scale_v
    scale = scale_v.reshape(1, Cpad)
    shift = shift_v.reshape(1, Cpad)

    # ---- pass 2: BN affine + ReLU, UNPADDED (N, Ho, Wo, Cout) f32 output ----
    cap2 = max(512, (ROW_CAP2_BASE * LANE) // Cpad)
    TH2 = _pick_row_tile(Ho, Wo, cap2)
    T2 = Ho // TH2
    conv4 = conv_out.reshape(N, Ho, Wo, Cpad)           # metadata-only reshape

    out = pl.pallas_call(
        partial(_bn_relu_kernel, cout=Cout),
        out_shape=jax.ShapeDtypeStruct((N, Ho, Wo, Cout), jnp.float32),
        grid_spec=pltpu.PrefetchScalarGridSpec(
            num_scalar_prefetch=0,
            grid=(N, T2),
            in_specs=[pl.BlockSpec((1, TH2, Wo, Cpad), lambda n, t: (n, t, 0, 0)),
                      pl.BlockSpec((1, Cpad), lambda n, t: (0, 0)),
                      pl.BlockSpec((1, Cpad), lambda n, t: (0, 0))],
            out_specs=pl.BlockSpec((1, TH2, Wo, Cout), lambda n, t: (n, t, 0, 0))),
        compiler_params=pltpu.CompilerParams(
            dimension_semantics=("parallel", "parallel"),
            vmem_limit_bytes=vmem_limit),
    )(conv4, scale, shift)

    # TODO(synk): the final NHWC->NCHW transpose could be fused into pass 2 with an
    # in-kernel XLU transpose; kept in XLA for lowering robustness.
    return jnp.transpose(out, (0, 3, 1, 2))


# ---------------- pure-JAX reference (exact f32 module semantics) ----------------

def conv_bn_block_ref(x_nchw, params, stride):
    w, b = params["w"], params["b"]
    gamma, beta = params["gamma"], params["beta"]
    y = lax.conv_general_dilated(
        x_nchw.astype(jnp.float32), w.astype(jnp.float32),
        window_strides=(stride, stride), padding=((1, 1), (1, 1)),
        dimension_numbers=("NCHW", "OIHW", "NCHW"))
    y = y + b.reshape(1, -1, 1, 1)
    mean = jnp.mean(y, axis=(0, 2, 3), keepdims=True)
    var = jnp.mean((y - mean) ** 2, axis=(0, 2, 3), keepdims=True)  # biased
    y = (y - mean) / jnp.sqrt(var + EPS)
    y = y * gamma.reshape(1, -1, 1, 1) + beta.reshape(1, -1, 1, 1)
    return jnp.maximum(y, 0.0)


if __name__ == "__main__":
    key = jax.random.PRNGKey(0)
    k_x, k_w, k_b, k_g, k_bt = jax.random.split(key, 5)

    in_channels, out_channels = 4, 8
    N, H, W = 2, 16, 16

    x = jax.random.normal(k_x, (N, in_channels, H, W), dtype=jnp.float32)
    params = {
        "w": jax.random.normal(k_w, (out_channels, in_channels, 3, 3),
                               dtype=jnp.float32) * 0.1,
        "b": jax.random.normal(k_b, (out_channels,), dtype=jnp.float32) * 0.1,
        "gamma": 1.0 + 0.1 * jax.random.normal(k_g, (out_channels,),
                                               dtype=jnp.float32),
        "beta": 0.1 * jax.random.normal(k_bt, (out_channels,),
                                        dtype=jnp.float32),
    }

    ok = True
    for stride in (1, 2):
        out = jax.block_until_ready(conv_bn_block(x, params, stride))
        ref = jax.block_until_ready(conv_bn_block_ref(x, params, stride))
        if out.shape != ref.shape:
            ok = False
            print(f"SHAPE MISMATCH at stride={stride}: {out.shape} vs {ref.shape}")
        # Tolerance accounts for bf16 MXU operands + bf16 conv intermediate
        # (f32 accumulation); reference is exact f32.
        elif not jnp.allclose(out, ref, atol=2e-2, rtol=2e-2):
            ok = False
            print(f"MISMATCH at stride={stride}, "
                  f"max err={float(jnp.max(jnp.abs(out - ref)))}")

    if ok:
        print("KERNEL_OK")
</pallas_src>

<mosaic_0001>
module attributes {stable_mosaic.version = 11 : i64} {
  func.func @_conv_stats_kernel(%arg0: i32, %arg1: i32, %arg2: memref<1x18x18x4xbf16, #tpu.memory_space<vmem>>, %arg3: memref<36x128xbf16, #tpu.memory_space<vmem>>, %arg4: memref<1x256x128xbf16, #tpu.memory_space<vmem>>, %arg5: memref<1x1x1x128xf32, #tpu.memory_space<vmem>>, %arg6: memref<1x1x1x128xf32, #tpu.memory_space<vmem>>, %arg7: memref<256x36xbf16, #tpu.memory_space<vmem>>) attributes {dimension_semantics = [#tpu.dimension_semantics<parallel>, #tpu.dimension_semantics<parallel>], iteration_bounds = array<i64: 2, 1>, scalar_prefetch = 0 : i64, scratch_operands = 1 : i64, tpu.core_type = #tpu.core_type<tc>, window_params = [{transform_indices = @transform_0, window_bounds = array<i64: 1, 18, 18, 4>}, {pipeline_mode = #tpu.pipeline_mode<synchronous>, transform_indices = @transform_1, window_bounds = array<i64: 36, 128>}, {transform_indices = @transform_2, window_bounds = array<i64: 1, 256, 128>}, {transform_indices = @transform_3, window_bounds = array<i64: 1, 1, 1, 128>}, {transform_indices = @transform_4, window_bounds = array<i64: 1, 1, 1, 128>}]} {
    %c16_i32 = arith.constant 16 : i32
    %0 = arith.muli %arg1, %c16_i32 : i32
    %c0_i32 = arith.constant 0 : i32
    %1 = arith.addi %0, %c0_i32 : i32
    %c0 = arith.constant 0 : index
    %2 = arith.index_cast %1 : i32 to index
    %c0_0 = arith.constant 0 : index
    %c0_1 = arith.constant 0 : index
    %3 = vector.load %arg2[%c0, %2, %c0_0, %c0_1] : memref<1x18x18x4xbf16, #tpu.memory_space<vmem>>, vector<1x16x16x4xbf16>
    %4 = vector.shape_cast %3 : vector<1x16x16x4xbf16> to vector<16x16x4xbf16>
    %5 = vector.shape_cast %4 : vector<16x16x4xbf16> to vector<256x4xbf16>
    %c0_2 = arith.constant 0 : index
    %c0_3 = arith.constant 0 : index
    %6 = vector.load %arg7[%c0_2, %c0_3] : memref<256x36xbf16, #tpu.memory_space<vmem>>, vector<256x4xbf16>
    tpu.vector_store %arg7[%c0_2, %c0_3], %5 {strides = array<i32>} : memref<256x36xbf16, #tpu.memory_space<vmem>>, vector<256x4xbf16>,
    %c0_i32_4 = arith.constant 0 : i32
    %7 = arith.addi %0, %c0_i32_4 : i32
    %c0_5 = arith.constant 0 : index
    %8 = arith.index_cast %7 : i32 to index
    %c1 = arith.constant 1 : index
    %c0_6 = arith.constant 0 : index
    %9 = vector.load %arg2[%c0_5, %8, %c1, %c0_6] : memref<1x18x18x4xbf16, #tpu.memory_space<vmem>>, vector<1x16x16x4xbf16>
    %10 = vector.shape_cast %9 : vector<1x16x16x4xbf16> to vector<16x16x4xbf16>
    %11 = vector.shape_cast %10 : vector<16x16x4xbf16> to vector<256x4xbf16>
    %c0_7 = arith.constant 0 : index
    %c4 = arith.constant 4 : index
    %12 = vector.load %arg7[%c0_7, %c4] : memref<256x36xbf16, #tpu.memory_space<vmem>>, vector<256x4xbf16>
    tpu.vector_store %arg7[%c0_7, %c4], %11 {strides = array<i32>} : memref<256x36xbf16, #tpu.memory_space<vmem>>, vector<256x4xbf16>,
    %c0_i32_8 = arith.constant 0 : i32
    %13 = arith.addi %0, %c0_i32_8 : i32
    %c0_9 = arith.constant 0 : index
    %14 = arith.index_cast %13 : i32 to index
    %c2 = arith.constant 2 : index
    %c0_10 = arith.constant 0 : index
    %15 = vector.load %arg2[%c0_9, %14, %c2, %c0_10] : memref<1x18x18x4xbf16, #tpu.memory_space<vmem>>, vector<1x16x16x4xbf16>
    %16 = vector.shape_cast %15 : vector<1x16x16x4xbf16> to vector<16x16x4xbf16>
    %17 = vector.shape_cast %16 : vector<16x16x4xbf16> to vector<256x4xbf16>
    %c0_11 = arith.constant 0 : index
    %c8 = arith.constant 8 : index
    %18 = vector.load %arg7[%c0_11, %c8] : memref<256x36xbf16, #tpu.memory_space<vmem>>, vector<256x4xbf16>
    tpu.vector_store %arg7[%c0_11, %c8], %17 {strides = array<i32>} : memref<256x36xbf16, #tpu.memory_space<vmem>>, vector<256x4xbf16>,
    %c1_i32 = arith.constant 1 : i32
    %19 = arith.addi %0, %c1_i32 : i32
    %c0_12 = arith.constant 0 : index
    %20 = arith.index_cast %19 : i32 to index
    %c0_13 = arith.constant 0 : index
    %c0_14 = arith.constant 0 : index
    %21 = vector.load %arg2[%c0_12, %20, %c0_13, %c0_14] : memref<1x18x18x4xbf16, #tpu.memory_space<vmem>>, vector<1x16x16x4xbf16>
    %22 = vector.shape_cast %21 : vector<1x16x16x4xbf16> to vector<16x16x4xbf16>
    %23 = vector.shape_cast %22 : vector<16x16x4xbf16> to vector<256x4xbf16>
    %c0_15 = arith.constant 0 : index
    %c12 = arith.constant 12 : index
    %24 = vector.load %arg7[%c0_15, %c12] : memref<256x36xbf16, #tpu.memory_space<vmem>>, vector<256x4xbf16>
    tpu.vector_store %arg7[%c0_15, %c12], %23 {strides = array<i32>} : memref<256x36xbf16, #tpu.memory_space<vmem>>, vector<256x4xbf16>,
    %c1_i32_16 = arith.constant 1 : i32
    %25 = arith.addi %0, %c1_i32_16 : i32
    %c0_17 = arith.constant 0 : index
    %26 = arith.index_cast %25 : i32 to index
    %c1_18 = arith.constant 1 : index
    %c0_19 = arith.constant 0 : index
    %27 = vector.load %arg2[%c0_17, %26, %c1_18, %c0_19] : memref<1x18x18x4xbf16, #tpu.memory_space<vmem>>, vector<1x16x16x4xbf16>
    %28 = vector.shape_cast %27 : vector<1x16x16x4xbf16> to vector<16x16x4xbf16>
    %29 = vector.shape_cast %28 : vector<16x16x4xbf16> to vector<256x4xbf16>
    %c0_20 = arith.constant 0 : index
    %c16 = arith.constant 16 : index
    %30 = vector.load %arg7[%c0_20, %c16] : memref<256x36xbf16, #tpu.memory_space<vmem>>, vector<256x4xbf16>
    tpu.vector_store %arg7[%c0_20, %c16], %29 {strides = array<i32>} : memref<256x36xbf16, #tpu.memory_space<vmem>>, vector<256x4xbf16>,
    %c1_i32_21 = arith.constant 1 : i32
    %31 = arith.addi %0, %c1_i32_21 : i32
    %c0_22 = arith.constant 0 : index
    %32 = arith.index_cast %31 : i32 to index
    %c2_23 = arith.constant 2 : index
    %c0_24 = arith.constant 0 : index
    %33 = vector.load %arg2[%c0_22, %32, %c2_23, %c0_24] : memref<1x18x18x4xbf16, #tpu.memory_space<vmem>>, vector<1x16x16x4xbf16>
    %34 = vector.shape_cast %33 : vector<1x16x16x4xbf16> to vector<16x16x4xbf16>
    %35 = vector.shape_cast %34 : vector<16x16x4xbf16> to vector<256x4xbf16>
    %c0_25 = arith.constant 0 : index
    %c20 = arith.constant 20 : index
    %36 = vector.load %arg7[%c0_25, %c20] : memref<256x36xbf16, #tpu.memory_space<vmem>>, vector<256x4xbf16>
    tpu.vector_store %arg7[%c0_25, %c20], %35 {strides = array<i32>} : memref<256x36xbf16, #tpu.memory_space<vmem>>, vector<256x4xbf16>,
    %c2_i32 = arith.constant 2 : i32
    %37 = arith.addi %0, %c2_i32 : i32
    %c0_26 = arith.constant 0 : index
    %38 = arith.index_cast %37 : i32 to index
    %c0_27 = arith.constant 0 : index
    %c0_28 = arith.constant 0 : index
    %39 = vector.load %arg2[%c0_26, %38, %c0_27, %c0_28] : memref<1x18x18x4xbf16, #tpu.memory_space<vmem>>, vector<1x16x16x4xbf16>
    %40 = vector.shape_cast %39 : vector<1x16x16x4xbf16> to vector<16x16x4xbf16>
    %41 = vector.shape_cast %40 : vector<16x16x4xbf16> to vector<256x4xbf16>
    %c0_29 = arith.constant 0 : index
    %c24 = arith.constant 24 : index
    %42 = vector.load %arg7[%c0_29, %c24] : memref<256x36xbf16, #tpu.memory_space<vmem>>, vector<256x4xbf16>
    tpu.vector_store %arg7[%c0_29, %c24], %41 {strides = array<i32>} : memref<256x36xbf16, #tpu.memory_space<vmem>>, vector<256x4xbf16>,
    %c2_i32_30 = arith.constant 2 : i32
    %43 = arith.addi %0, %c2_i32_30 : i32
    %c0_31 = arith.constant 0 : index
    %44 = arith.index_cast %43 : i32 to index
    %c1_32 = arith.constant 1 : index
    %c0_33 = arith.constant 0 : index
    %45 = vector.load %arg2[%c0_31, %44, %c1_32, %c0_33] : memref<1x18x18x4xbf16, #tpu.memory_space<vmem>>, vector<1x16x16x4xbf16>
    %46 = vector.shape_cast %45 : vector<1x16x16x4xbf16> to vector<16x16x4xbf16>
    %47 = vector.shape_cast %46 : vector<16x16x4xbf16> to vector<256x4xbf16>
    %c0_34 = arith.constant 0 : index
    %c28 = arith.constant 28 : index
    %48 = vector.load %arg7[%c0_34, %c28] : memref<256x36xbf16, #tpu.memory_space<vmem>>, vector<256x4xbf16>
    tpu.vector_store %arg7[%c0_34, %c28], %47 {strides = array<i32>} : memref<256x36xbf16, #tpu.memory_space<vmem>>, vector<256x4xbf16>,
    %c2_i32_35 = arith.constant 2 : i32
    %49 = arith.addi %0, %c2_i32_35 : i32
    %c0_36 = arith.constant 0 : index
    %50 = arith.index_cast %49 : i32 to index
    %c2_37 = arith.constant 2 : index
    %c0_38 = arith.constant 0 : index
    %51 = vector.load %arg2[%c0_36, %50, %c2_37, %c0_38] : memref<1x18x18x4xbf16, #tpu.memory_space<vmem>>, vector<1x16x16x4xbf16>
    %52 = vector.shape_cast %51 : vector<1x16x16x4xbf16> to vector<16x16x4xbf16>
    %53 = vector.shape_cast %52 : vector<16x16x4xbf16> to vector<256x4xbf16>
    %c0_39 = arith.constant 0 : index
    %c32 = arith.constant 32 : index
    %54 = vector.load %arg7[%c0_39, %c32] : memref<256x36xbf16, #tpu.memory_space<vmem>>, vector<256x4xbf16>
    tpu.vector_store %arg7[%c0_39, %c32], %53 {strides = array<i32>} : memref<256x36xbf16, #tpu.memory_space<vmem>>, vector<256x4xbf16>,
    %c0_40 = arith.constant 0 : index
    %c0_41 = arith.constant 0 : index
    %55 = vector.load %arg7[%c0_40, %c0_41] : memref<256x36xbf16, #tpu.memory_space<vmem>>, vector<256x36xbf16>
    %c0_42 = arith.constant 0 : index
    %c0_43 = arith.constant 0 : index
    %56 = vector.load %arg3[%c0_42, %c0_43] : memref<36x128xbf16, #tpu.memory_space<vmem>>, vector<36x128xbf16>
    %cst = arith.constant dense<0.000000e+00> : vector<256x128xf32>
    %57 = tpu.matmul %55, %56, %cst {dimension_numbers = #tpu.dot_dimension_numbers<[1], [0], [0], [1], [0, 0, 1, 1], [], []>} : vector<256x36xbf16>, vector<36x128xbf16>, vector<256x128xf32> -> vector<256x128xf32>
    %58 = arith.truncf %57 : vector<256x128xf32> to vector<256x128xbf16>
    %59 = vector.shape_cast %58 : vector<256x128xbf16> to vector<1x256x128xbf16>
    %c0_44 = arith.constant 0 : index
    %c0_45 = arith.constant 0 : index
    %c0_46 = arith.constant 0 : index
    %60 = vector.load %arg4[%c0_44, %c0_45, %c0_46] : memref<1x256x128xbf16, #tpu.memory_space<vmem>>, vector<1x256x128xbf16>
    tpu.vector_store %arg4[%c0_44, %c0_45, %c0_46], %59 {strides = array<i32>} : memref<1x256x128xbf16, #tpu.memory_space<vmem>>, vector<1x256x128xbf16>,
    %cst_47 = arith.constant dense<0.000000e+00> : vector<128xf32>
    %61 = vector.multi_reduction <add>, %57, %cst_47 [0] : vector<256x128xf32> to vector<128xf32>
    %62 = vector.shape_cast %61 : vector<128xf32> to vector<1x128xf32>
    %63 = vector.shape_cast %62 : vector<1x128xf32> to vector<1x1x1x128xf32>
    %c0_48 = arith.constant 0 : index
    %c0_49 = arith.constant 0 : index
    %c0_50 = arith.constant 0 : index
    %c0_51 = arith.constant 0 : index
    %64 = vector.load %arg5[%c0_48, %c0_49, %c0_50, %c0_51] : memref<1x1x1x128xf32, #tpu.memory_space<vmem>>, vector<1x1x1x128xf32>
    tpu.vector_store %arg5[%c0_48, %c0_49, %c0_50, %c0_51], %63 {strides = array<i32>} : memref<1x1x1x128xf32, #tpu.memory_space<vmem>>, vector<1x1x1x128xf32>,
    %65 = arith.mulf %57, %57 : vector<256x128xf32>
    %cst_52 = arith.constant dense<0.000000e+00> : vector<128xf32>
    %66 = vector.multi_reduction <add>, %65, %cst_52 [0] : vector<256x128xf32> to vector<128xf32>
    %67 = vector.shape_cast %66 : vector<128xf32> to vector<1x128xf32>
    %68 = vector.shape_cast %67 : vector<1x128xf32> to vector<1x1x1x128xf32>
    %c0_53 = arith.constant 0 : index
    %c0_54 = arith.constant 0 : index
    %c0_55 = arith.constant 0 : index
    %c0_56 = arith.constant 0 : index
    %69 = vector.load %arg6[%c0_53, %c0_54, %c0_55, %c0_56] : memref<1x1x1x128xf32, #tpu.memory_space<vmem>>, vector<1x1x1x128xf32>
    tpu.vector_store %arg6[%c0_53, %c0_54, %c0_55, %c0_56], %68 {strides = array<i32>} : memref<1x1x1x128xf32, #tpu.memory_space<vmem>>, vector<1x1x1x128xf32>,
    return
  }
  func.func @transform_0(%arg0: i32, %arg1: i32) -> (i32, i32, i32, i32) {
    %c0_i32 = arith.constant 0 : i32
    %c0_i32_0 = arith.constant 0 : i32
    %c0_i32_1 = arith.constant 0 : i32
    %c0_i32_2 = arith.constant 0 : i32
    return %arg0, %c0_i32, %c0_i32_0, %c0_i32_1 : i32, i32, i32, i32
  }
  func.func @transform_1(%arg0: i32, %arg1: i32) -> (i32, i32) {
    %c0_i32 = arith.constant 0 : i32
    %c0_i32_0 = arith.constant 0 : i32
    %c0_i32_1 = arith.constant 0 : i32
    return %c0_i32, %c0_i32_0 : i32, i32
  }
  func.func @transform_2(%arg0: i32, %arg1: i32) -> (i32, i32, i32) {
    %c0_i32 = arith.constant 0 : i32
    %c0_i32_0 = arith.constant 0 : i32
    return %arg0, %arg1, %c0_i32 : i32, i32, i32
  }
  func.func @transform_3(%arg0: i32, %arg1: i32) -> (i32, i32, i32, i32) {
    %c0_i32 = arith.constant 0 : i32
    %c0_i32_0 = arith.constant 0 : i32
    %c0_i32_1 = arith.constant 0 : i32
    return %arg0, %arg1, %c0_i32, %c0_i32_0 : i32, i32, i32, i32
  }
  func.func @transform_4(%arg0: i32, %arg1: i32) -> (i32, i32, i32, i32) {
    %c0_i32 = arith.constant 0 : i32
    %c0_i32_0 = arith.constant 0 : i32
    %c0_i32_1 = arith.constant 0 : i32
    return %arg0, %arg1, %c0_i32, %c0_i32_0 : i32, i32, i32, i32
  }
}

</mosaic_0001>

<bundles_post_ra>
// kernel: tpu_custom_call.1
= control target key start
LH: loop header
LB: loop body
LE: loop exit
PB: predicated region body
PF: predicated region fallthrough
CT: control target
= control target key end

     0   :  { %10 = vsyncpa [#allocation4], 0  ;;  %s6352_s0 = inlined_call_operand.vmem [shape: bf16[2,18,18,4], index: 0, kind: input, shape index: {}]   ;;  %s6353_s1 = inlined_call_operand.vmem [shape: bf16[36,128], index: 1, kind: input, shape index: {}]   ;;  %s6354_s2 = inlined_call_operand.hbm [shape: bf16[2,256,128], index: 2, kind: output, shape index: {0}]   ;;  %s6355_s3 = inlined_call_operand.hbm [shape: f32[2,1,1,128], index: 3, kind: output, shape index: {1}]   ;;  %s6356_s4 = inlined_call_operand.hbm [shape: f32[2,1,1,128], index: 4, kind: output, shape index: {2}]  }
   0x1   :  { %12 = vsyncpa [#allocation4 + $0x1], 0 }
   0x2   :  { %13 = vsyncpa [#allocation6], 0 }
   0x3   :  { %15 = vsyncpa [#allocation6 + $0x1], 0  ;;  %s5064_s15 = smov 0   ;;  %s5066_s16 = smov 0  }
   0x4   :  { %s5068_s17 = smov 0   ;;  %s5070_s18 = smov 0  }
   0x5   :  { %s5072_s19 = smov 0   ;;  %s5074_s20 = smov 0  }
   0x6 LB: > { %s4055_s21 = sadd.s32 4294967295, %s5025_s20   ;;  %s4056_s22 = sadd.s32 4294967294, %s5025_s20   ;;  %s5025_s20 = sphi %s5074_s20, %s21_s20   ;;  %s5021_s19 = sphi %s5072_s19, %s6367_s19   ;;  %s5017_s18 = sphi %s5070_s18, %s6366_s18   ;;  %s5013_s17 = sphi %s5068_s17, %s6365_s17   ;;  %s5009_s16 = sphi %s5066_s16, %s6364_s16   ;;  %s5005_s15 = sphi %s5064_s15, %s6363_s15  }
   0x7   : > { %s33_s23 = sadd.s32 1, %s5021_s19  ;;  %s89_s24 = sadd.s32 1, %s5013_s17 }
   0x8   : > { %p35_p0 = scmp.ge.s32.totalorder %s33_s23, 2  ;;  %p99_p1 = scmp.ne.s32.totalorder %s5013_s17, %s5009_s16 }
   0x9   : > { %p100_p2 = scmp.eq.s32.totalorder %s4055_s21, 1  ;;  %p105_p3 = scmp.ne.s32.totalorder %s5009_s16, %s5005_s15 }
   0xa   : > { %s6369_s23 = smov (%p35_p0, %s33_s23), 0  ;;  %p106_p5 = scmp.eq.s32.totalorder %s4056_s22, 1 }
   0xb   : > { %p5106_p4 = por %p100_p2, %p99_p1  ;;  %s84_s26 = ssub.s32 %s5021_s19, %s6369_s23 }
   0xc   : > { %p4059_p6 = scmp.ge.s32.totalorder %s5025_s20, 1  ;;  %p87_p7 = scmp.eq.s32.totalorder %s84_s26, 0 }
   0xd   : > { %p5115_p8 = por %p106_p5, %p105_p3  ;;  %p191_p9 = scmp.lt.s32.totalorder %s5025_s20, 3 }
   0xe   : > { %s5121_s28 = scalar_select %p87_p7, %s5013_s17, %s89_s24  }
   0xf   : > { %p192_p10 = pnand %p4059_p6, %p191_p9 }
  0x10   : > { %p225_p11 = scmp.lt.s32.totalorder (!%p192_p10), %s5017_s18, 1  ;;  %vm1025_vm0 = vcmask (!%p192_p10), 1042432   ;;  %vm1026_vm1 = vcmask (!%p192_p10), 1046532   ;;  %s5027_s8 = smov (!%p192_p10), 12   ;;  %vm429_vm3 = vsmask.f32 (!%p192_p10), 3328 }
  0x11   : > { %195 = sbr.rel (%p192_p10) target bundleno = 730 (0x2da), region = 28  ;;  %vm5130_vm2 = vmor (!%p192_p10), %vm1025_vm0, %vm1026_vm1  ;;  %vm430_vm4 = vsmask.f32 (!%p192_p10), 7440  ;;  %s5028_s9 = smov (!%p192_p10), 20   ;;  %vm364_vm6 = vcmask (!%p192_p10), 31744   ;;  %vm912_vm7 = vcmask (!%p192_p10), 64544  }
  0x12   : > { %s5029_s10 = smov (!%p192_p10), 8   ;;  %vm5171_vm5 = vmor (!%p192_p10), %vm429_vm3, %vm430_vm4  ;;  %s5030_s11 = smov (!%p192_p10), 4   ;;  %vm1236_vm8 = vcmask (!%p192_p10), 97344   ;;  %vm1417_vm9 = vcmask (!%p192_p10), 130144   ;;  %vm1962_vm10 = vcmask (!%p192_p10), 162944   ;;  %vm2283_vm11 = vcmask (!%p192_p10), 195744  }
  0x13   : > { %s5031_s12 = smov (!%p192_p10), 16   ;;  %s5032_s13 = smov (!%p192_p10), 24   ;;  %vm2464_vm12 = vcmask (!%p192_p10), 228544   ;;  %vm3009_vm13 = vcmask (!%p192_p10), 261344   ;;  %vm3330_vm14 = vcmask (!%p192_p10), 294144   ;;  %vm3432_vm15 = vcmask (!%p192_p10), 1041408  }
  0x14   : > { %s5033_s14 = smov (!%p192_p10), 28   ;;  %s5034_s24 = smov (!%p192_p10), 32   ;;  %vm3383_vm0 = vcmask (!%p192_p10), 293888  }
  0x15   : > { %s5035_s5 = smov (!%p192_p10), [#allocation3]  }
  0x16   : > { %s4891_s6 = sshll.u32 (!%p192_p10), %s5035_s5, 4  ;;  %s4892_s6 = int_to_ptr.vmem [resolvable:$false] %s4891_s6 }
  0x17   : > { %s4893_s26 = scalar_lea.vmem (!%p192_p10), %s4892_s6, 4096 }
  0x18   : > { %s226_s29 = scalar_select %p225_p11, %s5017_s18, 1 }
  0x1a   : > { %s4761_s30 = smul.u32 216, %s226_s29 }
  0x1c   : > { %s5128_s7 = scalar_lea.vmem %s6352_s0, %s4761_s30 }
  0x1d   : > { %v4836_v1 = vld [vmem:[%s5128_s7 + $0x18] sm:$0xff]   ;;  %v4837_v2 = vld [vmem:[%s5128_s7 + $0xc] sm:$0xff]   ;;  %v4240_v5 = vld [vmem:[%s5128_s7 + $0x14] sm:$0x1] }
  0x1e   : > { %1371 = vrot.lane.b32.xlu1 %v4836_v1, %s5027_s8  ;;  %v4238_v3 = vld [vmem:[%s5128_s7 + $0xc] sm:$0xe]  ;;  %v4239_v4 = vld [vmem:[%s5128_s7 + $0x10] sm:$0xf]  ;;  %1369 = vrot.lane.b32.xlu0 %v4837_v2, %s5027_s8  ;;  %v2080_v8 = vrot.slane %v4240_v5, 5 }
  0x1f   : > { %v4286_v6 = vrot.slane %v4238_v3, 9  ;;  %v2077_v7 = vrot.slane %v4239_v4, 5  ;;  %v929_v9 = vld [vmem:[%s5128_s7] sm:$0xe]  ;;  %v930_v10 = vld [vmem:[%s5128_s7 + $0x4] sm:$0xf] }
  0x20   : > { %v931_v11 = vld [vmem:[%s5128_s7 + $0x8] sm:$0x1]  ;;  %v4094_v12 = vrot.slane %v929_v9, 9  ;;  %v1030_v15 = vrot.slane %v930_v10, 5  ;;  %v932_v17 = vld [vmem:[%s5128_s7 + $0xc] sm:$0xe] }
  0x21   : > { %v2078_v13 = vsel %vm5130_vm2, %v4286_v6, %v2077_v7  ;;  %v2079_v14 = vrot.slane %v2077_v7, 4  ;;  %v1033_v16 = vrot.slane %v931_v11, 5  ;;  %v933_v18 = vld [vmem:[%s5128_s7 + $0x10] sm:$0xf]  ;;  %v934_v19 = vld [vmem:[%s5128_s7 + $0x14] sm:$0x1] }
  0x22   : > { %v4095_v20 = vrot.slane %v932_v17, 9  ;;  %v1031_v22 = vsel %vm5130_vm2, %v4094_v12, %v1030_v15  ;;  %v1032_v23 = vrot.slane %v1030_v15, 4  ;;  %v1037_v24 = vrot.slane %v933_v18, 5  ;;  %v381_v25 = vld [vmem:[%s5128_s7] sm:$0xf] }
  0x23   : > { %v2081_v21 = vsel %vm5130_vm2, %v2079_v14, %v2080_v8  ;;  %v382_v26 = vld [vmem:[%s5128_s7 + $0x4] sm:$0xf]  ;;  %v1040_v28 = vrot.slane %v934_v19, 5  ;;  %v383_v29 = vld [vmem:[%s5128_s7 + $0x8] sm:$0x1]  ;;  %v433_v30 = vshrl.u32 %v381_v25, 16 }
  0x24   : > { %v4302_v27 = vcombine.low %v2078_v13, %v2081_v21  ;;  %v436_v31 = vshll.u32 %v381_v25, 16  ;;  %v1034_v32 = vsel %vm5130_vm2, %v1032_v23, %v1033_v16  ;;  %v1038_v33 = vsel %vm5130_vm2, %v4095_v20, %v1037_v24  ;;  %v4241_v36 = vld [vmem:[%s5128_s7 + $0x18] sm:$0xe]  ;;  %v4242_v37 = vld [vmem:[%s5128_s7 + $0x1c] sm:$0xf] }
  0x25   : > { %v1039_v34 = vrot.slane %v1037_v24, 4  ;;  %v442_v35 = vshll.u32 %v382_v26, 16  ;;  %v4110_v38 = vcombine.low %v1031_v22, %v1034_v32  ;;  %v435_v39 = vrot.slane %v433_v30, 4  ;;  %v4243_v42 = vld [vmem:[%s5128_s7 + $0x20] sm:$0x1] }
  0x26   : > { %2235 = vrot.lane.b32.xlu0 %v4302_v27, %s5028_s9  ;;  %v438_v40 = vrot.slane %v436_v31, 5  ;;  %v446_v41 = vshrl.u32 %v382_v26, 16  ;;  %v452_v45 = vshll.u32 %v383_v29, 16  ;;  %v4287_v46 = vrot.slane %v4241_v36, 9  ;;  %v384_v47 = vld [vmem:[%s5128_s7 + $0xc] sm:$0xf] }
  0x27   : > { %v1041_v43 = vsel %vm5130_vm2, %v1039_v34, %v1040_v28  ;;  %v444_v44 = vrot.slane %v442_v35, 5  ;;  %1188 = vrot.lane.b32.xlu1 %v4110_v38, %s5029_s10  ;;  %v2084_v51 = vrot.slane %v4242_v37, 5  ;;  %v385_v52 = vld [vmem:[%s5128_s7 + $0x10] sm:$0xf]  ;;  %v2087_v55 = vrot.slane %v4243_v42, 5 }
  0x28   : > { %v4111_v48 = vcombine.low %v1038_v33, %v1041_v43  ;;  %v439_v49 = vor.u32 %v438_v40, %v435_v39  ;;  %v448_v50 = vrot.slane %v446_v41, 4  ;;  %v454_v54 = vrot.slane %v452_v45, 5  ;;  %v386_v56 = vld [vmem:[%s5128_s7 + $0x14] sm:$0x1]  ;;  %v4177_v63 = vld [vmem:[%s5128_s7 + $0x18] sm:$0xf] }
  0x29   : > { %v457_v57 = vshrl.u32 %v384_v47, 16  ;;  %v460_v58 = vshll.u32 %v384_v47, 16  ;;  %v2085_v61 = vsel %vm5130_vm2, %v4287_v46, %v2084_v51  ;;  %v2086_v62 = vrot.slane %v2084_v51, 4  ;;  %v4178_v5 = vld [vmem:[%s5128_s7 + $0x1c] sm:$0xf] }
  0x2a   : > { %v440_v59 = vrot.slane %v439_v49, 4  ;;  %v449_v60 = vor.u32 %v448_v50, %v444_v44  ;;  %v466_v3 = vshll.u32 %v385_v52, 16  ;;  %v470_v4 = vshrl.u32 %v385_v52, 16  ;;  %v4179_v10 = vld [vmem:[%s5128_s7 + $0x20] sm:$0x1] }
  0x2b   : > { %v459_v1 = vrot.slane %v457_v57, 4  ;;  %v462_v2 = vrot.slane %v460_v58, 5  ;;  %1190 = vrot.lane.b32.xlu1 %v4111_v48, %s5029_s10  ;;  %v2088_v8 = vsel %vm5130_vm2, %v2086_v62, %v2087_v55  ;;  %v476_v9 = vshll.u32 %v386_v56, 16  ;;  %v4174_v11 = vld [vmem:[%s5128_s7 + $0xc] sm:$0xf] }
  0x2c   : > { %v445_v6 = vsel %vm5171_vm5, %v440_v59, %v444_v44  ;;  %v450_v7 = vrot.slane %v449_v60, 4  ;;  %v4303_v12 = vcombine.low %v2085_v61, %v2088_v8  ;;  %v468_v14 = vrot.slane %v466_v3, 5  ;;  %v4175_v28 = vld [vmem:[%s5128_s7 + $0x10] sm:$0xf]  ;;  %v4176_v32 = vld [vmem:[%s5128_s7 + $0x14] sm:$0x1] }
  0x2d   : > { %v463_v13 = vor.u32 %v462_v2, %v459_v1  ;;  %v472_v15 = vrot.slane %v470_v4, 4  ;;  %v478_v17 = vrot.slane %v476_v9, 5  ;;  %v1507_v18 = vshrl.u32 %v4177_v63, 16  ;;  %v4366_v38 = vld [vmem:[%s5128_s7 + $0x18] sm:$0xf] }
  0x2e   : > { %v455_v16 = vsel %vm5171_vm5, %v450_v7, %v454_v54  ;;  %v1510_v19 = vshll.u32 %v4177_v63, 16  ;;  %v1516_v23 = vshll.u32 %v4178_v5, 16  ;;  %v1520_v26 = vshrl.u32 %v4178_v5, 16  ;;  %v4367_v47 = vld [vmem:[%s5128_s7 + $0x1c] sm:$0xf] }
  0x2f   : > { %v4078_v20 = vcombine.low %v445_v6, %v455_v16  ;;  %v464_v21 = vrot.slane %v463_v13, 4  ;;  %v473_v22 = vor.u32 %v472_v15, %v468_v14  ;;  %2237 = vrot.lane.b32.xlu1 %v4303_v12, %s5028_s9  ;;  %v1509_v24 = vrot.slane %v1507_v18, 4  ;;  %v4368_v56 = vld [vmem:[%s5128_s7 + $0x20] sm:$0x1]  ;;  %v4369_v62 = vld [vmem:[%s5128_s7 + $0x24] sm:$0xf] }
  0x30   : > { %v1512_v25 = vrot.slane %v1510_v19, 5  ;;  %v1526_v27 = vshll.u32 %v4179_v10, 16  ;;  %v1518_v31 = vrot.slane %v1516_v23, 5  ;;  %v1483_v33 = vshrl.u32 %v4174_v11, 16  ;;  %v4370_v4 = vld [vmem:[%s5128_s7 + $0x28] sm:$0xf] }
  0x31   : > { %864 = vrot.lane.b32.xlu0 %v4078_v20, %s5030_s11  ;;  %v469_v29 = vsel %vm5171_vm5, %v464_v21, %v468_v14  ;;  %v474_v30 = vrot.slane %v473_v22, 4  ;;  %v1522_v35 = vrot.slane %v1520_v26, 4  ;;  %v1486_v37 = vshll.u32 %v4174_v11, 16  ;;  %v4371_v12 = vld [vmem:[%s5128_s7 + $0x2c] sm:$0x1]  ;;  %v4839_v16 = vld [vmem:[%s5128_s7 + $0x24] sm:$0xff]  }
  0x32   : > { %v1513_v34 = vor.u32 %v1512_v25, %v1509_v24  ;;  %v1528_v36 = vrot.slane %v1526_v27, 5  ;;  %v1485_v40 = vrot.slane %v1483_v33, 4  ;;  %v1492_v41 = vshll.u32 %v4175_v28, 16  ;;  %v4430_v14 = vld [vmem:[%s5128_s7 + $0x18] sm:$0xe] }
  0x33   : > { %v479_v39 = vsel %vm5171_vm5, %v474_v30, %v478_v17  ;;  %v1496_v42 = vshrl.u32 %v4175_v28, 16  ;;  %v1523_v45 = vor.u32 %v1522_v35, %v1518_v31  ;;  %v1488_v46 = vrot.slane %v1486_v37, 5  ;;  %v4431_v20 = vld [vmem:[%s5128_s7 + $0x1c] sm:$0xf]  ;;  %v4432_v25 = vld [vmem:[%s5128_s7 + $0x20] sm:$0x1] }
  0x34   : > { %v4079_v43 = vcombine.low %v469_v29, %v479_v39  ;;  %v1514_v44 = vrot.slane %v1513_v34, 4  ;;  %v1494_v48 = vrot.slane %v1492_v41, 5  ;;  %v1502_v50 = vshll.u32 %v4176_v32, 16  ;;  %v387_v30 = vld [vmem:[%s5128_s7 + $0x18] sm:$0xf] }
  0x35   : > { %v1498_v49 = vrot.slane %v1496_v42, 4  ;;  %v2530_v51 = vshrl.u32 %v4366_v38, 16  ;;  %v1524_v54 = vrot.slane %v1523_v45, 4  ;;  %v1489_v55 = vor.u32 %v1488_v46, %v1485_v40  ;;  %v389_v41 = vld [vmem:[%s5128_s7 + $0x20] sm:$0x1] }
  0x36   : > { %866 = vrot.lane.b32.xlu0 %v4079_v43, %s5030_s11  ;;  %v1519_v52 = vsel %vm5171_vm5, %v1514_v44, %v1518_v31  ;;  %v2533_v57 = vshll.u32 %v4366_v38, 16  ;;  %v1504_v59 = vrot.slane %v1502_v50, 5  ;;  %v2539_v61 = vshll.u32 %v4367_v47, 16  ;;  %v4838_v31 = vld [vmem:[%s5128_s7 + $0x18] sm:$0xff]   ;;  %v4433_v42 = vld [vmem:[%s5128_s7 + $0x24] sm:$0xe] }
  0x37   : > { %v1499_v58 = vor.u32 %v1498_v49, %v1494_v48  ;;  %v2532_v60 = vrot.slane %v2530_v51, 4  ;;  %v1529_v63 = vsel %vm5171_vm5, %v1524_v54, %v1528_v36  ;;  %v1490_v1 = vrot.slane %v1489_v55, 4  ;;  %v388_v36 = vld [vmem:[%s5128_s7 + $0x1c] sm:$0xf]  ;;  %v390_v54 = vld [vmem:[%s5128_s7 + $0x24] sm:$0xf] }
  0x38   : > { %v2535_v2 = vrot.slane %v2533_v57, 5  ;;  %v2543_v3 = vshrl.u32 %v4367_v47, 16  ;;  %v4223_v5 = vcombine.low %v1519_v52, %v1529_v63  ;;  %v2541_v7 = vrot.slane %v2539_v61, 5  ;;  %v4434_v47 = vld [vmem:[%s5128_s7 + $0x28] sm:$0xf] }
  0x39   : > { %v1500_v6 = vrot.slane %v1499_v58, 4  ;;  %v2549_v8 = vshll.u32 %v4368_v56, 16  ;;  %v1495_v9 = vsel %vm5171_vm5, %v1490_v1, %v1494_v48  ;;  %v2554_v13 = vshrl.u32 %v4369_v62, 16  ;;  %v4435_v48 = vld [vmem:[%s5128_s7 + $0x2c] sm:$0x1] }
  0x3a   : > { %v2536_v10 = vor.u32 %v2535_v2, %v2532_v60  ;;  %v2545_v11 = vrot.slane %v2543_v3, 4  ;;  %1916 = vrot.lane.b32.xlu1 %v4223_v5, %s5031_s12  ;;  %v2557_v18 = vshll.u32 %v4369_v62, 16  ;;  %v2563_v19 = vshll.u32 %v4370_v4, 16 }
  0x3b   : > { %v1505_v15 = vsel %vm5171_vm5, %v1500_v6, %v1504_v59  ;;  %v2551_v17 = vrot.slane %v2549_v8, 5  ;;  %v2556_v24 = vrot.slane %v2554_v13, 4  ;;  %v2567_v28 = vshrl.u32 %v4370_v4, 16  ;;  %v391_v8 = vld [vmem:[%s5128_s7 + $0x28] sm:$0xf] }
  0x3c   : > { %v4222_v21 = vcombine.low %v1495_v9, %v1505_v15  ;;  %v2537_v22 = vrot.slane %v2536_v10, 4  ;;  %v2546_v23 = vor.u32 %v2545_v11, %v2541_v7  ;;  %v2559_v26 = vrot.slane %v2557_v18, 5 }
  0x3d   : > { %v2565_v27 = vrot.slane %v2563_v19, 5  ;;  %v2573_v29 = vshll.u32 %v4371_v12, 16  ;;  %v4478_v34 = vrot.slane %v4430_v14, 9  ;;  %v3124_v35 = vrot.slane %v4431_v20, 5  ;;  %v392_v12 = vld [vmem:[%s5128_s7 + $0x2c] sm:$0x1] }
  0x3e   : > { %1914 = vrot.lane.b32.xlu0 %v4222_v21, %s5031_s12  ;;  %v2542_v32 = vsel %vm5171_vm5, %v2537_v22, %v2541_v7  ;;  %v2547_v33 = vrot.slane %v2546_v23, 4  ;;  %2418 = vrot.lane.b32.xlu1 %v4839_v16, %s5032_s13  ;;  %v2560_v37 = vor.u32 %v2559_v26, %v2556_v24  ;;  %v2569_v38 = vrot.slane %v2567_v28, 4  ;;  %v935_v14 = vld [vmem:[%s5128_s7 + $0x18] sm:$0xe]  ;;  %v936_v19 = vld [vmem:[%s5128_s7 + $0x1c] sm:$0xf] }
  0x3f   : > { %v2575_v39 = vrot.slane %v2573_v29, 5  ;;  %v3127_v40 = vrot.slane %v4432_v25, 5  ;;  %v3125_v44 = vsel %vm5130_vm2, %v4478_v34, %v3124_v35  ;;  %v3126_v45 = vrot.slane %v3124_v35, 4  ;;  %v937_v24 = vld [vmem:[%s5128_s7 + $0x20] sm:$0x1] }
  0x40   : > { %v2552_v43 = vsel %vm5171_vm5, %v2547_v33, %v2551_v17  ;;  %v481_v46 = vshrl.u32 %v387_v30, 16  ;;  %v2561_v50 = vrot.slane %v2560_v37, 4  ;;  %v2570_v51 = vor.u32 %v2569_v38, %v2565_v27  ;;  %v938_v29 = vld [vmem:[%s5128_s7 + $0x24] sm:$0xe]  ;;  %v940_v35 = vld [vmem:[%s5128_s7 + $0x2c] sm:$0x1] }
  0x41   : > { %v4414_v49 = vcombine.low %v2542_v32, %v2552_v43  ;;  %v484_v52 = vshll.u32 %v387_v30, 16  ;;  %v3128_v55 = vsel %vm5130_vm2, %v3126_v45, %v3127_v40  ;;  %v490_v57 = vshll.u32 %v388_v36, 16  ;;  %v939_v30 = vld [vmem:[%s5128_s7 + $0x28] sm:$0xf] }
  0x42   : > { %2416 = vrot.lane.b32.xlu0 %v4838_v31, %s5032_s13  ;;  %v483_v56 = vrot.slane %v481_v46, 4  ;;  %v494_v58 = vshrl.u32 %v388_v36, 16  ;;  %v2566_v59 = vsel %vm5171_vm5, %v2561_v50, %v2565_v27  ;;  %v2571_v60 = vrot.slane %v2570_v51, 4  ;;  %v4180_v36 = vld [vmem:[%s5128_s7 + $0x24] sm:$0xf] }
  0x43   : > { %v4494_v61 = vcombine.low %v3125_v44, %v3128_v55  ;;  %v486_v62 = vrot.slane %v484_v52, 5  ;;  %v492_v63 = vrot.slane %v490_v57, 5  ;;  %v500_v2 = vshll.u32 %v389_v41, 16  ;;  %v4181_v41 = vld [vmem:[%s5128_s7 + $0x28] sm:$0xf]  ;;  %v4856_v55 = vld [vmem:[%s6353_s1] sm:$0xff]  }
  0x44   : > { %v496_v1 = vrot.slane %v494_v58, 4  ;;  %v4479_v3 = vrot.slane %v4433_v42, 9  ;;  %v2576_v4 = vsel %vm5171_vm5, %v2571_v60, %v2575_v39  ;;  %v3131_v6 = vrot.slane %v4434_v47, 5  ;;  %4715 = vmatprep.subr.bf16.mxu0 %v4856_v55  ;;  %4753 = vmatprep.subr.bf16.mxu1 %v4856_v55 }
  0x45   : > { %v487_v5 = vor.u32 %v486_v62, %v483_v56  ;;  %v3134_v7 = vrot.slane %v4435_v48, 5  ;;  %v4415_v9 = vcombine.low %v2566_v59, %v2576_v4  ;;  %v502_v11 = vrot.slane %v500_v2, 5  ;;  %v4182_v59 = vld [vmem:[%s5128_s7 + $0x2c] sm:$0x1]  ;;  %v4183_v2 = vld [vmem:[%s5128_s7 + $0x30] sm:$0xf]  ;;  %4716 = vmatpush3.bf16.msra.mxu0 %v4856_v55  ;;  %4756 = vmatpush3.bf16.msra.mxu1 %v4856_v55 }
  0x46   : > { %2961 = vrot.lane.b32.xlu0 %v4414_v49, %s5033_s14  ;;  %v497_v10 = vor.u32 %v496_v1, %v492_v63  ;;  %v505_v13 = vshrl.u32 %v390_v54, 16  ;;  %v3132_v16 = vsel %vm5130_vm2, %v4479_v3, %v3131_v6  ;;  %v3133_v17 = vrot.slane %v3131_v6, 4  ;;  %v4184_v3 = vld [vmem:[%s5128_s7 + $0x34] sm:$0xf] }
  0x47   : > { %v488_v15 = vrot.slane %v487_v5, 4  ;;  %v508_v18 = vshll.u32 %v390_v54, 16  ;;  %2963 = vrot.lane.b32.xlu1 %v4415_v9, %s5033_s14  ;;  %v514_v22 = vshll.u32 %v391_v8, 16  ;;  %v518_v23 = vshrl.u32 %v391_v8, 16  ;;  %v4185_v9 = vld [vmem:[%s5128_s7 + $0x38] sm:$0x1] }
  0x48   : > { %v498_v20 = vrot.slane %v497_v10, 4  ;;  %v507_v21 = vrot.slane %v505_v13, 4  ;;  %v3135_v26 = vsel %vm5130_vm2, %v3133_v17, %v3134_v7  ;;  %v524_v28 = vshll.u32 %v392_v12, 16  ;;  %v4840_v7 = vld [vmem:[%s5128_s7 + $0x24] sm:$0xff]  }
  0x49   : > { %v493_v25 = vsel %vm5171_vm5, %v488_v15, %v492_v63  ;;  %v510_v27 = vrot.slane %v508_v18, 5  ;;  %v4495_v32 = vcombine.low %v3132_v16, %v3135_v26  ;;  %v516_v33 = vrot.slane %v514_v22, 5  ;;  %v4244_v10 = vld [vmem:[%s5128_s7 + $0x24] sm:$0xe]  ;;  %v4245_v15 = vld [vmem:[%s5128_s7 + $0x28] sm:$0xf] }
  0x4a   : > { %3282 = vrot.lane.b32.xlu0 %v4494_v61, %s5034_s24  ;;  %v503_v31 = vsel %vm5171_vm5, %v498_v20, %v502_v11  ;;  %v520_v34 = vrot.slane %v518_v23, 4  ;;  %v526_v39 = vrot.slane %v524_v28, 5  ;;  %v4096_v40 = vrot.slane %v935_v14, 9  ;;  %v4246_v16 = vld [vmem:[%s5128_s7 + $0x2c] sm:$0x1] }
  0x4b   : > { %v4080_v37 = vcombine.low %v493_v25, %v503_v31  ;;  %v511_v38 = vor.u32 %v510_v27, %v507_v21  ;;  %v1044_v43 = vrot.slane %v936_v19, 5  ;;  %v1047_v44 = vrot.slane %v937_v24, 5  ;;  %v4247_v21 = vld [vmem:[%s5128_s7 + $0x30] sm:$0xe]  ;;  %v4248_v26 = vld [vmem:[%s5128_s7 + $0x34] sm:$0xf] }
  0x4c   : > { %v521_v42 = vor.u32 %v520_v34, %v516_v33  ;;  %v4097_v45 = vrot.slane %v938_v29, 9  ;;  %v1051_v47 = vrot.slane %v939_v30, 5  ;;  %v1054_v48 = vrot.slane %v940_v35, 5  ;;  %v4249_v31 = vld [vmem:[%s5128_s7 + $0x38] sm:$0x1] }
  0x4d   : > { %868 = vrot.lane.b32.xlu1 %v4080_v37, %s5030_s11  ;;  %v512_v46 = vrot.slane %v511_v38, 4  ;;  %v1531_v49 = vshrl.u32 %v4180_v36, 16  ;;  %v1045_v51 = vsel %vm5130_vm2, %v4096_v40, %v1044_v43  ;;  %v1046_v52 = vrot.slane %v1044_v43, 4  ;;  %v4841_v37 = vld [vmem:[%s5128_s7 + $0x30] sm:$0xff]  }
  0x4e   : > { %3284 = vrot.lane.b32.xlu0 %v4495_v32, %s5034_s24  ;;  %v522_v50 = vrot.slane %v521_v42, 4  ;;  %v1534_v54 = vshll.u32 %v4180_v36, 16  ;;  %v1052_v57 = vsel %vm5130_vm2, %v4097_v45, %v1051_v47  ;;  %v1053_v58 = vrot.slane %v1051_v47, 4  ;;  %v4858_v32 = vld [vmem:[%s6353_s1 + $0x8] sm:$0xff]  }
  0x4f   : > { %v517_v56 = vsel %vm5171_vm5, %v512_v46, %v516_v33  ;;  %v1533_v60 = vrot.slane %v1531_v49, 4  ;;  %v1048_v62 = vsel %vm5130_vm2, %v1046_v52, %v1047_v44  ;;  %v1540_v1 = vshll.u32 %v4181_v41, 16  ;;  %v4372_v46 = vld [vmem:[%s5128_s7 + $0x30] sm:$0xf]  ;;  %4717 = vmatprep.subr.bf16.mxu0 %v4858_v32  ;;  %4754 = vmatprep.subr.bf16.mxu1 %v4858_v32 }
  0x50   : > { %v527_v61 = vsel %vm5171_vm5, %v522_v50, %v526_v39  ;;  %v1536_v63 = vrot.slane %v1534_v54, 5  ;;  %v4112_v5 = vcombine.low %v1045_v51, %v1048_v62  ;;  %v1055_v6 = vsel %vm5130_vm2, %v1053_v58, %v1054_v48  ;;  %v4373_v51 = vld [vmem:[%s5128_s7 + $0x34] sm:$0xf]  ;;  %4718 = vmatpush3.bf16.msra.mxu0 %v4858_v32  ;;  %4757 = vmatpush3.bf16.msra.mxu1 %v4858_v32  ;;  %v4375_v62 = vld [vmem:[%s5128_s7 + $0x3c] sm:$0xf] }
  0x51   : > { %v4081_v4 = vcombine.low %v517_v56, %v527_v61  ;;  %v1544_v8 = vshrl.u32 %v4181_v41, 16  ;;  %v4113_v11 = vcombine.low %v1052_v57, %v1055_v6  ;;  %v1542_v13 = vrot.slane %v1540_v1, 5 }
  0x52   : > { %v1537_v12 = vor.u32 %v1536_v63, %v1533_v60  ;;  %v1550_v14 = vshll.u32 %v4182_v59, 16  ;;  %1192 = vrot.lane.b32.xlu0 %v4112_v5, %s5029_s10  ;;  %v1555_v18 = vshrl.u32 %v4183_v2, 16  ;;  %v1558_v19 = vshll.u32 %v4183_v2, 16  ;;  %v4374_v59 = vld [vmem:[%s5128_s7 + $0x38] sm:$0x1] }
  0x53   : > { %870 = vrot.lane.b32.xlu1 %v4081_v4, %s5030_s11  ;;  %v1546_v17 = vrot.slane %v1544_v8, 4  ;;  %v1564_v20 = vshll.u32 %v4184_v3, 16  ;;  %v1568_v24 = vshrl.u32 %v4184_v3, 16  ;;  %v1574_v25 = vshll.u32 %v4185_v9, 16  ;;  %v4376_v4 = vld [vmem:[%s5128_s7 + $0x40] sm:$0xf] }
  0x54   : > { %v1538_v22 = vrot.slane %v1537_v12, 4  ;;  %v1552_v23 = vrot.slane %v1550_v14, 5  ;;  %v1557_v28 = vrot.slane %v1555_v18, 4  ;;  %v1560_v29 = vrot.slane %v1558_v19, 5  ;;  %v4377_v5 = vld [vmem:[%s5128_s7 + $0x44] sm:$0x1] }
  0x55   : > { %v1547_v27 = vor.u32 %v1546_v17, %v1542_v13  ;;  %v1566_v30 = vrot.slane %v1564_v20, 5  ;;  %v1570_v34 = vrot.slane %v1568_v24, 4  ;;  %v1576_v35 = vrot.slane %v1574_v25, 5  ;;  %v4842_v17 = vld [vmem:[%s5128_s7 + $0x30] sm:$0xff]  }
  0x56   : > { %v1543_v33 = vsel %vm5171_vm5, %v1538_v22, %v1542_v13  ;;  %v4288_v36 = vrot.slane %v4244_v10, 9  ;;  %1373 = vrot.lane.b32.xlu0 %v4840_v7, %s5027_s8  ;;  %v1561_v39 = vor.u32 %v1560_v29, %v1557_v28  ;;  %v2091_v40 = vrot.slane %v4245_v15, 5  ;;  %v4436_v10 = vld [vmem:[%s5128_s7 + $0x30] sm:$0xe] }
  0x57   : > { %1194 = vrot.lane.b32.xlu1 %v4113_v11, %s5029_s10  ;;  %v1548_v38 = vrot.slane %v1547_v27, 4  ;;  %v2094_v41 = vrot.slane %v4246_v16, 5  ;;  %v1571_v42 = vor.u32 %v1570_v34, %v1566_v30  ;;  %v4289_v43 = vrot.slane %v4247_v21, 9  ;;  %v4437_v11 = vld [vmem:[%s5128_s7 + $0x34] sm:$0xf] }
  0x58   : > { %v2098_v44 = vrot.slane %v4248_v26, 5  ;;  %v2101_v45 = vrot.slane %v4249_v31, 5  ;;  %v1562_v48 = vrot.slane %v1561_v39, 4  ;;  %v2092_v49 = vsel %vm5130_vm2, %v4288_v36, %v2091_v40  ;;  %v4438_v16 = vld [vmem:[%s5128_s7 + $0x38] sm:$0x1]  ;;  %v4843_v36 = vld [vmem:[%s5128_s7 + $0x3c] sm:$0xff]  }
  0x59   : > { %v1553_v47 = vsel %vm5171_vm5, %v1548_v38, %v1552_v23  ;;  %v2093_v50 = vrot.slane %v2091_v40, 4  ;;  %v1572_v54 = vrot.slane %v1571_v42, 4  ;;  %v2578_v60 = vshrl.u32 %v4372_v46, 16  ;;  %v393_v22 = vld [vmem:[%s5128_s7 + $0x30] sm:$0xf] }
  0x5a   : > { %v4224_v52 = vcombine.low %v1543_v33, %v1553_v47  ;;  %v2099_v55 = vsel %vm5130_vm2, %v4289_v43, %v2098_v44  ;;  %v2100_v56 = vrot.slane %v2098_v44, 4  ;;  %v1567_v57 = vsel %vm5171_vm5, %v1562_v48, %v1566_v30  ;;  %v395_v44 = vld [vmem:[%s5128_s7 + $0x38] sm:$0x1] }
  0x5b   : > { %1375 = vrot.lane.b32.xlu1 %v4841_v37, %s5027_s8  ;;  %v2095_v58 = vsel %vm5130_vm2, %v2093_v50, %v2094_v41  ;;  %v2581_v61 = vshll.u32 %v4372_v46, 16  ;;  %v1577_v63 = vsel %vm5171_vm5, %v1572_v54, %v1576_v35  ;;  %v2587_v3 = vshll.u32 %v4373_v51, 16  ;;  %v394_v35 = vld [vmem:[%s5128_s7 + $0x34] sm:$0xf]  ;;  %v4439_v50 = vld [vmem:[%s5128_s7 + $0x3c] sm:$0xe] }
  0x5c   : > { %1918 = vrot.lane.b32.xlu0 %v4224_v52, %s5031_s12  ;;  %v4304_v1 = vcombine.low %v2092_v49, %v2095_v58  ;;  %v2102_v2 = vsel %vm5130_vm2, %v2100_v56, %v2101_v45  ;;  %v4225_v6 = vcombine.low %v1567_v57, %v1577_v63  ;;  %v2580_v8 = vrot.slane %v2578_v60, 4  ;;  %v4440_v56 = vld [vmem:[%s5128_s7 + $0x40] sm:$0xf]  ;;  %v4441_v57 = vld [vmem:[%s5128_s7 + $0x44] sm:$0x1] }
  0x5d   : > { %v4305_v7 = vcombine.low %v2099_v55, %v2102_v2  ;;  %v2583_v9 = vrot.slane %v2581_v61, 5  ;;  %v2589_v12 = vrot.slane %v2587_v3, 5  ;;  %v2591_v13 = vshrl.u32 %v4373_v51, 16 }
  0x5e   : > { %v2597_v14 = vshll.u32 %v4374_v59, 16  ;;  %v2602_v15 = vshrl.u32 %v4375_v62, 16  ;;  %v2605_v19 = vshll.u32 %v4375_v62, 16  ;;  %v2611_v20 = vshll.u32 %v4376_v4, 16  ;;  %v396_v62 = vld [vmem:[%s5128_s7 + $0x3c] sm:$0xf] }
  0x5f   : > { %1920 = vrot.lane.b32.xlu1 %v4225_v6, %s5031_s12  ;;  %v2584_v18 = vor.u32 %v2583_v9, %v2580_v8  ;;  %v2615_v21 = vshrl.u32 %v4376_v4, 16  ;;  %v2593_v23 = vrot.slane %v2591_v13, 4  ;;  %v2621_v26 = vshll.u32 %v4377_v5, 16  ;;  %v397_v4 = vld [vmem:[%s5128_s7 + $0x40] sm:$0xf] }
  0x60   : > { %2239 = vrot.lane.b32.xlu0 %v4304_v1, %s5028_s9  ;;  %v2599_v24 = vrot.slane %v2597_v14, 5  ;;  %v2604_v25 = vrot.slane %v2602_v15, 4  ;;  %v2607_v28 = vrot.slane %v2605_v19, 5  ;;  %v2613_v29 = vrot.slane %v2611_v20, 5  ;;  %v398_v9 = vld [vmem:[%s5128_s7 + $0x44] sm:$0x1] }
  0x61   : > { %v2585_v27 = vrot.slane %v2584_v18, 4  ;;  %v2617_v30 = vrot.slane %v2615_v21, 4  ;;  %v2594_v31 = vor.u32 %v2593_v23, %v2589_v12  ;;  %v2623_v32 = vrot.slane %v2621_v26, 5  ;;  %v941_v14 = vld [vmem:[%s5128_s7 + $0x30] sm:$0xe] }
  0x62   : > { %v4480_v33 = vrot.slane %v4436_v10, 9  ;;  %v3138_v34 = vrot.slane %v4437_v11, 5  ;;  %v2608_v38 = vor.u32 %v2607_v28, %v2604_v25  ;;  %v3141_v40 = vrot.slane %v4438_v16, 5  ;;  %v942_v19 = vld [vmem:[%s5128_s7 + $0x34] sm:$0xf] }
  0x63   : > { %2241 = vrot.lane.b32.xlu1 %v4305_v7, %s5028_s9  ;;  %v2590_v37 = vsel %vm5171_vm5, %v2585_v27, %v2589_v12  ;;  %v2618_v39 = vor.u32 %v2617_v30, %v2613_v29  ;;  %v2595_v41 = vrot.slane %v2594_v31, 4  ;;  %v529_v45 = vshrl.u32 %v393_v22, 16  ;;  %v943_v20 = vld [vmem:[%s5128_s7 + $0x38] sm:$0x1] }
  0x64   : > { %2420 = vrot.lane.b32.xlu0 %v4842_v17, %s5032_s13  ;;  %v3139_v42 = vsel %vm5130_vm2, %v4480_v33, %v3138_v34  ;;  %v3140_v43 = vrot.slane %v3138_v34, 4  ;;  %v2609_v46 = vrot.slane %v2608_v38, 4  ;;  %v532_v48 = vshll.u32 %v393_v22, 16  ;;  %v945_v34 = vld [vmem:[%s5128_s7 + $0x40] sm:$0xf] }
  0x65   : > { %v2619_v47 = vrot.slane %v2618_v39, 4  ;;  %v538_v49 = vshll.u32 %v394_v35, 16  ;;  %v2600_v51 = vsel %vm5171_vm5, %v2595_v41, %v2599_v24  ;;  %v531_v54 = vrot.slane %v529_v45, 4 }
  0x66   : > { %v3142_v52 = vsel %vm5130_vm2, %v3140_v43, %v3141_v40  ;;  %v542_v55 = vshrl.u32 %v394_v35, 16  ;;  %v4416_v58 = vcombine.low %v2590_v37, %v2600_v51  ;;  %v2614_v59 = vsel %vm5171_vm5, %v2609_v46, %v2613_v29  ;;  %v944_v29 = vld [vmem:[%s5128_s7 + $0x3c] sm:$0xe]  ;;  %v946_v35 = vld [vmem:[%s5128_s7 + $0x44] sm:$0x1] }
  0x67   : > { %2422 = vrot.lane.b32.xlu1 %v4843_v36, %s5032_s13  ;;  %v2624_v60 = vsel %vm5171_vm5, %v2619_v47, %v2623_v32  ;;  %v4496_v61 = vcombine.low %v3139_v42, %v3142_v52  ;;  %v534_v1 = vrot.slane %v532_v48, 5  ;;  %v540_v2 = vrot.slane %v538_v49, 5  ;;  %v4186_v36 = vld [vmem:[%s5128_s7 + $0x3c] sm:$0xf]  ;;  %v4187_v48 = vld [vmem:[%s5128_s7 + $0x40] sm:$0xf] }
  0x68   : > { %v4417_v63 = vcombine.low %v2614_v59, %v2624_v60  ;;  %v544_v3 = vrot.slane %v542_v55, 4  ;;  %2965 = vrot.lane.b32.xlu0 %v4416_v58, %s5033_s14  ;;  %v548_v5 = vshll.u32 %v395_v44, 16  ;;  %v4481_v6 = vrot.slane %v4439_v50, 9  ;;  %v4189_v60 = vld [vmem:[%s5128_s7 + $0x48] sm:$0xf] }
  0x69   : > { %v3145_v7 = vrot.slane %v4440_v56, 5  ;;  %v3148_v8 = vrot.slane %v4441_v57, 5  ;;  %v535_v10 = vor.u32 %v534_v1, %v531_v54  ;;  %v553_v12 = vshrl.u32 %v396_v62, 16  ;;  %v4188_v54 = vld [vmem:[%s5128_s7 + $0x44] sm:$0x1] }
  0x6a   : > { %v545_v11 = vor.u32 %v544_v3, %v540_v2  ;;  %v556_v13 = vshll.u32 %v396_v62, 16  ;;  %v550_v15 = vrot.slane %v548_v5, 5  ;;  %v562_v18 = vshll.u32 %v397_v4, 16 }
  0x6b   : > { %2967 = vrot.lane.b32.xlu1 %v4417_v63, %s5033_s14  ;;  %v3146_v16 = vsel %vm5130_vm2, %v4481_v6, %v3145_v7  ;;  %v3147_v17 = vrot.slane %v3145_v7, 4  ;;  %v536_v21 = vrot.slane %v535_v10, 4  ;;  %v555_v23 = vrot.slane %v553_v12, 4  ;;  %v4191_v7 = vld [vmem:[%s5128_s7 + $0x50] sm:$0x1] }
  0x6c   : > { %v546_v22 = vrot.slane %v545_v11, 4  ;;  %v558_v24 = vrot.slane %v556_v13, 5  ;;  %3286 = vrot.lane.b32.xlu0 %v4496_v61, %s5034_s24  ;;  %v564_v26 = vrot.slane %v562_v18, 5  ;;  %v566_v27 = vshrl.u32 %v397_v4, 16  ;;  %v4844_v11 = vld [vmem:[%s5128_s7 + $0x3c] sm:$0xff]  }
  0x6d   : > { %v3149_v25 = vsel %vm5130_vm2, %v3147_v17, %v3148_v8  ;;  %v572_v28 = vshll.u32 %v398_v9, 16  ;;  %v541_v30 = vsel %vm5171_vm5, %v536_v21, %v540_v2  ;;  %v4098_v40 = vrot.slane %v941_v14, 9  ;;  %v4190_v2 = vld [vmem:[%s5128_s7 + $0x4c] sm:$0xf]  ;;  %v4250_v8 = vld [vmem:[%s5128_s7 + $0x3c] sm:$0xe] }
  0x6e   : > { %v551_v31 = vsel %vm5171_vm5, %v546_v22, %v550_v15  ;;  %v4497_v32 = vcombine.low %v3146_v16, %v3149_v25  ;;  %v559_v33 = vor.u32 %v558_v24, %v555_v23  ;;  %v568_v38 = vrot.slane %v566_v27, 4  ;;  %v4251_v14 = vld [vmem:[%s5128_s7 + $0x40] sm:$0xf]  ;;  %v4252_v15 = vld [vmem:[%s5128_s7 + $0x44] sm:$0x1] }
  0x6f   : > { %v4082_v37 = vcombine.low %v541_v30, %v551_v31  ;;  %v574_v39 = vrot.slane %v572_v28, 5  ;;  %v1058_v42 = vrot.slane %v942_v19, 5  ;;  %v1061_v43 = vrot.slane %v943_v20, 5  ;;  %v4253_v20 = vld [vmem:[%s5128_s7 + $0x48] sm:$0xe] }
  0x70   : > { %v560_v41 = vrot.slane %v559_v33, 4  ;;  %v4099_v44 = vrot.slane %v944_v29, 9  ;;  %3288 = vrot.lane.b32.xlu0 %v4497_v32, %s5034_s24  ;;  %v569_v45 = vor.u32 %v568_v38, %v564_v26  ;;  %v1065_v46 = vrot.slane %v945_v34, 5  ;;  %v4254_v25 = vld [vmem:[%s5128_s7 + $0x4c] sm:$0xf] }
  0x71   : > { %872 = vrot.lane.b32.xlu1 %v4082_v37, %s5030_s11  ;;  %v1068_v47 = vrot.slane %v946_v35, 5  ;;  %v1579_v49 = vshrl.u32 %v4186_v36, 16  ;;  %v1059_v51 = vsel %vm5130_vm2, %v4098_v40, %v1058_v42  ;;  %v1060_v52 = vrot.slane %v1058_v42, 4  ;;  %v4255_v30 = vld [vmem:[%s5128_s7 + $0x50] sm:$0x1] }
  0x72   : > { %v565_v50 = vsel %vm5171_vm5, %v560_v41, %v564_v26  ;;  %v1582_v55 = vshll.u32 %v4186_v36, 16  ;;  %v570_v56 = vrot.slane %v569_v45, 4  ;;  %v1066_v57 = vsel %vm5130_vm2, %v4099_v44, %v1065_v46  ;;  %v4378_v44 = vld [vmem:[%s5128_s7 + $0x48] sm:$0xf] }
  0x73   : > { %v1067_v58 = vrot.slane %v1065_v46, 4  ;;  %v1581_v59 = vrot.slane %v1579_v49, 4  ;;  %v1062_v61 = vsel %vm5130_vm2, %v1060_v52, %v1061_v43  ;;  %v1588_v63 = vshll.u32 %v4187_v48, 16  ;;  %v4379_v49 = vld [vmem:[%s5128_s7 + $0x4c] sm:$0xf] }
  0x74   : > { %v1584_v62 = vrot.slane %v1582_v55, 5  ;;  %v1592_v1 = vshrl.u32 %v4187_v48, 16  ;;  %v575_v3 = vsel %vm5171_vm5, %v570_v56, %v574_v39  ;;  %v4114_v4 = vcombine.low %v1059_v51, %v1062_v61  ;;  %v4845_v39 = vld [vmem:[%s5128_s7 + $0x48] sm:$0xff]   ;;  %v4381_v56 = vld [vmem:[%s5128_s7 + $0x54] sm:$0xf] }
  0x75   : > { %v1069_v5 = vsel %vm5130_vm2, %v1067_v58, %v1068_v47  ;;  %v1598_v6 = vshll.u32 %v4188_v54, 16  ;;  %v4083_v9 = vcombine.low %v565_v50, %v575_v3  ;;  %v1590_v13 = vrot.slane %v1588_v63, 5  ;;  %v4380_v50 = vld [vmem:[%s5128_s7 + $0x50] sm:$0x1] }
  0x76   : > { %v4115_v10 = vcombine.low %v1066_v57, %v1069_v5  ;;  %v1585_v12 = vor.u32 %v1584_v62, %v1581_v59  ;;  %1196 = vrot.lane.b32.xlu0 %v4114_v4, %s5029_s10  ;;  %v1594_v16 = vrot.slane %v1592_v1, 4  ;;  %v1603_v18 = vshrl.u32 %v4189_v60, 16 }
  0x77   : > { %v1600_v17 = vrot.slane %v1598_v6, 5  ;;  %v1606_v19 = vshll.u32 %v4189_v60, 16  ;;  %874 = vrot.lane.b32.xlu1 %v4083_v9, %s5030_s11  ;;  %v1612_v22 = vshll.u32 %v4190_v2, 16  ;;  %v1616_v23 = vshrl.u32 %v4190_v2, 16  ;;  %v4382_v2 = vld [vmem:[%s5128_s7 + $0x58] sm:$0xf] }
  0x78   : > { %v1586_v21 = vrot.slane %v1585_v12, 4  ;;  %v1622_v24 = vshll.u32 %v4191_v7, 16  ;;  %v1595_v26 = vor.u32 %v1594_v16, %v1590_v13  ;;  %v1605_v27 = vrot.slane %v1603_v18, 4  ;;  %v4383_v7 = vld [vmem:[%s5128_s7 + $0x5c] sm:$0x1] }
  0x79   : > { %v1608_v28 = vrot.slane %v1606_v19, 5  ;;  %v4290_v29 = vrot.slane %v4250_v8, 9  ;;  %v1614_v32 = vrot.slane %v1612_v22, 5  ;;  %v1618_v33 = vrot.slane %v1616_v23, 4  ;;  %v4442_v12 = vld [vmem:[%s5128_s7 + $0x48] sm:$0xe] }
  0x7a   : > { %v1591_v31 = vsel %vm5171_vm5, %v1586_v21, %v1590_v13  ;;  %v1624_v34 = vrot.slane %v1622_v24, 5  ;;  %1377 = vrot.lane.b32.xlu0 %v4844_v11, %s5027_s8  ;;  %v1596_v35 = vrot.slane %v1595_v26, 4  ;;  %v2105_v37 = vrot.slane %v4251_v14, 5  ;;  %v4846_v13 = vld [vmem:[%s5128_s7 + $0x48] sm:$0xff]   ;;  %v4444_v23 = vld [vmem:[%s5128_s7 + $0x50] sm:$0x1] }
  0x7b   : > { %v1609_v36 = vor.u32 %v1608_v28, %v1605_v27  ;;  %v2108_v38 = vrot.slane %v4252_v15, 5  ;;  %1198 = vrot.lane.b32.xlu1 %v4115_v10, %s5029_s10  ;;  %v1619_v40 = vor.u32 %v1618_v33, %v1614_v32  ;;  %v4291_v41 = vrot.slane %v4253_v20, 9  ;;  %v4443_v18 = vld [vmem:[%s5128_s7 + $0x4c] sm:$0xf]  ;;  %v399_v28 = vld [vmem:[%s5128_s7 + $0x48] sm:$0xf] }
  0x7c   : > { %v2112_v42 = vrot.slane %v4254_v25, 5  ;;  %v2115_v43 = vrot.slane %v4255_v30, 5  ;;  %v1601_v45 = vsel %vm5171_vm5, %v1596_v35, %v1600_v17  ;;  %v2106_v47 = vsel %vm5130_vm2, %v4290_v29, %v2105_v37  ;;  %v400_v33 = vld [vmem:[%s5128_s7 + $0x4c] sm:$0xf] }
  0x7d   : > { %v1610_v46 = vrot.slane %v1609_v36, 4  ;;  %v2107_v48 = vrot.slane %v2105_v37, 4  ;;  %v4226_v51 = vcombine.low %v1591_v31, %v1601_v45  ;;  %v1620_v52 = vrot.slane %v1619_v40, 4  ;;  %v4446_v45 = vld [vmem:[%s5128_s7 + $0x58] sm:$0xf] }
  0x7e   : > { %v2113_v54 = vsel %vm5130_vm2, %v4291_v41, %v2112_v42  ;;  %v2114_v55 = vrot.slane %v2112_v42, 4  ;;  %v2626_v59 = vshrl.u32 %v4378_v44, 16  ;;  %v2629_v60 = vshll.u32 %v4378_v44, 16  ;;  %v401_v42 = vld [vmem:[%s5128_s7 + $0x50] sm:$0x1] }
  0x7f   : > { %v1615_v57 = vsel %vm5171_vm5, %v1610_v46, %v1614_v32  ;;  %v2109_v58 = vsel %vm5130_vm2, %v2107_v48, %v2108_v38  ;;  %1379 = vrot.lane.b32.xlu1 %v4845_v39, %s5027_s8  ;;  %1922 = vrot.lane.b32.xlu0 %v4226_v51, %s5031_s12  ;;  %v1625_v61 = vsel %vm5171_vm5, %v1620_v52, %v1624_v34  ;;  %v2635_v1 = vshll.u32 %v4379_v49, 16  ;;  %v4847_v38 = vld [vmem:[%s5128_s7 + $0x54] sm:$0xff]  }
  0x80   : > { %v4306_v62 = vcombine.low %v2106_v47, %v2109_v58  ;;  %v2116_v63 = vsel %vm5130_vm2, %v2114_v55, %v2115_v43  ;;  %v4227_v3 = vcombine.low %v1615_v57, %v1625_v61  ;;  %v2628_v5 = vrot.slane %v2626_v59, 4  ;;  %v4445_v44 = vld [vmem:[%s5128_s7 + $0x54] sm:$0xe] }
  0x81   : > { %v4307_v4 = vcombine.low %v2113_v54, %v2116_v63  ;;  %v2631_v6 = vrot.slane %v2629_v60, 5  ;;  %v2637_v8 = vrot.slane %v2635_v1, 5  ;;  %v2639_v9 = vshrl.u32 %v4379_v49, 16  ;;  %v402_v60 = vld [vmem:[%s5128_s7 + $0x54] sm:$0xf] }
  0x82   : > { %v2645_v10 = vshll.u32 %v4380_v50, 16  ;;  %v2650_v11 = vshrl.u32 %v4381_v56, 16  ;;  %v2653_v15 = vshll.u32 %v4381_v56, 16  ;;  %v2659_v16 = vshll.u32 %v4382_v2, 16  ;;  %v4447_v50 = vld [vmem:[%s5128_s7 + $0x5c] sm:$0x1] }
  0x83   : > { %v2632_v14 = vor.u32 %v2631_v6, %v2628_v5  ;;  %v2663_v17 = vshrl.u32 %v4382_v2, 16  ;;  %1924 = vrot.lane.b32.xlu1 %v4227_v3, %s5031_s12  ;;  %2243 = vrot.lane.b32.xlu0 %v4306_v62, %s5028_s9  ;;  %v2641_v19 = vrot.slane %v2639_v9, 4  ;;  %v2669_v22 = vshll.u32 %v4383_v7, 16  ;;  %v403_v2 = vld [vmem:[%s5128_s7 + $0x58] sm:$0xf] }
  0x84   : > { %v2647_v20 = vrot.slane %v2645_v10, 5  ;;  %v2652_v21 = vrot.slane %v2650_v11, 4  ;;  %v2655_v25 = vrot.slane %v2653_v15, 5  ;;  %v2661_v26 = vrot.slane %v2659_v16, 5  ;;  %v404_v9 = vld [vmem:[%s5128_s7 + $0x5c] sm:$0x1] }
  0x85   : > { %v2633_v24 = vrot.slane %v2632_v14, 4  ;;  %v2665_v27 = vrot.slane %v2663_v17, 4  ;;  %v2642_v29 = vor.u32 %v2641_v19, %v2637_v8  ;;  %v2671_v30 = vrot.slane %v2669_v22, 5  ;;  %v948_v17 = vld [vmem:[%s5128_s7 + $0x4c] sm:$0xf] }
  0x86   : > { %v4482_v31 = vrot.slane %v4442_v12, 9  ;;  %v3152_v32 = vrot.slane %v4443_v18, 5  ;;  %v2656_v35 = vor.u32 %v2655_v25, %v2652_v21  ;;  %v3155_v37 = vrot.slane %v4444_v23, 5  ;;  %v947_v12 = vld [vmem:[%s5128_s7 + $0x48] sm:$0xe] }
  0x87   : > { %v2638_v34 = vsel %vm5171_vm5, %v2633_v24, %v2637_v8  ;;  %v2666_v36 = vor.u32 %v2665_v27, %v2661_v26  ;;  %2245 = vrot.lane.b32.xlu1 %v4307_v4, %s5028_s9  ;;  %2424 = vrot.lane.b32.xlu0 %v4846_v13, %s5032_s13  ;;  %v2643_v39 = vrot.slane %v2642_v29, 4  ;;  %v577_v43 = vshrl.u32 %v399_v28, 16  ;;  %v949_v18 = vld [vmem:[%s5128_s7 + $0x50] sm:$0x1]  ;;  %v950_v19 = vld [vmem:[%s5128_s7 + $0x54] sm:$0xe] }
  0x88   : > { %v3153_v40 = vsel %vm5130_vm2, %v4482_v31, %v3152_v32  ;;  %v3154_v41 = vrot.slane %v3152_v32, 4  ;;  %v2657_v46 = vrot.slane %v2656_v35, 4  ;;  %v580_v48 = vshll.u32 %v399_v28, 16  ;;  %v951_v32 = vld [vmem:[%s5128_s7 + $0x58] sm:$0xf] }
  0x89   : > { %v2667_v47 = vrot.slane %v2666_v36, 4  ;;  %v586_v49 = vshll.u32 %v400_v33, 16  ;;  %v2648_v51 = vsel %vm5171_vm5, %v2643_v39, %v2647_v20  ;;  %v579_v54 = vrot.slane %v577_v43, 4  ;;  %v4193_v43 = vld [vmem:[%s5128_s7 + $0x58] sm:$0xf] }
  0x8a   : > { %v3156_v52 = vsel %vm5130_vm2, %v3154_v41, %v3155_v37  ;;  %v590_v55 = vshrl.u32 %v400_v33, 16  ;;  %v4418_v56 = vcombine.low %v2638_v34, %v2648_v51  ;;  %v2662_v57 = vsel %vm5171_vm5, %v2657_v46, %v2661_v26  ;;  %v952_v33 = vld [vmem:[%s5128_s7 + $0x5c] sm:$0x1]  ;;  %v4192_v34 = vld [vmem:[%s5128_s7 + $0x54] sm:$0xf] }
  0x8b   : > { %v2672_v58 = vsel %vm5171_vm5, %v2667_v47, %v2671_v30  ;;  %v4498_v59 = vcombine.low %v3153_v40, %v3156_v52  ;;  %2426 = vrot.lane.b32.xlu1 %v4847_v38, %s5032_s13  ;;  %v582_v62 = vrot.slane %v580_v48, 5  ;;  %v588_v63 = vrot.slane %v586_v49, 5  ;;  %v4194_v47 = vld [vmem:[%s5128_s7 + $0x5c] sm:$0x1] }
  0x8c   : > { %v4419_v61 = vcombine.low %v2662_v57, %v2672_v58  ;;  %v592_v1 = vrot.slane %v590_v55, 4  ;;  %2969 = vrot.lane.b32.xlu0 %v4418_v56, %s5033_s14  ;;  %v596_v3 = vshll.u32 %v401_v42, 16  ;;  %v4483_v4 = vrot.slane %v4445_v44, 9 }
  0x8d   : > { %v3159_v5 = vrot.slane %v4446_v45, 5  ;;  %v3162_v6 = vrot.slane %v4447_v50, 5  ;;  %v583_v7 = vor.u32 %v582_v62, %v579_v54  ;;  %v601_v10 = vshrl.u32 %v402_v60, 16 }
  0x8e   : > { %v593_v8 = vor.u32 %v592_v1, %v588_v63  ;;  %v604_v11 = vshll.u32 %v402_v60, 16  ;;  %v598_v13 = vrot.slane %v596_v3, 5  ;;  %v610_v16 = vshll.u32 %v403_v2, 16 }
  0x8f   : > { %v3160_v14 = vsel %vm5130_vm2, %v4483_v4, %v3159_v5  ;;  %v3161_v15 = vrot.slane %v3159_v5, 4  ;;  %2971 = vrot.lane.b32.xlu1 %v4419_v61, %s5033_s14  ;;  %v584_v20 = vrot.slane %v583_v7, 4  ;;  %v603_v22 = vrot.slane %v601_v10, 4  ;;  %v4197_v7 = vld [vmem:[%s5128_s7 + $0x68] sm:$0x1] }
  0x90   : > { %v594_v21 = vrot.slane %v593_v8, 4  ;;  %v606_v23 = vrot.slane %v604_v11, 5  ;;  %3290 = vrot.lane.b32.xlu0 %v4498_v59, %s5034_s24  ;;  %v612_v25 = vrot.slane %v610_v16, 5  ;;  %v614_v26 = vshrl.u32 %v403_v2, 16  ;;  %v5482_v54 = vpop.permute.xlu1 %1371  ;;  %v4195_v59 = vld [vmem:[%s5128_s7 + $0x60] sm:$0xf]  ;;  %v5487_v60 = vpop.permute.xlu0 %1369 }
  0x91   : > { %v3163_v24 = vsel %vm5130_vm2, %v3161_v15, %v3162_v6  ;;  %v620_v27 = vshll.u32 %v404_v9, 16  ;;  %v589_v28 = vsel %vm5171_vm5, %v584_v20, %v588_v63  ;;  %v4100_v38 = vrot.slane %v947_v12, 9  ;;  %v4196_v2 = vld [vmem:[%s5128_s7 + $0x64] sm:$0xf]  ;;  %v4256_v8 = vld [vmem:[%s5128_s7 + $0x54] sm:$0xe] }
  0x92   : > { %v599_v29 = vsel %vm5171_vm5, %v594_v21, %v598_v13  ;;  %v4499_v30 = vcombine.low %v3160_v14, %v3163_v24  ;;  %v607_v31 = vor.u32 %v606_v23, %v603_v22  ;;  %v616_v36 = vrot.slane %v614_v26, 4  ;;  %v4848_v11 = vld [vmem:[%s5128_s7 + $0x54] sm:$0xff]   ;;  %v4258_v15 = vld [vmem:[%s5128_s7 + $0x5c] sm:$0x1]  ;;  %v4259_v20 = vld [vmem:[%s5128_s7 + $0x60] sm:$0xe] }
  0x93   : > { %v4084_v35 = vcombine.low %v589_v28, %v599_v29  ;;  %v622_v37 = vrot.slane %v620_v27, 5  ;;  %v1072_v40 = vrot.slane %v948_v17, 5  ;;  %v1075_v41 = vrot.slane %v949_v18, 5  ;;  %v4257_v14 = vld [vmem:[%s5128_s7 + $0x58] sm:$0xf] }
  0x94   : > { %v608_v39 = vrot.slane %v607_v31, 4  ;;  %v4101_v42 = vrot.slane %v950_v19, 9  ;;  %3292 = vrot.lane.b32.xlu0 %v4499_v30, %s5034_s24  ;;  %v617_v44 = vor.u32 %v616_v36, %v612_v25  ;;  %v1079_v45 = vrot.slane %v951_v32, 5  ;;  %v4261_v31 = vld [vmem:[%s5128_s7 + $0x68] sm:$0x1] }
  0x95   : > { %876 = vrot.lane.b32.xlu1 %v4084_v35, %s5030_s11  ;;  %v1082_v46 = vrot.slane %v952_v33, 5  ;;  %v1627_v48 = vshrl.u32 %v4192_v34, 16  ;;  %v1073_v50 = vsel %vm5130_vm2, %v4100_v38, %v1072_v40  ;;  %v1074_v51 = vrot.slane %v1072_v40, 4 }
  0x96   : > { %v613_v49 = vsel %vm5171_vm5, %v608_v39, %v612_v25  ;;  %v1630_v52 = vshll.u32 %v4192_v34, 16  ;;  %v618_v55 = vrot.slane %v617_v44, 4  ;;  %v1080_v56 = vsel %vm5130_vm2, %v4101_v42, %v1079_v45  ;;  %v4260_v25 = vld [vmem:[%s5128_s7 + $0x64] sm:$0xf] }
  0x97   : > { %v1081_v57 = vrot.slane %v1079_v45, 4  ;;  %v1629_v58 = vrot.slane %v1627_v48, 4  ;;  %v1076_v61 = vsel %vm5130_vm2, %v1074_v51, %v1075_v41  ;;  %v1636_v63 = vshll.u32 %v4193_v43, 16  ;;  %v4384_v41 = vld [vmem:[%s5128_s7 + $0x60] sm:$0xf] }
  0x98   : > { %v1632_v62 = vrot.slane %v1630_v52, 5  ;;  %v1640_v1 = vshrl.u32 %v4193_v43, 16  ;;  %v623_v3 = vsel %vm5171_vm5, %v618_v55, %v622_v37  ;;  %v4116_v4 = vcombine.low %v1073_v50, %v1076_v61  ;;  %v5508_v32 = vpop.permute.xlu0 %2235  ;;  %v4849_v42 = vld [vmem:[%s5128_s7 + $0x60] sm:$0xff]  }
  0x99   : > { %v1083_v5 = vsel %vm5130_vm2, %v1081_v57, %v1082_v46  ;;  %v1646_v6 = vshll.u32 %v4194_v47, 16  ;;  %v4085_v9 = vcombine.low %v613_v49, %v623_v3  ;;  %v1638_v13 = vrot.slane %v1636_v63, 5  ;;  %v5505_v26 = vpop.permute.xlu1 %1188  ;;  %v4385_v47 = vld [vmem:[%s5128_s7 + $0x64] sm:$0xf] }
  0x9a   : > { %v4117_v10 = vcombine.low %v1080_v56, %v1083_v5  ;;  %v1633_v12 = vor.u32 %v1632_v62, %v1629_v58  ;;  %1200 = vrot.lane.b32.xlu0 %v4116_v4, %s5029_s10  ;;  %v1642_v16 = vrot.slane %v1640_v1, 4  ;;  %v1651_v18 = vshrl.u32 %v4195_v59, 16  ;;  %v4386_v62 = vld [vmem:[%s5128_s7 + $0x68] sm:$0x1] }
  0x9b   : > { %v1648_v17 = vrot.slane %v1646_v6, 5  ;;  %v1654_v19 = vshll.u32 %v4195_v59, 16  ;;  %878 = vrot.lane.b32.xlu1 %v4085_v9, %s5030_s11  ;;  %v1660_v22 = vshll.u32 %v4196_v2, 16  ;;  %v1664_v23 = vshrl.u32 %v4196_v2, 16  ;;  %v4387_v2 = vld [vmem:[%s5128_s7 + $0x6c] sm:$0xf] }
  0x9c   : > { %v1634_v21 = vrot.slane %v1633_v12, 4  ;;  %v1670_v24 = vshll.u32 %v4197_v7, 16  ;;  %v1643_v27 = vor.u32 %v1642_v16, %v1638_v13  ;;  %v1653_v28 = vrot.slane %v1651_v18, 4  ;;  %v4857_v16 = vld [vmem:[%s5128_s7 + $0x18] sm:$0xff]   ;;  %v4865_v18 = vld [vmem:[%s5128_s7 + $0x30] sm:$0xff]  }
  0x9d   : > { %v1656_v29 = vrot.slane %v1654_v19, 5  ;;  %v4292_v30 = vrot.slane %v4256_v8, 9  ;;  %v1662_v34 = vrot.slane %v1660_v22, 5  ;;  %v1666_v35 = vrot.slane %v1664_v23, 4  ;;  %v5525_v58 = vpop.permute.xlu1 %1190  ;;  %v4388_v8 = vld [vmem:[%s5128_s7 + $0x70] sm:$0xf] }
  0x9e   : > { %v1639_v33 = vsel %vm5171_vm5, %v1634_v21, %v1638_v13  ;;  %v1672_v36 = vrot.slane %v1670_v24, 5  ;;  %1381 = vrot.lane.b32.xlu0 %v4848_v11, %s5027_s8  ;;  %v1644_v37 = vrot.slane %v1643_v27, 4  ;;  %v2119_v39 = vrot.slane %v4257_v14, 5  ;;  %v4389_v13 = vld [vmem:[%s5128_s7 + $0x74] sm:$0x1]  ;;  %v4852_v14 = vld [vmem:[%s5128_s7] sm:$0xff]  }
  0x9f   : > { %v1657_v38 = vor.u32 %v1656_v29, %v1653_v28  ;;  %v2122_v40 = vrot.slane %v4258_v15, 5  ;;  %1202 = vrot.lane.b32.xlu1 %v4117_v10, %s5029_s10  ;;  %v1667_v43 = vor.u32 %v1666_v35, %v1662_v34  ;;  %v4293_v44 = vrot.slane %v4259_v20, 9  ;;  %v4853_v15 = vld [vmem:[%s5128_s7 + $0xc] sm:$0xff]   ;;  %v4866_v19 = vld [vmem:[%s5128_s7 + $0x3c] sm:$0xff]   ;;  %365 = vst.msk [vmem:[#allocation2] sm:$0xff] %vm364_vm6, %v4852_v14  ;;  %367 = vst.msk [vmem:[#allocation2 + $0x10] sm:$0xff] %vm364_vm6, %v4857_v16 }
  0xa0   : > { %v2126_v45 = vrot.slane %v4260_v25, 5  ;;  %v2129_v46 = vrot.slane %v4261_v31, 5  ;;  %v1649_v48 = vsel %vm5171_vm5, %v1644_v37, %v1648_v17  ;;  %v2120_v50 = vsel %vm5130_vm2, %v4292_v30, %v2119_v39  ;;  %v4859_v17 = vld [vmem:[%s5128_s7 + $0x24] sm:$0xff]   ;;  %v4448_v31 = vld [vmem:[%s5128_s7 + $0x60] sm:$0xe]  ;;  %366 = vst.msk [vmem:[#allocation2 + $0x8] sm:$0xff] %vm364_vm6, %v4853_v15 }
  0xa1   : > { %v1658_v49 = vrot.slane %v1657_v38, 4  ;;  %v2121_v51 = vrot.slane %v2119_v39, 4  ;;  %v4228_v52 = vcombine.low %v1639_v33, %v1649_v48  ;;  %v1668_v55 = vrot.slane %v1667_v43, 4  ;;  %v4871_v20 = vld [vmem:[%s5128_s7 + $0x48] sm:$0xff]   ;;  %v4850_v21 = vld [vmem:[%s5128_s7 + $0x60] sm:$0xff]   ;;  %v4872_v33 = vld [vmem:[%s5128_s7 + $0x54] sm:$0xff]   ;;  %v5559_v39 = vpop.permute.xlu1 %2237 }
  0xa2   : > { %v5523_v56 = vsel %vm5130_vm2, %v4293_v44, %v2126_v45  ;;  %v2128_v57 = vrot.slane %v2126_v45, 4  ;;  %v2674_v63 = vshrl.u32 %v4384_v41, 16  ;;  %v2677_v1 = vshll.u32 %v4384_v41, 16  ;;  %v4449_v38 = vld [vmem:[%s5128_s7 + $0x64] sm:$0xf]  ;;  %368 = vst.msk [vmem:[#allocation2 + $0x18] sm:$0xff] %vm364_vm6, %v4859_v17 }
  0xa3   : > { %v1663_v59 = vsel %vm5171_vm5, %v1658_v49, %v1662_v34  ;;  %v2123_v61 = vsel %vm5130_vm2, %v2121_v51, %v2122_v40  ;;  %v5533_v3 = vpop.permute.xlu0 %864  ;;  %1383 = vrot.lane.b32.xlu1 %v4849_v42, %s5027_s8  ;;  %1926 = vrot.lane.b32.xlu0 %v4228_v52, %s5031_s12  ;;  %v1673_v4 = vsel %vm5171_vm5, %v1668_v55, %v1672_v36  ;;  %v2683_v7 = vshll.u32 %v4385_v47, 16  ;;  %v4450_v44 = vld [vmem:[%s5128_s7 + $0x68] sm:$0x1]  ;;  %v405_v48 = vld [vmem:[%s5128_s7 + $0x60] sm:$0xf] }
  0xa4   : > { %v4308_v5 = vcombine.low %v2120_v50, %v2123_v61  ;;  %v2130_v6 = vsel %vm5130_vm2, %v2128_v57, %v2129_v46  ;;  %v4229_v9 = vcombine.low %v1663_v59, %v1673_v4  ;;  %v2676_v11 = vrot.slane %v2674_v63, 4  ;;  %v4851_v49 = vld [vmem:[%s5128_s7 + $0x6c] sm:$0xff]   ;;  %v406_v55 = vld [vmem:[%s5128_s7 + $0x64] sm:$0xf]  ;;  %369 = vst.msk [vmem:[#allocation2 + $0x20] sm:$0xff] %vm364_vm6, %v4865_v18  ;;  %370 = vst.msk [vmem:[#allocation2 + $0x28] sm:$0xff] %vm364_vm6, %v4866_v19 }
  0xa5   : > { %v4309_v10 = vcombine.low %v5523_v56, %v2130_v6  ;;  %v2679_v12 = vrot.slane %v2677_v1, 5  ;;  %v5552_v22 = vrot.slane %v2683_v7, 5  ;;  %v2687_v23 = vshrl.u32 %v4385_v47, 16  ;;  %371 = vst.msk [vmem:[#allocation2 + $0x30] sm:$0xff] %vm364_vm6, %v4871_v20  ;;  %372 = vst.msk [vmem:[#allocation2 + $0x38] sm:$0xff] %vm364_vm6, %v4872_v33 }
  0xa6   : > { %v2693_v24 = vshll.u32 %v4386_v62, 16  ;;  %v2698_v25 = vshrl.u32 %v4387_v2, 16  ;;  %v2701_v28 = vshll.u32 %v4387_v2, 16  ;;  %v2707_v29 = vshll.u32 %v4388_v8, 16  ;;  %913 = vst.msk [vmem:[#allocation2] sm:$0xff] %vm912_vm7, %v5533_v3 }
  0xa7   : > { %v2680_v27 = vor.u32 %v2679_v12, %v2676_v11  ;;  %v2711_v30 = vshrl.u32 %v4388_v8, 16  ;;  %1928 = vrot.lane.b32.xlu1 %v4229_v9, %s5031_s12  ;;  %2247 = vrot.lane.b32.xlu0 %v4308_v5, %s5028_s9  ;;  %v2689_v34 = vrot.slane %v2687_v23, 4  ;;  %v2717_v37 = vshll.u32 %v4389_v13, 16  ;;  %v407_v62 = vld [vmem:[%s5128_s7 + $0x68] sm:$0x1]  ;;  %1237 = vst.msk [vmem:[#allocation2] sm:$0xff] %vm1236_vm8, %v5505_v26 }
  0xa8   : > { %v2695_v35 = vrot.slane %v2693_v24, 5  ;;  %v2700_v36 = vrot.slane %v2698_v25, 4  ;;  %v2703_v41 = vrot.slane %v2701_v28, 5  ;;  %v2709_v42 = vrot.slane %v2707_v29, 5  ;;  %v867_v45 = vpop.permute.xlu0 %866  ;;  %v4451_v63 = vld [vmem:[%s5128_s7 + $0x6c] sm:$0xe] }
  0xa9   : > { %v2681_v40 = vrot.slane %v2680_v27, 4  ;;  %v2713_v43 = vrot.slane %v2711_v30, 4  ;;  %v2690_v46 = vor.u32 %v2689_v34, %v5552_v22  ;;  %v2719_v47 = vrot.slane %v2717_v37, 5  ;;  %914 = vst.msk [vmem:[#allocation2 + $0x8] sm:$0xff] %vm912_vm7, %v867_v45  ;;  %v4452_v6 = vld [vmem:[%s5128_s7 + $0x70] sm:$0xf] }
  0xaa   : > { %v2704_v51 = vor.u32 %v2703_v41, %v2700_v36  ;;  %v4484_v57 = vrot.slane %v4448_v31, 9  ;;  %v3166_v59 = vrot.slane %v4449_v38, 5  ;;  %v3169_v61 = vrot.slane %v4450_v44, 5  ;;  %1238 = vst.msk [vmem:[#allocation2 + $0x8] sm:$0xff] %vm1236_vm8, %v5525_v58  ;;  %v4453_v7 = vld [vmem:[%s5128_s7 + $0x74] sm:$0x1] }
  0xab   : > { %v2686_v50 = vsel %vm5171_vm5, %v2681_v40, %v5552_v22  ;;  %v2714_v52 = vor.u32 %v2713_v43, %v2709_v42  ;;  %2249 = vrot.lane.b32.xlu1 %v4309_v10, %s5028_s9  ;;  %2428 = vrot.lane.b32.xlu0 %v4850_v21, %s5032_s13  ;;  %v2691_v56 = vrot.slane %v2690_v46, 4  ;;  %v625_v4 = vshrl.u32 %v405_v48, 16  ;;  %v408_v3 = vld [vmem:[%s5128_s7 + $0x6c] sm:$0xf]  ;;  %v409_v19 = vld [vmem:[%s5128_s7 + $0x70] sm:$0xf] }
  0xac   : > { %v2705_v1 = vrot.slane %v2704_v51, 4  ;;  %v628_v5 = vshll.u32 %v405_v48, 16  ;;  %v3167_v9 = vsel %vm5130_vm2, %v4484_v57, %v3166_v59  ;;  %v3168_v10 = vrot.slane %v3166_v59, 4  ;;  %v5595_v12 = vpop.permute.xlu1 %1916  ;;  %v410_v33 = vld [vmem:[%s5128_s7 + $0x74] sm:$0x1]  ;;  %1419 = vst.msk [vmem:[#allocation2 + $0x8] sm:$0xff] %vm1417_vm9, %v5482_v54 }
  0xad   : > { %v2715_v2 = vrot.slane %v2714_v52, 4  ;;  %v2696_v8 = vsel %vm5171_vm5, %v2691_v56, %v2695_v35  ;;  %v634_v11 = vshll.u32 %v406_v55, 16  ;;  %v627_v14 = vrot.slane %v625_v4, 4  ;;  %v953_v41 = vld [vmem:[%s5128_s7 + $0x60] sm:$0xe]  ;;  %1418 = vst.msk [vmem:[#allocation2] sm:$0xff] %vm1417_vm9, %v5487_v60 }
  0xae   : > { %v4420_v26 = vcombine.low %v2686_v50, %v2696_v8  ;;  %v2710_v13 = vsel %vm5171_vm5, %v2705_v1, %v2709_v42  ;;  %v3170_v16 = vsel %vm5130_vm2, %v3168_v10, %v3169_v61  ;;  %v630_v17 = vrot.slane %v628_v5, 5  ;;  %v954_v48 = vld [vmem:[%s5128_s7 + $0x64] sm:$0xf]  ;;  %v955_v52 = vld [vmem:[%s5128_s7 + $0x68] sm:$0x1]  ;;  %1964 = vst.msk [vmem:[#allocation2 + $0x8] sm:$0xff] %vm1962_vm10, %v5595_v12 }
  0xaf   : > { %v2720_v58 = vsel %vm5171_vm5, %v2715_v2, %v2719_v47  ;;  %2430 = vrot.lane.b32.xlu1 %v4851_v49, %s5032_s13  ;;  %v636_v18 = vrot.slane %v634_v11, 5  ;;  %v4500_v21 = vcombine.low %v3167_v9, %v3170_v16  ;;  %v638_v22 = vshrl.u32 %v406_v55, 16  ;;  %v956_v61 = vld [vmem:[%s5128_s7 + $0x6c] sm:$0xe]  ;;  %v958_v4 = vld [vmem:[%s5128_s7 + $0x74] sm:$0x1] }
  0xb0   : > { %v4421_v15 = vcombine.low %v2710_v13, %v2720_v58  ;;  %v1915_v20 = vpop.permute.xlu0 %1914  ;;  %2973 = vrot.lane.b32.xlu0 %v4420_v26, %s5033_s14  ;;  %v644_v23 = vshll.u32 %v407_v62, 16  ;;  %v4485_v24 = vrot.slane %v4451_v63, 9  ;;  %v631_v25 = vor.u32 %v630_v17, %v627_v14  ;;  %v5613_v43 = vpop.permute.xlu1 %2418  ;;  %v957_v62 = vld [vmem:[%s5128_s7 + $0x70] sm:$0xf]  ;;  %v4198_v26 = vld [vmem:[%s5128_s7 + $0x6c] sm:$0xf] }
  0xb1   : > { %v3173_v27 = vrot.slane %v4452_v6, 5  ;;  %v3176_v28 = vrot.slane %v4453_v7, 5  ;;  %v649_v29 = vshrl.u32 %v408_v3, 16  ;;  %v640_v30 = vrot.slane %v638_v22, 4  ;;  %1963 = vst.msk [vmem:[#allocation2] sm:$0xff] %vm1962_vm10, %v1915_v20  ;;  %v4877_v17 = vld [vmem:[%s5128_s7 + $0x60] sm:$0xff]  }
  0xb2   : > { %v646_v31 = vrot.slane %v644_v23, 5  ;;  %v652_v34 = vshll.u32 %v408_v3, 16  ;;  %v658_v35 = vshll.u32 %v409_v19, 16  ;;  %v632_v36 = vrot.slane %v631_v25, 4  ;;  %v4199_v13 = vld [vmem:[%s5128_s7 + $0x70] sm:$0xf] }
  0xb3   : > { %2975 = vrot.lane.b32.xlu1 %v4421_v15, %s5033_s14  ;;  %v3174_v37 = vsel %vm5130_vm2, %v4485_v24, %v3173_v27  ;;  %v3175_v38 = vrot.slane %v3173_v27, 4  ;;  %v651_v40 = vrot.slane %v649_v29, 4  ;;  %v641_v44 = vor.u32 %v640_v30, %v636_v18  ;;  %v4200_v12 = vld [vmem:[%s5128_s7 + $0x74] sm:$0x1]  ;;  %2284 = vst.msk [vmem:[#allocation2] sm:$0xff] %vm2283_vm11, %v5508_v32  ;;  %2285 = vst.msk [vmem:[#allocation2 + $0x8] sm:$0xff] %vm2283_vm11, %v5559_v39 }
  0xb4   : > { %v5611_v42 = vpop.permute.xlu0 %2416  ;;  %3294 = vrot.lane.b32.xlu0 %v4500_v21, %s5034_s24  ;;  %v654_v45 = vrot.slane %v652_v34, 5  ;;  %v660_v46 = vrot.slane %v658_v35, 5  ;;  %v662_v47 = vshrl.u32 %v409_v19, 16  ;;  %v637_v49 = vsel %vm5171_vm5, %v632_v36, %v636_v18  ;;  %v4201_v19 = vld [vmem:[%s5128_s7 + $0x78] sm:$0xf]  ;;  %373 = vst.msk [vmem:[#allocation2 + $0x40] sm:$0xff] %vm364_vm6, %v4877_v17 }
  0xb5   : > { %v3177_v50 = vsel %vm5130_vm2, %v3175_v38, %v3176_v28  ;;  %v668_v51 = vshll.u32 %v410_v33, 16  ;;  %v642_v55 = vrot.slane %v641_v44, 4  ;;  %v4102_v1 = vrot.slane %v953_v41, 9  ;;  %v4202_v25 = vld [vmem:[%s5128_s7 + $0x7c] sm:$0xf]  ;;  %2465 = vst.msk [vmem:[#allocation2] sm:$0xff] %vm2464_vm12, %v5611_v42 }
  0xb6   : > { %v4501_v56 = vcombine.low %v3174_v37, %v3177_v50  ;;  %v655_v57 = vor.u32 %v654_v45, %v651_v40  ;;  %v664_v59 = vrot.slane %v662_v47, 4  ;;  %v1086_v2 = vrot.slane %v954_v48, 5  ;;  %2466 = vst.msk [vmem:[#allocation2 + $0x8] sm:$0xff] %vm2464_vm12, %v5613_v43  ;;  %v4878_v33 = vld [vmem:[%s5128_s7 + $0x6c] sm:$0xff]   ;;  %v4264_v50 = vld [vmem:[%s5128_s7 + $0x74] sm:$0x1] }
  0xb7   : > { %v670_v63 = vrot.slane %v668_v51, 5  ;;  %v647_v6 = vsel %vm5171_vm5, %v642_v55, %v646_v31  ;;  %v1089_v60 = vrot.slane %v955_v52, 5  ;;  %v4103_v10 = vrot.slane %v956_v61, 9  ;;  %v4203_v31 = vld [vmem:[%s5128_s7 + $0x80] sm:$0x1]  ;;  %v4854_v39 = vld [vmem:[%s5128_s7 + $0x6c] sm:$0xff]  }
  0xb8   : > { %v2962_v5 = vpop.permute.xlu0 %2961  ;;  %3296 = vrot.lane.b32.xlu0 %v4501_v56, %s5034_s24  ;;  %v656_v7 = vrot.slane %v655_v57, 4  ;;  %v665_v54 = vor.u32 %v664_v59, %v660_v46  ;;  %v4086_v3 = vcombine.low %v637_v49, %v647_v6  ;;  %v1087_v8 = vsel %vm5130_vm2, %v4102_v1, %v1086_v2  ;;  %v4262_v38 = vld [vmem:[%s5128_s7 + $0x6c] sm:$0xe]  ;;  %v4263_v44 = vld [vmem:[%s5128_s7 + $0x70] sm:$0xf]  ;;  %374 = vst.msk [vmem:[#allocation2 + $0x48] sm:$0xff] %vm364_vm6, %v4878_v33 }
  0xb9   : > { %v1088_v9 = vrot.slane %v1086_v2, 4  ;;  %v2964_v11 = vpop.permute.xlu1 %2963  ;;  %v1093_v15 = vrot.slane %v957_v62, 5  ;;  %v1096_v16 = vrot.slane %v958_v4, 5  ;;  %v1675_v28 = vshrl.u32 %v4198_v26, 16  ;;  %3010 = vst.msk [vmem:[#allocation2] sm:$0xff] %vm3009_vm13, %v2962_v5  ;;  %v4855_v59 = vld [vmem:[%s5128_s7 + $0x78] sm:$0xff]  }
  0xba   : > { %v661_v58 = vsel %vm5171_vm5, %v656_v7, %v660_v46  ;;  %v666_v14 = vrot.slane %v665_v54, 4  ;;  %880 = vrot.lane.b32.xlu1 %v4086_v3, %s5030_s11  ;;  %v1678_v29 = vshll.u32 %v4198_v26, 16  ;;  %v1684_v30 = vshll.u32 %v4199_v13, 16  ;;  %3011 = vst.msk [vmem:[#allocation2 + $0x8] sm:$0xff] %vm3009_vm13, %v2964_v11  ;;  %v4265_v57 = vld [vmem:[%s5128_s7 + $0x78] sm:$0xe] }
  0xbb   : > { %v1090_v18 = vsel %vm5130_vm2, %v1088_v9, %v1089_v60  ;;  %v1094_v23 = vsel %vm5130_vm2, %v4103_v10, %v1093_v15  ;;  %v1095_v24 = vrot.slane %v1093_v15, 4  ;;  %v1688_v34 = vshrl.u32 %v4199_v13, 16  ;;  %v4266_v1 = vld [vmem:[%s5128_s7 + $0x7c] sm:$0xf]  ;;  %v4267_v7 = vld [vmem:[%s5128_s7 + $0x80] sm:$0x1] }
  0xbc   : > { %v3283_v20 = vpop.permute.xlu0 %3282  ;;  %v671_v21 = vsel %vm5171_vm5, %v666_v14, %v670_v63  ;;  %v4118_v22 = vcombine.low %v1087_v8, %v1090_v18  ;;  %v1694_v35 = vshll.u32 %v4200_v12, 16  ;;  %v1699_v36 = vshrl.u32 %v4201_v19, 16  ;;  %v4862_v54 = vld [vmem:[%s6353_s1 + $0x10] ss:$0 sps:$4 sm:$0x33]  }
  0xbd   : > { %v4087_v27 = vcombine.low %v661_v58, %v671_v21  ;;  %v1097_v32 = vsel %vm5130_vm2, %v1095_v24, %v1096_v16  ;;  %v1677_v41 = vrot.slane %v1675_v28, 4  ;;  %v1680_v42 = vrot.slane %v1678_v29, 5  ;;  %3331 = vst.msk [vmem:[#allocation2] sm:$0xff] %vm3330_vm14, %v3283_v20  ;;  %v4390_v18 = vld [vmem:[%s5128_s7 + $0x78] sm:$0xf]  ;;  %4759 = vmatprep.subr.msk.bf16.mxu0 %vm3432_vm15, %v4862_v54  ;;  %4760 = vmatprep.subr.msk.bf16.mxu1 %vm3432_vm15, %v4862_v54 }
  0xbe   : > { %1204 = vrot.lane.b32.xlu0 %v4118_v22, %s5029_s10  ;;  %v4119_v40 = vcombine.low %v1094_v23, %v1097_v32  ;;  %v1686_v43 = vrot.slane %v1684_v30, 5  ;;  %v1690_v46 = vrot.slane %v1688_v34, 4  ;;  %v1696_v47 = vrot.slane %v1694_v35, 5  ;;  %v4391_v23 = vld [vmem:[%s5128_s7 + $0x7c] sm:$0xf] }
  0xbf   : > { %v869_v37 = vpop.permute.xlu1 %868  ;;  %882 = vrot.lane.b32.xlu1 %v4087_v27, %s5030_s11  ;;  %v1701_v48 = vrot.slane %v1699_v36, 4  ;;  %v1702_v49 = vshll.u32 %v4201_v19, 16  ;;  %v1681_v51 = vor.u32 %v1680_v42, %v1677_v41  ;;  %v1708_v52 = vshll.u32 %v4202_v25, 16  ;;  %v4392_v24 = vld [vmem:[%s5128_s7 + $0x80] sm:$0x1] }
  0xc0   : > { %915 = vst.msk [vmem:[#allocation2 + $0x10] sm:$0xff] %vm912_vm7, %v869_v37  ;;  %v3285_v45 = vpop.permute.xlu0 %3284  ;;  %v1712_v55 = vshrl.u32 %v4202_v25, 16  ;;  %v1718_v56 = vshll.u32 %v4203_v31, 16  ;;  %v1691_v61 = vor.u32 %v1690_v46, %v1686_v43  ;;  %v4294_v63 = vrot.slane %v4262_v38, 9  ;;  %v4393_v30 = vld [vmem:[%s5128_s7 + $0x84] sm:$0xf] }
  0xc1   : > { %v1704_v62 = vrot.slane %v1702_v49, 5  ;;  %v1682_v2 = vrot.slane %v1681_v51, 4  ;;  %v1710_v4 = vrot.slane %v1708_v52, 5  ;;  %3332 = vst.msk [vmem:[#allocation2 + $0x8] sm:$0xff] %vm3330_vm14, %v3285_v45  ;;  %v2133_v8 = vrot.slane %v4263_v44, 5  ;;  %v4860_v44 = vld [vmem:[%s5128_s7 + $0x78] sm:$0xff]  }
  0xc2   : > { %1385 = vrot.lane.b32.xlu0 %v4854_v39, %s5027_s8  ;;  %v1714_v5 = vrot.slane %v1712_v55, 4  ;;  %v1720_v6 = vrot.slane %v1718_v56, 5  ;;  %v1692_v60 = vrot.slane %v1691_v61, 4  ;;  %v2136_v9 = vrot.slane %v4264_v50, 5  ;;  %v4394_v31 = vld [vmem:[%s5128_s7 + $0x88] sm:$0xf] }
  0xc3   : > { %1206 = vrot.lane.b32.xlu1 %v4119_v40, %s5029_s10  ;;  %v1705_v3 = vor.u32 %v1704_v62, %v1701_v48  ;;  %v1687_v26 = vsel %vm5171_vm5, %v1682_v2, %v1686_v43  ;;  %v4295_v58 = vrot.slane %v4265_v57, 9  ;;  %v2140_v14 = vrot.slane %v4266_v1, 5  ;;  %v4395_v41 = vld [vmem:[%s5128_s7 + $0x8c] sm:$0x1]  ;;  %v4454_v48 = vld [vmem:[%s5128_s7 + $0x78] sm:$0xe] }
  0xc4   : > { %v1193_v11 = vpop.permute.xlu0 %1192  ;;  %v1715_v13 = vor.u32 %v1714_v5, %v1710_v4  ;;  %v1697_v15 = vsel %vm5171_vm5, %v1692_v60, %v1696_v47  ;;  %v2134_v12 = vsel %vm5130_vm2, %v4294_v63, %v2133_v8  ;;  %v2135_v17 = vrot.slane %v2133_v8, 4  ;;  %v3347_v37 = vld [vmem:[#allocation2] sm:$0xff]  ;;  %v4455_v56 = vld [vmem:[%s5128_s7 + $0x7c] sm:$0xf] }
  0xc5   : > { %v871_v10 = vpop.permute.xlu1 %870  ;;  %1239 = vst.msk [vmem:[#allocation2 + $0x10] sm:$0xff] %vm1236_vm8, %v1193_v11  ;;  %v1706_v16 = vrot.slane %v1705_v3, 4  ;;  %v4230_v19 = vcombine.low %v1687_v26, %v1697_v15  ;;  %v5698_v21 = vsel %vm5130_vm2, %v4295_v58, %v2140_v14  ;;  %v2142_v22 = vrot.slane %v2140_v14, 4  ;;  %4721 = vmatprep.mubr.msk.bf16.mxu0 %vm3383_vm0, %v3347_v37  ;;  %v4456_v63 = vld [vmem:[%s5128_s7 + $0x80] sm:$0x1] }
  0xc6   : > { %916 = vst.msk [vmem:[#allocation2 + $0x18] sm:$0xff] %vm912_vm7, %v871_v10  ;;  %v1716_v20 = vrot.slane %v1715_v13, 4  ;;  %v2137_v27 = vsel %vm5130_vm2, %v2135_v17, %v2136_v9  ;;  %v2143_v28 = vrot.slane %v4267_v7, 5  ;;  %v3434_v34 = vsel %vm3432_vm15, %v4862_v54, 0  ;;  %v411_v7 = vld [vmem:[%s5128_s7 + $0x78] sm:$0xf] }
  0xc7   : > { %1387 = vrot.lane.b32.xlu1 %v4855_v59, %s5027_s8  ;;  %v1711_v25 = vsel %vm5171_vm5, %v1706_v16, %v1710_v4  ;;  %1930 = vrot.lane.b32.xlu0 %v4230_v19, %s5031_s12  ;;  %v4310_v39 = vcombine.low %v2134_v12, %v2137_v27  ;;  %v2722_v38 = vshrl.u32 %v4390_v18, 16  ;;  %v2725_v40 = vshll.u32 %v4390_v18, 16  ;;  %v412_v9 = vld [vmem:[%s5128_s7 + $0x7c] sm:$0xf]  ;;  %v4861_v10 = vld [vmem:[%s5128_s7 + $0x84] sm:$0xff]  }
  0xc8   : > { %v1374_v33 = vpop.permute.xlu0 %1373  ;;  %v1721_v32 = vsel %vm5171_vm5, %v1716_v20, %v1720_v6  ;;  %v2144_v36 = vsel %vm5130_vm2, %v2142_v22, %v2143_v28  ;;  %4720 = vmatpush3.bf16.msra.mxu0 %v3434_v34  ;;  %v3348_v42 = vld [vmem:[#allocation2 + $0x8] sm:$0xff]  ;;  %v2731_v45 = vshll.u32 %v4391_v23, 16  ;;  %v2735_v46 = vshrl.u32 %v4391_v23, 16  ;;  %4758 = vmatpush3.bf16.msra.mxu1 %v3434_v34  ;;  %v413_v14 = vld [vmem:[%s5128_s7 + $0x80] sm:$0x1] }
  0xc9   : > { %v1195_v29 = vpop.permute.xlu1 %1194  ;;  %1420 = vst.msk [vmem:[#allocation2 + $0x10] sm:$0xff] %vm1417_vm9, %v1374_v33  ;;  %v4231_v35 = vcombine.low %v1711_v25, %v1721_v32  ;;  %v4311_v43 = vcombine.low %v5698_v21, %v2144_v36  ;;  %v2741_v47 = vshll.u32 %v4392_v24, 16  ;;  %v2724_v49 = vrot.slane %v2722_v38, 4  ;;  %v4457_v19 = vld [vmem:[%s5128_s7 + $0x84] sm:$0xe]  ;;  %v4881_v25 = vld [vmem:[%s5128_s7 + $0x78] sm:$0xff]  }
  0xca   : > { %1240 = vst.msk [vmem:[#allocation2 + $0x18] sm:$0xff] %vm1236_vm8, %v1195_v29  ;;  %v2727_v50 = vrot.slane %v2725_v40, 5  ;;  %v2746_v51 = vshrl.u32 %v4393_v30, 16  ;;  %v2749_v52 = vshll.u32 %v4393_v30, 16  ;;  %v2733_v57 = vrot.slane %v2731_v45, 5 }
  0xcb   : > { %1932 = vrot.lane.b32.xlu1 %v4231_v35, %s5031_s12  ;;  %2251 = vrot.lane.b32.xlu0 %v4310_v39, %s5028_s9  ;;  %v2737_v59 = vrot.slane %v2735_v46, 4  ;;  %v2743_v61 = vrot.slane %v2741_v47, 5  ;;  %v2755_v62 = vshll.u32 %v4394_v31, 16  ;;  %v2759_v6 = vshrl.u32 %v4394_v31, 16  ;;  %v4458_v31 = vld [vmem:[%s5128_s7 + $0x88] sm:$0xf] }
  0xcc   : > { %4722 = vmatmul.mubr.msk.bf16.vlgmr.msra.gmra.mrb[0].mxu0 %vm3383_vm0, %v3348_v42  ;;  %v2728_v2 = vor.u32 %v2727_v50, %v2724_v49  ;;  %v2748_v4 = vrot.slane %v2746_v51, 4  ;;  %v2751_v5 = vrot.slane %v2749_v52, 5  ;;  %v2765_v3 = vshll.u32 %v4395_v41, 16  ;;  %v4459_v35 = vld [vmem:[%s5128_s7 + $0x8c] sm:$0x1]  ;;  %375 = vst.msk [vmem:[#allocation2 + $0x50] sm:$0xff] %vm364_vm6, %v4881_v25 }
  0xcd   : > { %v1376_v55 = vpop.permute.xlu1 %1375  ;;  %v2738_v54 = vor.u32 %v2737_v59, %v2733_v57  ;;  %v2757_v60 = vrot.slane %v2755_v62, 5  ;;  %v4486_v8 = vrot.slane %v4454_v48, 9  ;;  %v2761_v13 = vrot.slane %v2759_v6, 4  ;;  %v414_v42 = vld [vmem:[%s5128_s7 + $0x84] sm:$0xf] }
  0xce   : > { %1421 = vst.msk [vmem:[#allocation2 + $0x18] sm:$0xff] %vm1417_vm9, %v1376_v55  ;;  %v1919_v1 = vpop.permute.xlu0 %1918  ;;  %v2729_v11 = vrot.slane %v2728_v2, 4  ;;  %v2752_v26 = vor.u32 %v2751_v5, %v2748_v4  ;;  %v3180_v58 = vrot.slane %v4455_v56, 5  ;;  %v2767_v12 = vrot.slane %v2765_v3, 5  ;;  %v415_v48 = vld [vmem:[%s5128_s7 + $0x88] sm:$0xf] }
  0xcf   : > { %1965 = vst.msk [vmem:[#allocation2 + $0x10] sm:$0xff] %vm1962_vm10, %v1919_v1  ;;  %2253 = vrot.lane.b32.xlu1 %v4311_v43, %s5028_s9  ;;  %2432 = vrot.lane.b32.xlu0 %v4860_v44, %s5032_s13  ;;  %v2739_v16 = vrot.slane %v2738_v54, 4  ;;  %v3183_v17 = vrot.slane %v4456_v63, 5  ;;  %v673_v18 = vshrl.u32 %v411_v7, 16  ;;  %v2762_v23 = vor.u32 %v2761_v13, %v2757_v60  ;;  %v959_v5 = vld [vmem:[%s5128_s7 + $0x78] sm:$0xe] }
  0xd0   : > { %v2734_v21 = vsel %vm5171_vm5, %v2729_v11, %v2733_v57  ;;  %v2753_v22 = vrot.slane %v2752_v26, 4  ;;  %v3181_v24 = vsel %vm5130_vm2, %v4486_v8, %v3180_v58  ;;  %v3182_v28 = vrot.slane %v3180_v58, 4  ;;  %v416_v57 = vld [vmem:[%s5128_s7 + $0x8c] sm:$0x1]  ;;  %v4882_v6 = vld [vmem:[%s5128_s7 + $0x84] sm:$0xff]  }
  0xd1   : > { %v1921_v15 = vpop.permute.xlu1 %1920  ;;  %v2744_v27 = vsel %vm5171_vm5, %v2739_v16, %v2743_v61  ;;  %v675_v29 = vrot.slane %v673_v18, 4  ;;  %v676_v30 = vshll.u32 %v411_v7, 16  ;;  %v2763_v39 = vrot.slane %v2762_v23, 4  ;;  %v960_v8 = vld [vmem:[%s5128_s7 + $0x7c] sm:$0xf]  ;;  %376 = vst.msk [vmem:[#allocation2 + $0x58] sm:$0xff] %vm364_vm6, %v4882_v6 }
  0xd2   : > { %1966 = vst.msk [vmem:[#allocation2 + $0x18] sm:$0xff] %vm1962_vm10, %v1921_v15  ;;  %v2240_v20 = vpop.permute.xlu0 %2239  ;;  %v4422_v33 = vcombine.low %v2734_v21, %v2744_v27  ;;  %v2758_v32 = vsel %vm5171_vm5, %v2753_v22, %v2757_v60  ;;  %v682_v34 = vshll.u32 %v412_v9, 16  ;;  %v3184_v37 = vsel %vm5130_vm2, %v3182_v28, %v3183_v17  ;;  %v961_v58 = vld [vmem:[%s5128_s7 + $0x80] sm:$0x1]  ;;  %v962_v17 = vld [vmem:[%s5128_s7 + $0x84] sm:$0xe] }
  0xd3   : > { %2286 = vst.msk [vmem:[#allocation2 + $0x10] sm:$0xff] %vm2283_vm11, %v2240_v20  ;;  %2434 = vrot.lane.b32.xlu1 %v4861_v10, %s5032_s13  ;;  %v678_v38 = vrot.slane %v676_v30, 5  ;;  %v686_v40 = vshrl.u32 %v412_v9, 16  ;;  %v692_v41 = vshll.u32 %v413_v14, 16  ;;  %v2768_v44 = vsel %vm5171_vm5, %v2763_v39, %v2767_v12  ;;  %v963_v18 = vld [vmem:[%s5128_s7 + $0x88] sm:$0xf] }
  0xd4   : > { %2977 = vrot.lane.b32.xlu0 %v4422_v33, %s5033_s14  ;;  %v4502_v45 = vcombine.low %v3181_v24, %v3184_v37  ;;  %v684_v46 = vrot.slane %v682_v34, 5  ;;  %v4487_v47 = vrot.slane %v4457_v19, 9  ;;  %v4423_v49 = vcombine.low %v2758_v32, %v2768_v44  ;;  %v964_v24 = vld [vmem:[%s5128_s7 + $0x8c] sm:$0x1]  ;;  %v4204_v25 = vld [vmem:[%s5128_s7 + $0x84] sm:$0xf] }
  0xd5   : > { %v2242_v36 = vpop.permute.xlu1 %2241  ;;  %v679_v50 = vor.u32 %v678_v38, %v675_v29  ;;  %v688_v51 = vrot.slane %v686_v40, 4  ;;  %v694_v52 = vrot.slane %v692_v41, 5  ;;  %v3187_v55 = vrot.slane %v4458_v31, 5  ;;  %v4205_v31 = vld [vmem:[%s5128_s7 + $0x88] sm:$0xf] }
  0xd6   : > { %2287 = vst.msk [vmem:[#allocation2 + $0x18] sm:$0xff] %vm2283_vm11, %v2242_v36  ;;  %v2421_v43 = vpop.permute.xlu0 %2420  ;;  %v3190_v56 = vrot.slane %v4459_v35, 5  ;;  %v697_v59 = vshrl.u32 %v414_v42, 16  ;;  %v700_v61 = vshll.u32 %v414_v42, 16  ;;  %v706_v2 = vshll.u32 %v415_v48, 16 }
  0xd7   : > { %2467 = vst.msk [vmem:[#allocation2 + $0x10] sm:$0xff] %vm2464_vm12, %v2421_v43  ;;  %2979 = vrot.lane.b32.xlu1 %v4423_v49, %s5033_s14  ;;  %v680_v63 = vrot.slane %v679_v50, 4  ;;  %v689_v1 = vor.u32 %v688_v51, %v684_v46  ;;  %v710_v4 = vshrl.u32 %v415_v48, 16  ;;  %v3188_v7 = vsel %vm5130_vm2, %v4487_v47, %v3187_v55  ;;  %v4206_v43 = vld [vmem:[%s5128_s7 + $0x8c] sm:$0x1] }
  0xd8   : > { %3298 = vrot.lane.b32.xlu0 %v4502_v45, %s5034_s24  ;;  %v3189_v54 = vrot.slane %v3187_v55, 4  ;;  %v699_v60 = vrot.slane %v697_v59, 4  ;;  %v702_v3 = vrot.slane %v700_v61, 5  ;;  %v708_v26 = vrot.slane %v706_v2, 5  ;;  %v4208_v51 = vld [vmem:[%s5128_s7 + $0x94] sm:$0xf] }
  0xd9   : > { %v2423_v62 = vpop.permute.xlu1 %2422  ;;  %v685_v10 = vsel %vm5171_vm5, %v680_v63, %v684_v46  ;;  %v690_v11 = vrot.slane %v689_v1, 4  ;;  %v712_v13 = vrot.slane %v710_v4, 4  ;;  %v716_v16 = vshll.u32 %v416_v57, 16  ;;  %v4207_v46 = vld [vmem:[%s5128_s7 + $0x90] sm:$0xf]  ;;  %v4863_v2 = vld [vmem:[%s5128_s7 + $0x84] sm:$0xff]  }
  0xda   : > { %2468 = vst.msk [vmem:[#allocation2 + $0x18] sm:$0xff] %vm2464_vm12, %v2423_v62  ;;  %v2966_v9 = vpop.permute.xlu0 %2965  ;;  %v3191_v14 = vsel %vm5130_vm2, %v3189_v54, %v3190_v56  ;;  %v703_v15 = vor.u32 %v702_v3, %v699_v60  ;;  %v4104_v12 = vrot.slane %v959_v5, 9  ;;  %v1100_v23 = vrot.slane %v960_v8, 5  ;;  %v4268_v63 = vld [vmem:[%s5128_s7 + $0x84] sm:$0xe] }
  0xdb   : > { %3012 = vst.msk [vmem:[#allocation2 + $0x10] sm:$0xff] %vm3009_vm13, %v2966_v9  ;;  %v695_v20 = vsel %vm5171_vm5, %v690_v11, %v694_v52  ;;  %v4503_v21 = vcombine.low %v3188_v7, %v3191_v14  ;;  %v713_v22 = vor.u32 %v712_v13, %v708_v26  ;;  %v718_v29 = vrot.slane %v716_v16, 5  ;;  %v4209_v52 = vld [vmem:[%s5128_s7 + $0x98] sm:$0x1]  ;;  %v4269_v7 = vld [vmem:[%s5128_s7 + $0x88] sm:$0xf] }
  0xdc   : > { %v4088_v27 = vcombine.low %v685_v10, %v695_v20  ;;  %v704_v28 = vrot.slane %v703_v15, 4  ;;  %v1103_v30 = vrot.slane %v961_v58, 5  ;;  %v1101_v39 = vsel %vm5130_vm2, %v4104_v12, %v1100_v23  ;;  %v4270_v9 = vld [vmem:[%s5128_s7 + $0x8c] sm:$0x1]  ;;  %v4271_v58 = vld [vmem:[%s5128_s7 + $0x90] sm:$0xe] }
  0xdd   : > { %v2968_v19 = vpop.permute.xlu1 %2967  ;;  %3300 = vrot.lane.b32.xlu0 %v4503_v21, %s5034_s24  ;;  %v714_v32 = vrot.slane %v713_v22, 4  ;;  %v1102_v34 = vrot.slane %v1100_v23, 4  ;;  %v4105_v35 = vrot.slane %v962_v17, 9  ;;  %v1107_v37 = vrot.slane %v963_v18, 5  ;;  %v4272_v14 = vld [vmem:[%s5128_s7 + $0x94] sm:$0xf] }
  0xde   : > { %3013 = vst.msk [vmem:[#allocation2 + $0x18] sm:$0xff] %vm3009_vm13, %v2968_v19  ;;  %v3287_v33 = vpop.permute.xlu0 %3286  ;;  %884 = vrot.lane.b32.xlu1 %v4088_v27, %s5030_s11  ;;  %v709_v36 = vsel %vm5171_vm5, %v704_v28, %v708_v26  ;;  %v1110_v38 = vrot.slane %v964_v24, 5  ;;  %v1723_v40 = vshrl.u32 %v4204_v25, 16  ;;  %v1726_v44 = vshll.u32 %v4204_v25, 16  ;;  %v4273_v15 = vld [vmem:[%s5128_s7 + $0x98] sm:$0x1] }
  0xdf   : > { %3333 = vst.msk [vmem:[#allocation2 + $0x10] sm:$0xff] %vm3330_vm14, %v3287_v33  ;;  %v719_v41 = vsel %vm5171_vm5, %v714_v32, %v718_v29  ;;  %v1104_v42 = vsel %vm5130_vm2, %v1102_v34, %v1103_v30  ;;  %v1732_v45 = vshll.u32 %v4205_v31, 16  ;;  %v1108_v49 = vsel %vm5130_vm2, %v4105_v35, %v1107_v37  ;;  %v4864_v20 = vld [vmem:[%s5128_s7 + $0x90] sm:$0xff]  }
  0xe0   : > { %v4089_v47 = vcombine.low %v709_v36, %v719_v41  ;;  %v4120_v48 = vcombine.low %v1101_v39, %v1104_v42  ;;  %v1109_v50 = vrot.slane %v1107_v37, 4  ;;  %v1725_v57 = vrot.slane %v1723_v40, 4  ;;  %v4396_v35 = vld [vmem:[%s5128_s7 + $0x90] sm:$0xf]  ;;  %v4397_v42 = vld [vmem:[%s5128_s7 + $0x94] sm:$0xf] }
  0xe1   : > { %v1728_v59 = vrot.slane %v1726_v44, 5  ;;  %v1734_v61 = vrot.slane %v1732_v45, 5  ;;  %v1736_v62 = vshrl.u32 %v4205_v31, 16  ;;  %v1742_v4 = vshll.u32 %v4206_v43, 16 }
  0xe2   : > { %v3289_v56 = vpop.permute.xlu0 %3288  ;;  %886 = vrot.lane.b32.xlu1 %v4089_v47, %s5030_s11  ;;  %1208 = vrot.lane.b32.xlu0 %v4120_v48, %s5029_s10  ;;  %v1111_v1 = vsel %vm5130_vm2, %v1109_v50, %v1110_v38  ;;  %v1747_v5 = vshrl.u32 %v4207_v46, 16  ;;  %v1750_v6 = vshll.u32 %v4207_v46, 16  ;;  %v1756_v8 = vshll.u32 %v4208_v51, 16  ;;  %v4398_v47 = vld [vmem:[%s5128_s7 + $0x98] sm:$0x1] }
  0xe3   : > { %v873_v55 = vpop.permute.xlu1 %872  ;;  %3334 = vst.msk [vmem:[#allocation2 + $0x18] sm:$0xff] %vm3330_vm14, %v3289_v56  ;;  %v4121_v54 = vcombine.low %v1108_v49, %v1111_v1  ;;  %v1729_v60 = vor.u32 %v1728_v59, %v1725_v57  ;;  %v1738_v3 = vrot.slane %v1736_v62, 4  ;;  %v1744_v10 = vrot.slane %v1742_v4, 5  ;;  %v4399_v56 = vld [vmem:[%s5128_s7 + $0x9c] sm:$0xf] }
  0xe4   : > { %917 = vst.msk [vmem:[#allocation2 + $0x20] sm:$0xff] %vm912_vm7, %v873_v55  ;;  %v1749_v11 = vrot.slane %v1747_v5, 4  ;;  %v1752_v26 = vrot.slane %v1750_v6, 5  ;;  %v1760_v13 = vshrl.u32 %v4208_v51, 16  ;;  %v1758_v18 = vrot.slane %v1756_v8, 5 }
  0xe5   : > { %v1730_v12 = vrot.slane %v1729_v60, 4  ;;  %v1739_v17 = vor.u32 %v1738_v3, %v1734_v61  ;;  %v1766_v19 = vshll.u32 %v4209_v52, 16  ;;  %v4296_v23 = vrot.slane %v4268_v63, 9  ;;  %v4400_v57 = vld [vmem:[%s5128_s7 + $0xa0] sm:$0xf] }
  0xe6   : > { %v3349_v16 = vld [vmem:[#allocation2 + $0x10] sm:$0xff]  ;;  %1210 = vrot.lane.b32.xlu1 %v4121_v54, %s5029_s10  ;;  %1389 = vrot.lane.b32.xlu0 %v4863_v2, %s5027_s8  ;;  %v1753_v21 = vor.u32 %v1752_v26, %v1749_v11  ;;  %v1762_v22 = vrot.slane %v1760_v13, 4  ;;  %v2147_v24 = vrot.slane %v4269_v7, 5  ;;  %v2150_v30 = vrot.slane %v4270_v9, 5  ;;  %v4401_v6 = vld [vmem:[%s5128_s7 + $0xa4] sm:$0x1] }
  0xe7   : > { %4725 = vmatprep.mubr.msk.bf16.mxu0 %vm3383_vm0, %v3349_v16  ;;  %v1735_v27 = vsel %vm5171_vm5, %v1730_v12, %v1734_v61  ;;  %v1740_v28 = vrot.slane %v1739_v17, 4  ;;  %v1768_v29 = vrot.slane %v1766_v19, 5  ;;  %v4297_v38 = vrot.slane %v4271_v58, 9  ;;  %v4867_v54 = vld [vmem:[%s5128_s7 + $0x90] sm:$0xff]   ;;  %v4462_v19 = vld [vmem:[%s5128_s7 + $0x98] sm:$0x1] }
  0xe8   : > { %v1197_v25 = vpop.permute.xlu0 %1196  ;;  %v1754_v33 = vrot.slane %v1753_v21, 4  ;;  %v1763_v32 = vor.u32 %v1762_v22, %v1758_v18  ;;  %v2148_v39 = vsel %vm5130_vm2, %v4296_v23, %v2147_v24  ;;  %v2149_v34 = vrot.slane %v2147_v24, 4  ;;  %v4460_v9 = vld [vmem:[%s5128_s7 + $0x90] sm:$0xe] }
  0xe9   : > { %v875_v31 = vpop.permute.xlu1 %874  ;;  %1241 = vst.msk [vmem:[#allocation2 + $0x20] sm:$0xff] %vm1236_vm8, %v1197_v25  ;;  %v1745_v37 = vsel %vm5171_vm5, %v1740_v28, %v1744_v10  ;;  %v2154_v40 = vrot.slane %v4272_v14, 5  ;;  %v2157_v41 = vrot.slane %v4273_v15, 5  ;;  %v2770_v55 = vshrl.u32 %v4396_v35, 16  ;;  %v4461_v14 = vld [vmem:[%s5128_s7 + $0x94] sm:$0xf] }
  0xea   : > { %918 = vst.msk [vmem:[#allocation2 + $0x28] sm:$0xff] %vm912_vm7, %v875_v31  ;;  %v3350_v36 = vld [vmem:[#allocation2 + $0x18] sm:$0xff]  ;;  %1391 = vrot.lane.b32.xlu1 %v4864_v20, %s5027_s8  ;;  %v4232_v43 = vcombine.low %v1735_v27, %v1745_v37  ;;  %v1759_v44 = vsel %vm5171_vm5, %v1754_v33, %v1758_v18  ;;  %v1764_v45 = vrot.slane %v1763_v32, 4  ;;  %v2151_v46 = vsel %vm5130_vm2, %v2149_v34, %v2150_v30  ;;  %v417_v20 = vld [vmem:[%s5128_s7 + $0x90] sm:$0xf] }
  0xeb   : > { %4726 = vmatmul.mubr.msk.bf16.gmra.mrb[4].mxu0 %vm3383_vm0, %v3350_v36  ;;  %v4312_v49 = vcombine.low %v2148_v39, %v2151_v46  ;;  %v2155_v50 = vsel %vm5130_vm2, %v4297_v38, %v2154_v40  ;;  %v2156_v51 = vrot.slane %v2154_v40, 4  ;;  %v2773_v61 = vshll.u32 %v4396_v35, 16  ;;  %v418_v25 = vld [vmem:[%s5128_s7 + $0x94] sm:$0xf]  ;;  %v419_v31 = vld [vmem:[%s5128_s7 + $0x98] sm:$0x1] }
  0xec   : > { %v1378_v48 = vpop.permute.xlu0 %1377  ;;  %1934 = vrot.lane.b32.xlu0 %v4232_v43, %s5031_s12  ;;  %v1769_v59 = vsel %vm5171_vm5, %v1764_v45, %v1768_v29  ;;  %v2779_v62 = vshll.u32 %v4397_v42, 16  ;;  %v2783_v63 = vshrl.u32 %v4397_v42, 16  ;;  %v2772_v4 = vrot.slane %v2770_v55, 4  ;;  %v4868_v33 = vld [vmem:[%s5128_s7 + $0x9c] sm:$0xff]  }
  0xed   : > { %v1199_v52 = vpop.permute.xlu1 %1198  ;;  %1422 = vst.msk [vmem:[#allocation2 + $0x20] sm:$0xff] %vm1417_vm9, %v1378_v48  ;;  %v4233_v1 = vcombine.low %v1759_v44, %v1769_v59  ;;  %v2158_v2 = vsel %vm5130_vm2, %v2156_v51, %v2157_v41  ;;  %v2789_v5 = vshll.u32 %v4398_v47, 16  ;;  %v2775_v60 = vrot.slane %v2773_v61, 5  ;;  %v4463_v43 = vld [vmem:[%s5128_s7 + $0x9c] sm:$0xe]  ;;  %v4883_v44 = vld [vmem:[%s5128_s7 + $0x90] sm:$0xff]  }
  0xee   : > { %1242 = vst.msk [vmem:[#allocation2 + $0x28] sm:$0xff] %vm1236_vm8, %v1199_v52  ;;  %v4313_v7 = vcombine.low %v2155_v50, %v2158_v2  ;;  %v2781_v3 = vrot.slane %v2779_v62, 5  ;;  %v2785_v8 = vrot.slane %v2783_v63, 4  ;;  %v2794_v11 = vshrl.u32 %v4399_v56, 16  ;;  %v4464_v55 = vld [vmem:[%s5128_s7 + $0xa0] sm:$0xf] }
  0xef   : > { %1936 = vrot.lane.b32.xlu1 %v4233_v1, %s5031_s12  ;;  %v2791_v10 = vrot.slane %v2789_v5, 5  ;;  %v2797_v26 = vshll.u32 %v4399_v56, 16  ;;  %v2803_v13 = vshll.u32 %v4400_v57, 16  ;;  %v2776_v16 = vor.u32 %v2775_v60, %v2772_v4  ;;  %377 = vst.msk [vmem:[#allocation2 + $0x60] sm:$0xff] %vm364_vm6, %v4883_v44  ;;  %v4465_v62 = vld [vmem:[%s5128_s7 + $0xa4] sm:$0x1] }
  0xf0   : > { %2255 = vrot.lane.b32.xlu0 %v4312_v49, %s5028_s9  ;;  %v2786_v12 = vor.u32 %v2785_v8, %v2781_v3  ;;  %v2807_v17 = vshrl.u32 %v4400_v57, 16  ;;  %v2813_v18 = vshll.u32 %v4401_v6, 16  ;;  %v2796_v21 = vrot.slane %v2794_v11, 4  ;;  %v420_v63 = vld [vmem:[%s5128_s7 + $0x9c] sm:$0xf] }
  0xf1   : > { %v1380_v58 = vpop.permute.xlu1 %1379  ;;  %v1923_v15 = vpop.permute.xlu0 %1922  ;;  %v2799_v22 = vrot.slane %v2797_v26, 5  ;;  %v2805_v23 = vrot.slane %v2803_v13, 5  ;;  %v4488_v24 = vrot.slane %v4460_v9, 9  ;;  %v2777_v27 = vrot.slane %v2776_v16, 4  ;;  %v4884_v60 = vld [vmem:[%s5128_s7 + $0x9c] sm:$0xff]  }
  0xf2   : > { %1423 = vst.msk [vmem:[#allocation2 + $0x28] sm:$0xff] %vm1417_vm9, %v1380_v58  ;;  %v2787_v28 = vrot.slane %v2786_v12, 4  ;;  %v2809_v29 = vrot.slane %v2807_v17, 4  ;;  %v2815_v30 = vrot.slane %v2813_v18, 5  ;;  %v3194_v39 = vrot.slane %v4461_v14, 5 }
  0xf3   : > { %1967 = vst.msk [vmem:[#allocation2 + $0x20] sm:$0xff] %vm1962_vm10, %v1923_v15  ;;  %2257 = vrot.lane.b32.xlu1 %v4313_v7, %s5028_s9  ;;  %v2800_v32 = vor.u32 %v2799_v22, %v2796_v21  ;;  %v3197_v34 = vrot.slane %v4462_v19, 5  ;;  %v721_v35 = vshrl.u32 %v417_v20, 16  ;;  %v2782_v38 = vsel %vm5171_vm5, %v2777_v27, %v2781_v3  ;;  %v422_v11 = vld [vmem:[%s5128_s7 + $0xa4] sm:$0x1] }
  0xf4   : > { %2436 = vrot.lane.b32.xlu0 %v4867_v54, %s5032_s13  ;;  %v2792_v40 = vsel %vm5171_vm5, %v2787_v28, %v2791_v10  ;;  %v2810_v41 = vor.u32 %v2809_v29, %v2805_v23  ;;  %v724_v42 = vshll.u32 %v417_v20, 16  ;;  %v3195_v47 = vsel %vm5130_vm2, %v4488_v24, %v3194_v39  ;;  %v421_v54 = vld [vmem:[%s5128_s7 + $0xa0] sm:$0xf]  ;;  %v965_v15 = vld [vmem:[%s5128_s7 + $0x90] sm:$0xe]  ;;  %378 = vst.msk [vmem:[#allocation2 + $0x68] sm:$0xff] %vm364_vm6, %v4884_v60 }
  0xf5   : > { %v1925_v36 = vpop.permute.xlu1 %1924  ;;  %v2244_v37 = vpop.permute.xlu0 %2243  ;;  %v4424_v45 = vcombine.low %v2782_v38, %v2792_v40  ;;  %v2801_v46 = vrot.slane %v2800_v32, 4  ;;  %v3196_v48 = vrot.slane %v3194_v39, 4  ;;  %v723_v50 = vrot.slane %v721_v35, 4  ;;  %v966_v19 = vld [vmem:[%s5128_s7 + $0x94] sm:$0xf] }
  0xf6   : > { %1968 = vst.msk [vmem:[#allocation2 + $0x28] sm:$0xff] %vm1962_vm10, %v1925_v36  ;;  %v2811_v49 = vrot.slane %v2810_v41, 4  ;;  %v726_v51 = vrot.slane %v724_v42, 5  ;;  %v730_v52 = vshll.u32 %v418_v25, 16  ;;  %v734_v59 = vshrl.u32 %v418_v25, 16 }
  0xf7   : > { %2288 = vst.msk [vmem:[#allocation2 + $0x20] sm:$0xff] %vm2283_vm11, %v2244_v37  ;;  %2438 = vrot.lane.b32.xlu1 %v4868_v33, %s5032_s13  ;;  %v2806_v56 = vsel %vm5171_vm5, %v2801_v46, %v2805_v23  ;;  %v3198_v57 = vsel %vm5130_vm2, %v3196_v48, %v3197_v34  ;;  %v740_v61 = vshll.u32 %v419_v31, 16  ;;  %v4489_v10 = vrot.slane %v4463_v43, 9  ;;  %v967_v31 = vld [vmem:[%s5128_s7 + $0x98] sm:$0x1] }
  0xf8   : > { %2981 = vrot.lane.b32.xlu0 %v4424_v45, %s5033_s14  ;;  %v2816_v4 = vsel %vm5171_vm5, %v2811_v49, %v2815_v30  ;;  %v4504_v5 = vcombine.low %v3195_v47, %v3198_v57  ;;  %v727_v6 = vor.u32 %v726_v51, %v723_v50  ;;  %v732_v7 = vrot.slane %v730_v52, 5  ;;  %v968_v35 = vld [vmem:[%s5128_s7 + $0x9c] sm:$0xe]  ;;  %v969_v41 = vld [vmem:[%s5128_s7 + $0xa0] sm:$0xf] }
  0xf9   : > { %v2246_v1 = vpop.permute.xlu1 %2245  ;;  %v2425_v2 = vpop.permute.xlu0 %2424  ;;  %v4425_v3 = vcombine.low %v2806_v56, %v2816_v4  ;;  %v736_v8 = vrot.slane %v734_v59, 4  ;;  %v742_v9 = vrot.slane %v740_v61, 5  ;;  %v3201_v13 = vrot.slane %v4464_v55, 5  ;;  %v970_v42 = vld [vmem:[%s5128_s7 + $0xa4] sm:$0x1] }
  0xfa   : > { %2289 = vst.msk [vmem:[#allocation2 + $0x28] sm:$0xff] %vm2283_vm11, %v2246_v1  ;;  %v728_v26 = vrot.slane %v727_v6, 4  ;;  %v3204_v58 = vrot.slane %v4465_v62, 5  ;;  %v745_v14 = vshrl.u32 %v420_v63, 16  ;;  %v748_v12 = vshll.u32 %v420_v63, 16 }
  0xfb   : > { %2469 = vst.msk [vmem:[#allocation2 + $0x20] sm:$0xff] %vm2464_vm12, %v2425_v2  ;;  %2983 = vrot.lane.b32.xlu1 %v4425_v3, %s5033_s14  ;;  %v737_v16 = vor.u32 %v736_v8, %v732_v7  ;;  %v754_v17 = vshll.u32 %v421_v54, 16  ;;  %v758_v18 = vshrl.u32 %v421_v54, 16  ;;  %v3202_v22 = vsel %vm5130_vm2, %v4489_v10, %v3201_v13  ;;  %v4210_v44 = vld [vmem:[%s5128_s7 + $0x9c] sm:$0xf] }
  0xfc   : > { %3302 = vrot.lane.b32.xlu0 %v4504_v5, %s5034_s24  ;;  %v733_v21 = vsel %vm5171_vm5, %v728_v26, %v732_v7  ;;  %v3203_v23 = vrot.slane %v3201_v13, 4  ;;  %v747_v24 = vrot.slane %v745_v14, 4  ;;  %v750_v28 = vrot.slane %v748_v12, 5  ;;  %v4211_v49 = vld [vmem:[%s5128_s7 + $0xa0] sm:$0xf] }
  0xfd   : > { %v2427_v20 = vpop.permute.xlu1 %2426  ;;  %v738_v27 = vrot.slane %v737_v16, 4  ;;  %v756_v29 = vrot.slane %v754_v17, 5  ;;  %v760_v30 = vrot.slane %v758_v18, 4  ;;  %v764_v32 = vshll.u32 %v422_v11, 16  ;;  %v4212_v4 = vld [vmem:[%s5128_s7 + $0xa4] sm:$0x1] }
  0xfe   : > { %2470 = vst.msk [vmem:[#allocation2 + $0x28] sm:$0xff] %vm2464_vm12, %v2427_v20  ;;  %v2970_v25 = vpop.permute.xlu0 %2969  ;;  %v3205_v33 = vsel %vm5130_vm2, %v3203_v23, %v3204_v58  ;;  %v4106_v39 = vrot.slane %v965_v15, 9  ;;  %v1114_v34 = vrot.slane %v966_v19, 5  ;;  %v751_v38 = vor.u32 %v750_v28, %v747_v24  ;;  %v4213_v6 = vld [vmem:[%s5128_s7 + $0xa8] sm:$0xf]  ;;  %v4869_v17 = vld [vmem:[%s5128_s7 + $0x9c] sm:$0xff]  }
  0xff   : > { %3014 = vst.msk [vmem:[#allocation2 + $0x20] sm:$0xff] %vm3009_vm13, %v2970_v25  ;;  %v743_v36 = vsel %vm5171_vm5, %v738_v27, %v742_v9  ;;  %v4505_v37 = vcombine.low %v3202_v22, %v3205_v33  ;;  %v761_v40 = vor.u32 %v760_v30, %v756_v29  ;;  %v766_v46 = vrot.slane %v764_v32, 5  ;;  %v4214_v8 = vld [vmem:[%s5128_s7 + $0xac] sm:$0xf]  ;;  %v4215_v9 = vld [vmem:[%s5128_s7 + $0xb0] sm:$0x1] }
 0x100   : > { %v4090_v45 = vcombine.low %v733_v21, %v743_v36  ;;  %v1115_v47 = vsel %vm5130_vm2, %v4106_v39, %v1114_v34  ;;  %v1116_v48 = vrot.slane %v1114_v34, 4  ;;  %v752_v51 = vrot.slane %v751_v38, 4  ;;  %v4274_v15 = vld [vmem:[%s5128_s7 + $0x9c] sm:$0xe]  ;;  %v4275_v16 = vld [vmem:[%s5128_s7 + $0xa0] sm:$0xf] }
 0x101   : > { %v2972_v43 = vpop.permute.xlu1 %2971  ;;  %3304 = vrot.lane.b32.xlu0 %v4505_v37, %s5034_s24  ;;  %v762_v52 = vrot.slane %v761_v40, 4  ;;  %v1117_v55 = vrot.slane %v967_v31, 5  ;;  %v4107_v56 = vrot.slane %v968_v35, 9  ;;  %v1121_v57 = vrot.slane %v969_v41, 5  ;;  %v4276_v21 = vld [vmem:[%s5128_s7 + $0xa4] sm:$0x1] }
 0x102   : > { %3015 = vst.msk [vmem:[#allocation2 + $0x28] sm:$0xff] %vm3009_vm13, %v2972_v43  ;;  %v3291_v50 = vpop.permute.xlu0 %3290  ;;  %888 = vrot.lane.b32.xlu1 %v4090_v45, %s5030_s11  ;;  %v1124_v59 = vrot.slane %v970_v42, 5  ;;  %v1771_v61 = vshrl.u32 %v4210_v44, 16  ;;  %v1774_v62 = vshll.u32 %v4210_v44, 16  ;;  %v757_v63 = vsel %vm5171_vm5, %v752_v51, %v756_v29  ;;  %v4277_v31 = vld [vmem:[%s5128_s7 + $0xa8] sm:$0xe] }
 0x103   : > { %3335 = vst.msk [vmem:[#allocation2 + $0x20] sm:$0xff] %vm3330_vm14, %v3291_v50  ;;  %v767_v1 = vsel %vm5171_vm5, %v762_v52, %v766_v46  ;;  %v1118_v2 = vsel %vm5130_vm2, %v1116_v48, %v1117_v55  ;;  %v1780_v5 = vshll.u32 %v4211_v49, 16  ;;  %v1122_v60 = vsel %vm5130_vm2, %v4107_v56, %v1121_v57  ;;  %v4278_v33 = vld [vmem:[%s5128_s7 + $0xac] sm:$0xf]  ;;  %v4279_v43 = vld [vmem:[%s5128_s7 + $0xb0] sm:$0x1] }
 0x104   : > { %v4091_v7 = vcombine.low %v757_v63, %v767_v1  ;;  %v4122_v54 = vcombine.low %v1115_v47, %v1118_v2  ;;  %v1123_v3 = vrot.slane %v1121_v57, 4  ;;  %v1773_v26 = vrot.slane %v1771_v61, 4  ;;  %v4870_v37 = vld [vmem:[%s5128_s7 + $0xa8] sm:$0xff]  }
 0x105   : > { %v1776_v13 = vrot.slane %v1774_v62, 5  ;;  %v1782_v58 = vrot.slane %v1780_v5, 5  ;;  %v1784_v14 = vshrl.u32 %v4211_v49, 16  ;;  %v1790_v18 = vshll.u32 %v4212_v4, 16  ;;  %v4402_v56 = vld [vmem:[%s5128_s7 + $0xa8] sm:$0xf] }
 0x106   : > { %v3293_v11 = vpop.permute.xlu0 %3292  ;;  %890 = vrot.lane.b32.xlu1 %v4091_v7, %s5030_s11  ;;  %1212 = vrot.lane.b32.xlu0 %v4122_v54, %s5029_s10  ;;  %v1125_v12 = vsel %vm5130_vm2, %v1123_v3, %v1124_v59  ;;  %v1795_v19 = vshrl.u32 %v4213_v6, 16  ;;  %v1798_v20 = vshll.u32 %v4213_v6, 16  ;;  %v1804_v25 = vshll.u32 %v4214_v8, 16  ;;  %v4403_v1 = vld [vmem:[%s5128_s7 + $0xac] sm:$0xf] }
 0x107   : > { %v877_v10 = vpop.permute.xlu1 %876  ;;  %3336 = vst.msk [vmem:[#allocation2 + $0x28] sm:$0xff] %vm3330_vm14, %v3293_v11  ;;  %v4123_v22 = vcombine.low %v1122_v60, %v1125_v12  ;;  %v1777_v23 = vor.u32 %v1776_v13, %v1773_v26  ;;  %v1786_v24 = vrot.slane %v1784_v14, 4  ;;  %v1792_v27 = vrot.slane %v1790_v18, 5  ;;  %v4404_v7 = vld [vmem:[%s5128_s7 + $0xb0] sm:$0x1] }
 0x108   : > { %919 = vst.msk [vmem:[#allocation2 + $0x30] sm:$0xff] %vm912_vm7, %v877_v10  ;;  %v1797_v28 = vrot.slane %v1795_v19, 4  ;;  %v1800_v29 = vrot.slane %v1798_v20, 5  ;;  %v1808_v30 = vshrl.u32 %v4214_v8, 16  ;;  %v1806_v35 = vrot.slane %v1804_v25, 5 }
 0x109   : > { %v1778_v39 = vrot.slane %v1777_v23, 4  ;;  %v1787_v34 = vor.u32 %v1786_v24, %v1782_v58  ;;  %v1814_v36 = vshll.u32 %v4215_v9, 16  ;;  %v4298_v41 = vrot.slane %v4274_v15, 9  ;;  %v4405_v54 = vld [vmem:[%s5128_s7 + $0xb4] sm:$0xf] }
 0x10a   : > { %v3351_v32 = vld [vmem:[#allocation2 + $0x20] sm:$0xff]  ;;  %1214 = vrot.lane.b32.xlu1 %v4123_v22, %s5029_s10  ;;  %1393 = vrot.lane.b32.xlu0 %v4869_v17, %s5027_s8  ;;  %v1801_v38 = vor.u32 %v1800_v29, %v1797_v28  ;;  %v1810_v40 = vrot.slane %v1808_v30, 4  ;;  %v2161_v42 = vrot.slane %v4275_v16, 5  ;;  %v2164_v48 = vrot.slane %v4276_v21, 5  ;;  %v4406_v15 = vld [vmem:[%s5128_s7 + $0xb8] sm:$0xf] }
 0x10b   : > { %4729 = vmatprep.mubr.msk.bf16.mxu0 %vm3383_vm0, %v3351_v32  ;;  %v1783_v45 = vsel %vm5171_vm5, %v1778_v39, %v1782_v58  ;;  %v1788_v46 = vrot.slane %v1787_v34, 4  ;;  %v1816_v47 = vrot.slane %v1814_v36, 5  ;;  %v4299_v61 = vrot.slane %v4277_v31, 9  ;;  %v4407_v19 = vld [vmem:[%s5128_s7 + $0xbc] sm:$0x1]  ;;  %v4873_v22 = vld [vmem:[%s5128_s7 + $0xa8] sm:$0xff]  }
 0x10c   : > { %v1201_v44 = vpop.permute.xlu0 %1200  ;;  %v1802_v50 = vrot.slane %v1801_v38, 4  ;;  %v1811_v51 = vor.u32 %v1810_v40, %v1806_v35  ;;  %v2162_v52 = vsel %vm5130_vm2, %v4298_v41, %v2161_v42  ;;  %v2163_v55 = vrot.slane %v2161_v42, 4  ;;  %v4466_v20 = vld [vmem:[%s5128_s7 + $0xa8] sm:$0xe]  ;;  %v4468_v32 = vld [vmem:[%s5128_s7 + $0xb0] sm:$0x1] }
 0x10d   : > { %v879_v49 = vpop.permute.xlu1 %878  ;;  %1243 = vst.msk [vmem:[#allocation2 + $0x30] sm:$0xff] %vm1236_vm8, %v1201_v44  ;;  %v1793_v59 = vsel %vm5171_vm5, %v1788_v46, %v1792_v27  ;;  %v2168_v62 = vrot.slane %v4278_v33, 5  ;;  %v2171_v63 = vrot.slane %v4279_v43, 5  ;;  %v2818_v11 = vshrl.u32 %v4402_v56, 16  ;;  %v4467_v27 = vld [vmem:[%s5128_s7 + $0xac] sm:$0xf] }
 0x10e   : > { %920 = vst.msk [vmem:[#allocation2 + $0x38] sm:$0xff] %vm912_vm7, %v879_v49  ;;  %v3352_v57 = vld [vmem:[#allocation2 + $0x28] sm:$0xff]  ;;  %1395 = vrot.lane.b32.xlu1 %v4870_v37, %s5027_s8  ;;  %v4234_v2 = vcombine.low %v1783_v45, %v1793_v59  ;;  %v1807_v4 = vsel %vm5171_vm5, %v1802_v50, %v1806_v35  ;;  %v1812_v5 = vrot.slane %v1811_v51, 4  ;;  %v2165_v6 = vsel %vm5130_vm2, %v2163_v55, %v2164_v48  ;;  %v4874_v40 = vld [vmem:[%s5128_s7 + $0xb4] sm:$0xff]   ;;  %v425_v50 = vld [vmem:[%s5128_s7 + $0xb0] sm:$0x1] }
 0x10f   : > { %4730 = vmatmul.mubr.msk.bf16.gmra.mrb[8].mxu0 %vm3383_vm0, %v3352_v57  ;;  %v4314_v3 = vcombine.low %v2162_v52, %v2165_v6  ;;  %v2169_v8 = vsel %vm5130_vm2, %v4299_v61, %v2168_v62  ;;  %v2170_v9 = vrot.slane %v2168_v62, 4  ;;  %v2821_v13 = vshll.u32 %v4402_v56, 16  ;;  %v423_v38 = vld [vmem:[%s5128_s7 + $0xa8] sm:$0xf]  ;;  %v424_v45 = vld [vmem:[%s5128_s7 + $0xac] sm:$0xf] }
 0x110   : > { %v1382_v60 = vpop.permute.xlu0 %1381  ;;  %1938 = vrot.lane.b32.xlu0 %v4234_v2, %s5031_s12  ;;  %v1817_v26 = vsel %vm5171_vm5, %v1812_v5, %v1816_v47  ;;  %v2827_v58 = vshll.u32 %v4403_v1, 16  ;;  %v2831_v14 = vshrl.u32 %v4403_v1, 16  ;;  %v2820_v17 = vrot.slane %v2818_v11, 4  ;;  %v4885_v61 = vld [vmem:[%s5128_s7 + $0xa8] sm:$0xff]  }
 0x111   : > { %v1203_v10 = vpop.permute.xlu1 %1202  ;;  %1424 = vst.msk [vmem:[#allocation2 + $0x30] sm:$0xff] %vm1417_vm9, %v1382_v60  ;;  %v4235_v16 = vcombine.low %v1807_v4, %v1817_v26  ;;  %v2172_v12 = vsel %vm5130_vm2, %v2170_v9, %v2171_v63  ;;  %v2837_v18 = vshll.u32 %v4404_v7, 16  ;;  %v2823_v23 = vrot.slane %v2821_v13, 5 }
 0x112   : > { %1244 = vst.msk [vmem:[#allocation2 + $0x38] sm:$0xff] %vm1236_vm8, %v1203_v10  ;;  %v4315_v21 = vcombine.low %v2169_v8, %v2172_v12  ;;  %v2829_v24 = vrot.slane %v2827_v58, 5  ;;  %v2833_v25 = vrot.slane %v2831_v14, 4  ;;  %v2842_v29 = vshrl.u32 %v4405_v54, 16  ;;  %v4470_v10 = vld [vmem:[%s5128_s7 + $0xb8] sm:$0xf] }
 0x113   : > { %1940 = vrot.lane.b32.xlu1 %v4235_v16, %s5031_s12  ;;  %v2839_v28 = vrot.slane %v2837_v18, 5  ;;  %v2845_v30 = vshll.u32 %v4405_v54, 16  ;;  %v2851_v31 = vshll.u32 %v4406_v15, 16  ;;  %v2824_v34 = vor.u32 %v2823_v23, %v2820_v17  ;;  %v4469_v54 = vld [vmem:[%s5128_s7 + $0xb4] sm:$0xe]  ;;  %379 = vst.msk [vmem:[#allocation2 + $0x70] sm:$0xff] %vm364_vm6, %v4885_v61 }
 0x114   : > { %2259 = vrot.lane.b32.xlu0 %v4314_v3, %s5028_s9  ;;  %v2834_v35 = vor.u32 %v2833_v25, %v2829_v24  ;;  %v2855_v36 = vshrl.u32 %v4406_v15, 16  ;;  %v2861_v37 = vshll.u32 %v4407_v19, 16  ;;  %v2844_v41 = vrot.slane %v2842_v29, 4  ;;  %v4471_v14 = vld [vmem:[%s5128_s7 + $0xbc] sm:$0x1] }
 0x115   : > { %v1384_v33 = vpop.permute.xlu1 %1383  ;;  %v1927_v39 = vpop.permute.xlu0 %1926  ;;  %v2847_v42 = vrot.slane %v2845_v30, 5  ;;  %v2853_v43 = vrot.slane %v2851_v31, 5  ;;  %v4490_v44 = vrot.slane %v4466_v20, 9  ;;  %v2825_v46 = vrot.slane %v2824_v34, 4  ;;  %v426_v15 = vld [vmem:[%s5128_s7 + $0xb4] sm:$0xf] }
 0x116   : > { %1425 = vst.msk [vmem:[#allocation2 + $0x38] sm:$0xff] %vm1417_vm9, %v1384_v33  ;;  %v2835_v47 = vrot.slane %v2834_v35, 4  ;;  %v2857_v48 = vrot.slane %v2855_v36, 4  ;;  %v2863_v49 = vrot.slane %v2861_v37, 5  ;;  %v3208_v52 = vrot.slane %v4467_v27, 5 }
 0x117   : > { %1969 = vst.msk [vmem:[#allocation2 + $0x30] sm:$0xff] %vm1962_vm10, %v1927_v39  ;;  %2261 = vrot.lane.b32.xlu1 %v4315_v21, %s5028_s9  ;;  %v2848_v51 = vor.u32 %v2847_v42, %v2844_v41  ;;  %v3211_v55 = vrot.slane %v4468_v32, 5  ;;  %v769_v56 = vshrl.u32 %v423_v38, 16  ;;  %v2830_v62 = vsel %vm5171_vm5, %v2825_v46, %v2829_v24  ;;  %v427_v21 = vld [vmem:[%s5128_s7 + $0xb8] sm:$0xf] }
 0x118   : > { %2440 = vrot.lane.b32.xlu0 %v4873_v22, %s5032_s13  ;;  %v2840_v63 = vsel %vm5171_vm5, %v2835_v47, %v2839_v28  ;;  %v2858_v1 = vor.u32 %v2857_v48, %v2853_v43  ;;  %v772_v2 = vshll.u32 %v423_v38, 16  ;;  %v3209_v6 = vsel %vm5130_vm2, %v4490_v44, %v3208_v52  ;;  %v4886_v22 = vld [vmem:[%s5128_s7 + $0xb4] sm:$0xff]   ;;  %v428_v28 = vld [vmem:[%s5128_s7 + $0xbc] sm:$0x1]  ;;  %v971_v32 = vld [vmem:[%s5128_s7 + $0xa8] sm:$0xe] }
 0x119   : > { %v1929_v57 = vpop.permute.xlu1 %1928  ;;  %v2248_v59 = vpop.permute.xlu0 %2247  ;;  %v4426_v4 = vcombine.low %v2830_v62, %v2840_v63  ;;  %v2849_v5 = vrot.slane %v2848_v51, 4  ;;  %v3210_v7 = vrot.slane %v3208_v52, 4  ;;  %v771_v3 = vrot.slane %v769_v56, 4  ;;  %380 = vst.msk [vmem:[#allocation2 + $0x78] sm:$0xff] %vm364_vm6, %v4886_v22  ;;  %v972_v37 = vld [vmem:[%s5128_s7 + $0xac] sm:$0xf] }
 0x11a   : > { %1970 = vst.msk [vmem:[#allocation2 + $0x38] sm:$0xff] %vm1962_vm10, %v1929_v57  ;;  %v2859_v60 = vrot.slane %v2858_v1, 4  ;;  %v774_v8 = vrot.slane %v772_v2, 5  ;;  %v778_v9 = vshll.u32 %v424_v45, 16  ;;  %v782_v13 = vshrl.u32 %v424_v45, 16 }
 0x11b   : > { %2290 = vst.msk [vmem:[#allocation2 + $0x30] sm:$0xff] %vm2283_vm11, %v2248_v59  ;;  %2442 = vrot.lane.b32.xlu1 %v4874_v40, %s5032_s13  ;;  %v2854_v11 = vsel %vm5171_vm5, %v2849_v5, %v2853_v43  ;;  %v3212_v26 = vsel %vm5130_vm2, %v3210_v7, %v3211_v55  ;;  %v788_v58 = vshll.u32 %v425_v50, 16  ;;  %v4491_v27 = vrot.slane %v4469_v54, 9  ;;  %v973_v44 = vld [vmem:[%s5128_s7 + $0xb0] sm:$0x1] }
 0x11c   : > { %2985 = vrot.lane.b32.xlu0 %v4426_v4, %s5033_s14  ;;  %v2864_v17 = vsel %vm5171_vm5, %v2859_v60, %v2863_v49  ;;  %v4506_v18 = vcombine.low %v3209_v6, %v3212_v26  ;;  %v775_v19 = vor.u32 %v774_v8, %v771_v3  ;;  %v780_v20 = vrot.slane %v778_v9, 5  ;;  %v974_v45 = vld [vmem:[%s5128_s7 + $0xb4] sm:$0xe]  ;;  %v975_v51 = vld [vmem:[%s5128_s7 + $0xb8] sm:$0xf] }
 0x11d   : > { %v2250_v16 = vpop.permute.xlu1 %2249  ;;  %v2429_v12 = vpop.permute.xlu0 %2428  ;;  %v4427_v23 = vcombine.low %v2854_v11, %v2864_v17  ;;  %v784_v24 = vrot.slane %v782_v13, 4  ;;  %v790_v25 = vrot.slane %v788_v58, 5  ;;  %v3215_v30 = vrot.slane %v4470_v10, 5  ;;  %v976_v52 = vld [vmem:[%s5128_s7 + $0xbc] sm:$0x1] }
 0x11e   : > { %2291 = vst.msk [vmem:[#allocation2 + $0x38] sm:$0xff] %vm2283_vm11, %v2250_v16  ;;  %v776_v29 = vrot.slane %v775_v19, 4  ;;  %v3218_v31 = vrot.slane %v4471_v14, 5  ;;  %v793_v33 = vshrl.u32 %v426_v15, 16  ;;  %v796_v34 = vshll.u32 %v426_v15, 16 }
 0x11f   : > { %2471 = vst.msk [vmem:[#allocation2 + $0x30] sm:$0xff] %vm2464_vm12, %v2429_v12  ;;  %2987 = vrot.lane.b32.xlu1 %v4427_v23, %s5033_s14  ;;  %v785_v39 = vor.u32 %v784_v24, %v780_v20  ;;  %v802_v35 = vshll.u32 %v427_v21, 16  ;;  %v806_v36 = vshrl.u32 %v427_v21, 16  ;;  %v3216_v41 = vsel %vm5130_vm2, %v4491_v27, %v3215_v30  ;;  %v4216_v55 = vld [vmem:[%s5128_s7 + $0xb4] sm:$0xf] }
 0x120   : > { %3306 = vrot.lane.b32.xlu0 %v4506_v18, %s5034_s24  ;;  %v781_v40 = vsel %vm5171_vm5, %v776_v29, %v780_v20  ;;  %v3217_v42 = vrot.slane %v3215_v30, 4  ;;  %v795_v43 = vrot.slane %v793_v33, 4  ;;  %v798_v48 = vrot.slane %v796_v34, 5  ;;  %v4217_v62 = vld [vmem:[%s5128_s7 + $0xb8] sm:$0xf] }
 0x121   : > { %v2431_v38 = vpop.permute.xlu1 %2430  ;;  %v786_v47 = vrot.slane %v785_v39, 4  ;;  %v804_v49 = vrot.slane %v802_v35, 5  ;;  %v808_v50 = vrot.slane %v806_v36, 4  ;;  %v812_v57 = vshll.u32 %v428_v28, 16  ;;  %v4218_v26 = vld [vmem:[%s5128_s7 + $0xbc] sm:$0x1] }
 0x122   : > { %2472 = vst.msk [vmem:[#allocation2 + $0x38] sm:$0xff] %vm2464_vm12, %v2431_v38  ;;  %v2974_v46 = vpop.permute.xlu0 %2973  ;;  %v3219_v56 = vsel %vm5130_vm2, %v3217_v42, %v3218_v31  ;;  %v4108_v59 = vrot.slane %v971_v32, 9  ;;  %v1128_v61 = vrot.slane %v972_v37, 5  ;;  %v799_v2 = vor.u32 %v798_v48, %v795_v43  ;;  %v4219_v13 = vld [vmem:[%s5128_s7 + $0xc0] sm:$0xf]  ;;  %v4875_v32 = vld [vmem:[%s5128_s7 + $0xb4] sm:$0xff]  }
 0x123   : > { %3016 = vst.msk [vmem:[#allocation2 + $0x30] sm:$0xff] %vm3009_vm13, %v2974_v46  ;;  %v791_v63 = vsel %vm5171_vm5, %v786_v47, %v790_v25  ;;  %v4507_v1 = vcombine.low %v3216_v41, %v3219_v56  ;;  %v809_v4 = vor.u32 %v808_v50, %v804_v49  ;;  %v814_v7 = vrot.slane %v812_v57, 5  ;;  %v4220_v24 = vld [vmem:[%s5128_s7 + $0xc4] sm:$0xf]  ;;  %v4221_v31 = vld [vmem:[%s5128_s7 + $0xc8] sm:$0x1] }
 0x124   : > { %v4092_v6 = vcombine.low %v781_v40, %v791_v63  ;;  %v1129_v54 = vsel %vm5130_vm2, %v4108_v59, %v1128_v61  ;;  %v1130_v60 = vrot.slane %v1128_v61, 4  ;;  %v800_v8 = vrot.slane %v799_v2, 4  ;;  %v4280_v36 = vld [vmem:[%s5128_s7 + $0xb4] sm:$0xe]  ;;  %v4281_v43 = vld [vmem:[%s5128_s7 + $0xb8] sm:$0xf] }
 0x125   : > { %v2976_v5 = vpop.permute.xlu1 %2975  ;;  %3308 = vrot.lane.b32.xlu0 %v4507_v1, %s5034_s24  ;;  %v810_v9 = vrot.slane %v809_v4, 4  ;;  %v1131_v10 = vrot.slane %v973_v44, 5  ;;  %v4109_v11 = vrot.slane %v974_v45, 9  ;;  %v1135_v58 = vrot.slane %v975_v51, 5  ;;  %v4282_v44 = vld [vmem:[%s5128_s7 + $0xbc] sm:$0x1] }
 0x126   : > { %3017 = vst.msk [vmem:[#allocation2 + $0x38] sm:$0xff] %vm3009_vm13, %v2976_v5  ;;  %v3295_v3 = vpop.permute.xlu0 %3294  ;;  %892 = vrot.lane.b32.xlu1 %v4092_v6, %s5030_s11  ;;  %v1138_v14 = vrot.slane %v976_v52, 5  ;;  %v1819_v15 = vshrl.u32 %v4216_v55, 16  ;;  %v1822_v16 = vshll.u32 %v4216_v55, 16  ;;  %v805_v12 = vsel %vm5171_vm5, %v800_v8, %v804_v49  ;;  %v4283_v49 = vld [vmem:[%s5128_s7 + $0xc0] sm:$0xe] }
 0x127   : > { %3337 = vst.msk [vmem:[#allocation2 + $0x30] sm:$0xff] %vm3330_vm14, %v3295_v3  ;;  %v815_v17 = vsel %vm5171_vm5, %v810_v9, %v814_v7  ;;  %v1132_v18 = vsel %vm5130_vm2, %v1130_v60, %v1131_v10  ;;  %v1828_v19 = vshll.u32 %v4217_v62, 16  ;;  %v1136_v22 = vsel %vm5130_vm2, %v4109_v11, %v1135_v58  ;;  %v4284_v57 = vld [vmem:[%s5128_s7 + $0xc4] sm:$0xf]  ;;  %v4285_v2 = vld [vmem:[%s5128_s7 + $0xc8] sm:$0x1] }
 0x128   : > { %v4093_v20 = vcombine.low %v805_v12, %v815_v17  ;;  %v4124_v21 = vcombine.low %v1129_v54, %v1132_v18  ;;  %v1137_v23 = vrot.slane %v1135_v58, 4  ;;  %v1821_v27 = vrot.slane %v1819_v15, 4  ;;  %v4876_v59 = vld [vmem:[%s5128_s7 + $0xc0] sm:$0xff]  }
 0x129   : > { %v1824_v28 = vrot.slane %v1822_v16, 5  ;;  %v1830_v29 = vrot.slane %v1828_v19, 5  ;;  %v1832_v30 = vshrl.u32 %v4217_v62, 16  ;;  %v1838_v39 = vshll.u32 %v4218_v26, 16  ;;  %v4408_v11 = vld [vmem:[%s5128_s7 + $0xc0] sm:$0xf] }
 0x12a   : > { %v3297_v25 = vpop.permute.xlu0 %3296  ;;  %894 = vrot.lane.b32.xlu1 %v4093_v20, %s5030_s11  ;;  %1216 = vrot.lane.b32.xlu0 %v4124_v21, %s5029_s10  ;;  %v1139_v33 = vsel %vm5130_vm2, %v1137_v23, %v1138_v14  ;;  %v1843_v34 = vshrl.u32 %v4219_v13, 16  ;;  %v1846_v35 = vshll.u32 %v4219_v13, 16  ;;  %v1852_v41 = vshll.u32 %v4220_v24, 16  ;;  %v4409_v16 = vld [vmem:[%s5128_s7 + $0xc4] sm:$0xf] }
 0x12b   : > { %3338 = vst.msk [vmem:[#allocation2 + $0x38] sm:$0xff] %vm3330_vm14, %v3297_v25  ;;  %v4125_v37 = vcombine.low %v1136_v22, %v1139_v33  ;;  %v1825_v38 = vor.u32 %v1824_v28, %v1821_v27  ;;  %v1834_v40 = vrot.slane %v1832_v30, 4  ;;  %v1840_v45 = vrot.slane %v1838_v39, 5  ;;  %v4410_v20 = vld [vmem:[%s5128_s7 + $0xc8] sm:$0x1] }
 0x12c   : > { %v881_v42 = vpop.permute.xlu1 %880  ;;  %v1845_v46 = vrot.slane %v1843_v34, 4  ;;  %v1848_v47 = vrot.slane %v1846_v35, 5  ;;  %v1856_v48 = vshrl.u32 %v4220_v24, 16  ;;  %v1854_v55 = vrot.slane %v1852_v41, 5  ;;  %v4411_v28 = vld [vmem:[%s5128_s7 + $0xcc] sm:$0xf] }
 0x12d   : > { %921 = vst.msk [vmem:[#allocation2 + $0x40] sm:$0xff] %vm912_vm7, %v881_v42  ;;  %v1826_v51 = vrot.slane %v1825_v38, 4  ;;  %v1835_v52 = vor.u32 %v1834_v40, %v1830_v29  ;;  %v1862_v56 = vshll.u32 %v4221_v31, 16  ;;  %v4300_v63 = vrot.slane %v4280_v36, 9  ;;  %v4879_v40 = vld [vmem:[%s5128_s7 + $0xc0] sm:$0xff]  }
 0x12e   : > { %v3353_v50 = vld [vmem:[#allocation2 + $0x30] sm:$0xff]  ;;  %1218 = vrot.lane.b32.xlu1 %v4125_v37, %s5029_s10  ;;  %1397 = vrot.lane.b32.xlu0 %v4875_v32, %s5027_s8  ;;  %v1849_v61 = vor.u32 %v1848_v47, %v1845_v46  ;;  %v1858_v62 = vrot.slane %v1856_v48, 4  ;;  %v2175_v1 = vrot.slane %v4281_v43, 5  ;;  %v2178_v54 = vrot.slane %v4282_v44, 5  ;;  %v4472_v44 = vld [vmem:[%s5128_s7 + $0xc0] sm:$0xe] }
 0x12f   : > { %4733 = vmatprep.mubr.msk.bf16.mxu0 %vm3383_vm0, %v3353_v50  ;;  %v1831_v5 = vsel %vm5171_vm5, %v1826_v51, %v1830_v29  ;;  %v1836_v6 = vrot.slane %v1835_v52, 4  ;;  %v1864_v7 = vrot.slane %v1862_v56, 5  ;;  %v4301_v58 = vrot.slane %v4283_v49, 9  ;;  %v4412_v32 = vld [vmem:[%s5128_s7 + $0xd0] sm:$0xf]  ;;  %s4600_s10 = sshll.u32 %s5017_s18, 11 }
 0x130   : > { %v1205_v4 = vpop.permute.xlu0 %1204  ;;  %v1850_v3 = vrot.slane %v1849_v61, 4  ;;  %v1859_v8 = vor.u32 %v1858_v62, %v1854_v55  ;;  %v2176_v9 = vsel %vm5130_vm2, %v4300_v63, %v2175_v1  ;;  %v2177_v10 = vrot.slane %v2175_v1, 4  ;;  %v4413_v37 = vld [vmem:[%s5128_s7 + $0xd4] sm:$0x1]  ;;  %v4473_v50 = vld [vmem:[%s5128_s7 + $0xc4] sm:$0xf] }
 0x131   : > { %v883_v60 = vpop.permute.xlu1 %882  ;;  %1245 = vst.msk [vmem:[#allocation2 + $0x40] sm:$0xff] %vm1236_vm8, %v1205_v4  ;;  %v1841_v13 = vsel %vm5171_vm5, %v1836_v6, %v1840_v45  ;;  %v2182_v14 = vrot.slane %v4284_v57, 5  ;;  %v2185_v15 = vrot.slane %v4285_v2, 5  ;;  %v2866_v27 = vshrl.u32 %v4408_v11, 16  ;;  %v4474_v57 = vld [vmem:[%s5128_s7 + $0xc8] sm:$0x1] }
 0x132   : > { %922 = vst.msk [vmem:[#allocation2 + $0x48] sm:$0xff] %vm912_vm7, %v883_v60  ;;  %v3354_v26 = vld [vmem:[#allocation2 + $0x38] sm:$0xff]  ;;  %1399 = vrot.lane.b32.xlu1 %v4876_v59, %s5027_s8  ;;  %v4236_v12 = vcombine.low %v1831_v5, %v1841_v13  ;;  %v1855_v17 = vsel %vm5171_vm5, %v1850_v3, %v1854_v55  ;;  %v1860_v18 = vrot.slane %v1859_v8, 4  ;;  %v2179_v19 = vsel %vm5130_vm2, %v2177_v10, %v2178_v54  ;;  %v4475_v59 = vld [vmem:[%s5128_s7 + $0xcc] sm:$0xe] }
 0x133   : > { %4734 = vmatmul.mubr.msk.bf16.gmra.mrb[12].mxu0 %vm3383_vm0, %v3354_v26  ;;  %v4316_v22 = vcombine.low %v2176_v9, %v2179_v19  ;;  %v2183_v23 = vsel %vm5130_vm2, %v4301_v58, %v2182_v14  ;;  %v2184_v24 = vrot.slane %v2182_v14, 4  ;;  %v2869_v30 = vshll.u32 %v4408_v11, 16  ;;  %v4476_v2 = vld [vmem:[%s5128_s7 + $0xd0] sm:$0xf]  ;;  %v4477_v10 = vld [vmem:[%s5128_s7 + $0xd4] sm:$0x1] }
 0x134   : > { %v1386_v21 = vpop.permute.xlu0 %1385  ;;  %1942 = vrot.lane.b32.xlu0 %v4236_v12, %s5031_s12  ;;  %v1865_v29 = vsel %vm5171_vm5, %v1860_v18, %v1864_v7  ;;  %v2875_v31 = vshll.u32 %v4409_v16, 16  ;;  %v2879_v33 = vshrl.u32 %v4409_v16, 16  ;;  %v2868_v35 = vrot.slane %v2866_v27, 4  ;;  %v4880_v60 = vld [vmem:[%s5128_s7 + $0xcc] sm:$0xff]   ;;  %s6183_s7 = sand.u32 1, %s5009_s16  }
 0x135   : > { %v1207_v25 = vpop.permute.xlu1 %1206  ;;  %1426 = vst.msk [vmem:[#allocation2 + $0x40] sm:$0xff] %vm1417_vm9, %v1386_v21  ;;  %v4237_v39 = vcombine.low %v1855_v17, %v1865_v29  ;;  %v2186_v34 = vsel %vm5130_vm2, %v2184_v24, %v2185_v15  ;;  %v2885_v36 = vshll.u32 %v4410_v20, 16  ;;  %v2871_v41 = vrot.slane %v2869_v30, 5  ;;  %s4060_s8 = sshll.u32 %s6183_s7, 7  ;;  %s3866_s29 = scalar_lea.sflag [#allocation4], %s6183_s7 }
 0x136   : > { %1246 = vst.msk [vmem:[#allocation2 + $0x48] sm:$0xff] %vm1236_vm8, %v1207_v25  ;;  %v4317_v38 = vcombine.low %v2183_v23, %v2186_v34  ;;  %v2877_v42 = vrot.slane %v2875_v31, 5  ;;  %v2881_v43 = vrot.slane %v2879_v33, 4  ;;  %v2890_v46 = vshrl.u32 %v4411_v28, 16 }
 0x137   : > { %1944 = vrot.lane.b32.xlu1 %v4237_v39, %s5031_s12  ;;  %v2887_v45 = vrot.slane %v2885_v36, 5  ;;  %v2893_v47 = vshll.u32 %v4411_v28, 16  ;;  %v2899_v48 = vshll.u32 %v4412_v32, 16  ;;  %v2872_v51 = vor.u32 %v2871_v41, %v2868_v35 }
 0x138   : > { %2263 = vrot.lane.b32.xlu0 %v4316_v22, %s5028_s9  ;;  %v2882_v52 = vor.u32 %v2881_v43, %v2877_v42  ;;  %v2903_v55 = vshrl.u32 %v4412_v32, 16  ;;  %v2909_v56 = vshll.u32 %v4413_v37, 16  ;;  %v2892_v61 = vrot.slane %v2890_v46, 4 }
 0x139   : > { %v1388_v49 = vpop.permute.xlu1 %1387  ;;  %v2895_v62 = vrot.slane %v2893_v47, 5  ;;  %v2901_v63 = vrot.slane %v2899_v48, 5  ;;  %v4492_v1 = vrot.slane %v4472_v44, 9  ;;  %v1931_v4 = vpop.permute.xlu0 %1930  ;;  %v2873_v5 = vrot.slane %v2872_v51, 4 }
 0x13a   : > { %1427 = vst.msk [vmem:[#allocation2 + $0x48] sm:$0xff] %vm1417_vm9, %v1388_v49  ;;  %v2883_v6 = vrot.slane %v2882_v52, 4  ;;  %v2905_v7 = vrot.slane %v2903_v55, 4  ;;  %v2911_v54 = vrot.slane %v2909_v56, 5  ;;  %v3222_v8 = vrot.slane %v4473_v50, 5 }
 0x13b   : > { %1971 = vst.msk [vmem:[#allocation2 + $0x40] sm:$0xff] %vm1962_vm10, %v1931_v4  ;;  %2265 = vrot.lane.b32.xlu1 %v4317_v38, %s5028_s9  ;;  %v2896_v3 = vor.u32 %v2895_v62, %v2892_v61  ;;  %v3225_v9 = vrot.slane %v4474_v57, 5  ;;  %v4493_v11 = vrot.slane %v4475_v59, 9  ;;  %v2878_v26 = vsel %vm5171_vm5, %v2873_v5, %v2877_v42  ;;  %s6191_s9 = scalar_lea.vmem [#allocation3], %s4060_s8 }
 0x13c   : > { %2444 = vrot.lane.b32.xlu0 %v4879_v40, %s5032_s13  ;;  %v2888_v13 = vsel %vm5171_vm5, %v2883_v6, %v2887_v45  ;;  %v2906_v58 = vor.u32 %v2905_v7, %v2901_v63  ;;  %v3229_v14 = vrot.slane %v4476_v2, 5  ;;  %v3223_v17 = vsel %vm5130_vm2, %v4492_v1, %v3222_v8  ;;  %s3889_s12 = sshll.u32 %s6191_s9, 4  ;;  %s6227_s12 = int_to_ptr.vmem [resolvable:$true] %s3889_s12 }
 0x13d   : > { %v1933_v15 = vpop.permute.xlu1 %1932  ;;  %v4428_v16 = vcombine.low %v2878_v26, %v2888_v13  ;;  %v2897_v12 = vrot.slane %v2896_v3, 4  ;;  %v3224_v18 = vrot.slane %v3222_v8, 4  ;;  %v2252_v19 = vpop.permute.xlu0 %2251  ;;  %v3232_v22 = vrot.slane %v4477_v10, 5  ;;  %s4887_s30 = scalar_lea.vmem %s6227_s12, 2048  ;;  %p4894_p1 = scmp.lt.s32.totalorder %s6227_s12, %s4892_s6 }
 0x13e   : > { %1972 = vst.msk [vmem:[#allocation2 + $0x48] sm:$0xff] %vm1962_vm10, %v1933_v15  ;;  %v2907_v20 = vrot.slane %v2906_v58, 4  ;;  %v3231_v21 = vrot.slane %v3229_v14, 4  ;;  %v3230_v28 = vsel %vm5130_vm2, %v4493_v11, %v3229_v14  ;;  %p4888_p12 = scmp.ne.s32.totalorder %s6227_s12, %s4887_s30  ;;  %p4895_p2 = scmp.lt.s32.totalorder %s4893_s26, %s4887_s30 }
 0x13f   : > { %2292 = vst.msk [vmem:[#allocation2 + $0x40] sm:$0xff] %vm2283_vm11, %v2252_v19  ;;  %2446 = vrot.lane.b32.xlu1 %v4880_v60, %s5032_s13  ;;  %v2902_v23 = vsel %vm5171_vm5, %v2897_v12, %v2901_v63  ;;  %v3226_v24 = vsel %vm5130_vm2, %v3224_v18, %v3225_v9 }
 0x140   : > { %2989 = vrot.lane.b32.xlu0 %v4428_v16, %s5033_s14  ;;  %v2912_v25 = vsel %vm5171_vm5, %v2907_v20, %v2911_v54  ;;  %v4508_v27 = vcombine.low %v3223_v17, %v3226_v24  ;;  %v3233_v29 = vsel %vm5130_vm2, %v3231_v21, %v3232_v22  ;;  %p4889_p13 = pnand %p4888_p12, %p5106_p4  ;;  %p4896_p3 = por %p4895_p2, %p4894_p1 }
 0x141   : > { %v2254_v30 = vpop.permute.xlu1 %2253  ;;  %v4429_v31 = vcombine.low %v2902_v23, %v2912_v25  ;;  %v2433_v33 = vpop.permute.xlu0 %2432  ;;  %v4509_v32 = vcombine.low %v3230_v28, %v3233_v29 }
 0x142   : > { %2293 = vst.msk [vmem:[#allocation2 + $0x48] sm:$0xff] %vm2283_vm11, %v2254_v30  ;;  %p4890_p0 = pneg %p4889_p13 }
 0x143   : > { %2473 = vst.msk [vmem:[#allocation2 + $0x40] sm:$0xff] %vm2464_vm12, %v2433_v33  ;;  %2991 = vrot.lane.b32.xlu1 %v4429_v31, %s5033_s14 }
 0x144   : > { %3310 = vrot.lane.b32.xlu0 %v4508_v27, %s5034_s24  ;;  %p4897_p5 = pnand %p4896_p3, %p4890_p0 }
 0x145   : > { %v2435_v53 = vpop.permute.xlu1 %2434 }
 0x146   : > { %2474 = vst.msk [vmem:[#allocation2 + $0x48] sm:$0xff] %vm2464_vm12, %v2435_v53  ;;  %v2978_v39 = vpop.permute.xlu0 %2977 }
 0x147   : > { %3312 = vrot.lane.b32.xlu1 %v4509_v32, %s5034_s24  ;;  %3018 = vst.msk [vmem:[#allocation2 + $0x40] sm:$0xff] %vm3009_vm13, %v2978_v39  ;;  %s6225_s24 = scalar_lea.hbm %s6354_s2, %s4600_s10 }
 0x149   : > { %v2980_v0 = vpop.permute.xlu1 %2979 }
 0x14a   : > { %3019 = vst.msk [vmem:[#allocation2 + $0x48] sm:$0xff] %vm3009_vm13, %v2980_v0  ;;  %v3299_v34 = vpop.permute.xlu0 %3298 }
 0x14b   : > { %3339 = vst.msk [vmem:[#allocation2 + $0x40] sm:$0xff] %vm3330_vm14, %v3299_v34 }
 0x14f   : > { %v3301_v35 = vpop.permute.xlu0 %3300 }
 0x150   : > { %v885_v36 = vpop.permute.xlu1 %884  ;;  %3340 = vst.msk [vmem:[#allocation2 + $0x48] sm:$0xff] %vm3330_vm14, %v3301_v35 }
 0x151   : > { %923 = vst.msk [vmem:[#allocation2 + $0x50] sm:$0xff] %vm912_vm7, %v885_v36 }
 0x152   : > { %v3355_v37 = vld [vmem:[#allocation2 + $0x40] sm:$0xff] }
 0x153   : > { %4737 = vmatprep.mubr.msk.bf16.mxu1 %vm3383_vm0, %v3355_v37 }
 0x154   : > { %v887_v38 = vpop.permute.xlu1 %886  ;;  %v1209_v40 = vpop.permute.xlu0 %1208 }
 0x155   : > { %924 = vst.msk [vmem:[#allocation2 + $0x58] sm:$0xff] %vm912_vm7, %v887_v38 }
 0x156   : > { %1247 = vst.msk [vmem:[#allocation2 + $0x50] sm:$0xff] %vm1236_vm8, %v1209_v40 }
 0x157   : > { %v3356_v41 = vld [vmem:[#allocation2 + $0x48] sm:$0xff] }
 0x158   : > { %v1211_v42 = vpop.permute.xlu1 %1210  ;;  %v1390_v43 = vpop.permute.xlu0 %1389  ;;  %4738 = vmatmul.mubr.msk.bf16.vlgmr.msra.gmra.mrb[0].mxu1 %vm3383_vm0, %v3356_v41 }
 0x159   : > { %1248 = vst.msk [vmem:[#allocation2 + $0x58] sm:$0xff] %vm1236_vm8, %v1211_v42 }
 0x15a   : > { %1428 = vst.msk [vmem:[#allocation2 + $0x50] sm:$0xff] %vm1417_vm9, %v1390_v43 }
 0x15c   : > { %v1392_v44 = vpop.permute.xlu1 %1391 }
 0x15d   : > { %1429 = vst.msk [vmem:[#allocation2 + $0x58] sm:$0xff] %vm1417_vm9, %v1392_v44 }
 0x15e   : > { %v1935_v45 = vpop.permute.xlu0 %1934 }
 0x15f   : > { %1973 = vst.msk [vmem:[#allocation2 + $0x50] sm:$0xff] %vm1962_vm10, %v1935_v45 }
 0x161   : > { %v1937_v46 = vpop.permute.xlu1 %1936 }
 0x162   : > { %1974 = vst.msk [vmem:[#allocation2 + $0x58] sm:$0xff] %vm1962_vm10, %v1937_v46  ;;  %v2256_v47 = vpop.permute.xlu0 %2255 }
 0x163   : > { %2294 = vst.msk [vmem:[#allocation2 + $0x50] sm:$0xff] %vm2283_vm11, %v2256_v47 }
 0x165   : > { %v2258_v48 = vpop.permute.xlu1 %2257 }
 0x166   : > { %2295 = vst.msk [vmem:[#allocation2 + $0x58] sm:$0xff] %vm2283_vm11, %v2258_v48  ;;  %v2437_v49 = vpop.permute.xlu0 %2436 }
 0x167   : > { %2475 = vst.msk [vmem:[#allocation2 + $0x50] sm:$0xff] %vm2464_vm12, %v2437_v49 }
 0x169   : > { %v2439_v50 = vpop.permute.xlu1 %2438 }
 0x16a   : > { %2476 = vst.msk [vmem:[#allocation2 + $0x58] sm:$0xff] %vm2464_vm12, %v2439_v50  ;;  %v2982_v51 = vpop.permute.xlu0 %2981 }
 0x16b   : > { %3020 = vst.msk [vmem:[#allocation2 + $0x50] sm:$0xff] %vm3009_vm13, %v2982_v51 }
 0x16d   : > { %v2984_v52 = vpop.permute.xlu1 %2983 }
 0x16e   : > { %3021 = vst.msk [vmem:[#allocation2 + $0x58] sm:$0xff] %vm3009_vm13, %v2984_v52  ;;  %v3303_v55 = vpop.permute.xlu0 %3302 }
 0x16f   : > { %3341 = vst.msk [vmem:[#allocation2 + $0x50] sm:$0xff] %vm3330_vm14, %v3303_v55 }
 0x173   : > { %v3305_v56 = vpop.permute.xlu0 %3304 }
 0x174   : > { %v889_v57 = vpop.permute.xlu1 %888  ;;  %3342 = vst.msk [vmem:[#allocation2 + $0x58] sm:$0xff] %vm3330_vm14, %v3305_v56 }
 0x175   : > { %925 = vst.msk [vmem:[#allocation2 + $0x60] sm:$0xff] %vm912_vm7, %v889_v57 }
 0x176   : > { %v3357_v59 = vld [vmem:[#allocation2 + $0x50] sm:$0xff] }
 0x177   : > { %4741 = vmatprep.mubr.msk.bf16.mxu1 %vm3383_vm0, %v3357_v59 }
 0x178   : > { %v891_v61 = vpop.permute.xlu1 %890  ;;  %v1213_v62 = vpop.permute.xlu0 %1212 }
 0x179   : > { %926 = vst.msk [vmem:[#allocation2 + $0x68] sm:$0xff] %vm912_vm7, %v891_v61 }
 0x17a   : > { %1249 = vst.msk [vmem:[#allocation2 + $0x60] sm:$0xff] %vm1236_vm8, %v1213_v62 }
 0x17b   : > { %v3358_v63 = vld [vmem:[#allocation2 + $0x58] sm:$0xff] }
 0x17c   : > { %v1215_v1 = vpop.permute.xlu1 %1214  ;;  %v1394_v2 = vpop.permute.xlu0 %1393  ;;  %4742 = vmatmul.mubr.msk.bf16.gmra.mrb[4].mxu1 %vm3383_vm0, %v3358_v63 }
 0x17d   : > { %1250 = vst.msk [vmem:[#allocation2 + $0x68] sm:$0xff] %vm1236_vm8, %v1215_v1 }
 0x17e   : > { %1430 = vst.msk [vmem:[#allocation2 + $0x60] sm:$0xff] %vm1417_vm9, %v1394_v2 }
 0x180   : > { %v1396_v4 = vpop.permute.xlu1 %1395 }
 0x181   : > { %1431 = vst.msk [vmem:[#allocation2 + $0x68] sm:$0xff] %vm1417_vm9, %v1396_v4 }
 0x182   : > { %v1939_v5 = vpop.permute.xlu0 %1938 }
 0x183   : > { %1975 = vst.msk [vmem:[#allocation2 + $0x60] sm:$0xff] %vm1962_vm10, %v1939_v5 }
 0x185   : > { %v1941_v6 = vpop.permute.xlu1 %1940 }
 0x186   : > { %1976 = vst.msk [vmem:[#allocation2 + $0x68] sm:$0xff] %vm1962_vm10, %v1941_v6  ;;  %v2260_v7 = vpop.permute.xlu0 %2259 }
 0x187   : > { %2296 = vst.msk [vmem:[#allocation2 + $0x60] sm:$0xff] %vm2283_vm11, %v2260_v7 }
 0x189   : > { %v2262_v54 = vpop.permute.xlu1 %2261 }
 0x18a   : > { %2297 = vst.msk [vmem:[#allocation2 + $0x68] sm:$0xff] %vm2283_vm11, %v2262_v54  ;;  %v2441_v60 = vpop.permute.xlu0 %2440 }
 0x18b   : > { %2477 = vst.msk [vmem:[#allocation2 + $0x60] sm:$0xff] %vm2464_vm12, %v2441_v60 }
 0x18d   : > { %v2443_v3 = vpop.permute.xlu1 %2442 }
 0x18e   : > { %2478 = vst.msk [vmem:[#allocation2 + $0x68] sm:$0xff] %vm2464_vm12, %v2443_v3  ;;  %v2986_v8 = vpop.permute.xlu0 %2985 }
 0x18f   : > { %3022 = vst.msk [vmem:[#allocation2 + $0x60] sm:$0xff] %vm3009_vm13, %v2986_v8 }
 0x191   : > { %v2988_v9 = vpop.permute.xlu1 %2987 }
 0x192   : > { %3023 = vst.msk [vmem:[#allocation2 + $0x68] sm:$0xff] %vm3009_vm13, %v2988_v9  ;;  %v3307_v10 = vpop.permute.xlu0 %3306 }
 0x193   : > { %3343 = vst.msk [vmem:[#allocation2 + $0x60] sm:$0xff] %vm3330_vm14, %v3307_v10 }
 0x197   : > { %v3309_v11 = vpop.permute.xlu0 %3308 }
 0x198   : > { %v893_v26 = vpop.permute.xlu1 %892  ;;  %3344 = vst.msk [vmem:[#allocation2 + $0x68] sm:$0xff] %vm3330_vm14, %v3309_v11 }
 0x199   : > { %927 = vst.msk [vmem:[#allocation2 + $0x70] sm:$0xff] %vm912_vm7, %v893_v26 }
 0x19a   : > { %v3359_v13 = vld [vmem:[#allocation2 + $0x60] sm:$0xff] }
 0x19b   : > { %4745 = vmatprep.mubr.msk.bf16.mxu1 %vm3383_vm0, %v3359_v13 }
 0x19c   : > { %v895_v58 = vpop.permute.xlu1 %894  ;;  %v1217_v14 = vpop.permute.xlu0 %1216 }
 0x19d   : > { %928 = vst.msk [vmem:[#allocation2 + $0x78] sm:$0xff] %vm912_vm7, %v895_v58 }
 0x19e   : > { %1251 = vst.msk [vmem:[#allocation2 + $0x70] sm:$0xff] %vm1236_vm8, %v1217_v14 }
 0x19f   : > { %v4723_v15 = vpop.f32.mrb[0].mxu0  ;;  %v3360_v16 = vld [vmem:[#allocation2 + $0x68] sm:$0xff] }
 0x1a0   : > { %v3470_v12 = vpop.f32.mrb[1].mxu0  ;;  %v1219_v17 = vpop.permute.xlu1 %1218  ;;  %4746 = vmatmul.mubr.msk.bf16.gmra.mrb[8].mxu1 %vm3383_vm0, %v3360_v16  ;;  %v3797_v28 = vmul.f32 %v4723_v15, %v4723_v15 }
 0x1a1   : > { %v1398_v18 = vpop.permute.xlu0 %1397  ;;  %1252 = vst.msk [vmem:[#allocation2 + $0x78] sm:$0xff] %vm1236_vm8, %v1219_v17  ;;  %v4724_v19 = vpop.f32.mrb[2].mxu0  ;;  %v3795_v22 = vmul.f32 %v3470_v12, %v3470_v12 }
 0x1a2   : > { %1432 = vst.msk [vmem:[#allocation2 + $0x70] sm:$0xff] %vm1417_vm9, %v1398_v18  ;;  %v4609_v20 = vpack.c.bf16 %v4724_v19, %v4723_v15  ;;  %v3473_v21 = vpop.f32.mrb[3].mxu0  ;;  %v3798_v33 = vmul.f32 %v4724_v19, %v4724_v19 }
 0x1a3   : > { %v4604_v23 = vpack.c.bf16 %v3473_v21, %v3470_v12  ;;  %v3757_v24 = vadd.f32 %v3473_v21, %v3470_v12  ;;  %v3796_v25 = vmul.f32 %v3473_v21, %v3473_v21 }
 0x1a4   : > { %v1400_v27 = vpop.permute.xlu1 %1399  ;;  %4681 = vst [vmem:[%s6191_s9 + $0x8] sm:$0xff] %v4609_v20  }
 0x1a5   : > { %1433 = vst.msk [vmem:[#allocation2 + $0x78] sm:$0xff] %vm1417_vm9, %v1400_v27  ;;  %4605 = vst [vmem:[%s6191_s9] sm:$0xff] %v4604_v23   ;;  %v3758_v29 = vadd.f32 %v4723_v15, %v3757_v24  ;;  %v3827_v30 = vadd.f32 %v3796_v25, %v3795_v22 }
 0x1a6   : > { %v1943_v31 = vpop.permute.xlu0 %1942 }
 0x1a7   : > { %1977 = vst.msk [vmem:[#allocation2 + $0x70] sm:$0xff] %vm1962_vm10, %v1943_v31  ;;  %v3828_v32 = vadd.f32 %v3827_v30, %v3797_v28  ;;  %v3759_v53 = vadd.f32 %v4724_v19, %v3758_v29 }
 0x1a9   : > { %v1945_v39 = vpop.permute.xlu1 %1944  ;;  %v3829_v0 = vadd.f32 %v3828_v32, %v3798_v33 }
 0x1aa   : > { %1978 = vst.msk [vmem:[#allocation2 + $0x78] sm:$0xff] %vm1962_vm10, %v1945_v39  ;;  %v2264_v34 = vpop.permute.xlu0 %2263 }
 0x1ab   : > { %2298 = vst.msk [vmem:[#allocation2 + $0x70] sm:$0xff] %vm2283_vm11, %v2264_v34 }
 0x1ad   : > { %v2266_v35 = vpop.permute.xlu1 %2265 }
 0x1ae   : > { %2299 = vst.msk [vmem:[#allocation2 + $0x78] sm:$0xff] %vm2283_vm11, %v2266_v35  ;;  %v2445_v36 = vpop.permute.xlu0 %2444 }
 0x1af   : > { %2479 = vst.msk [vmem:[#allocation2 + $0x70] sm:$0xff] %vm2464_vm12, %v2445_v36 }
 0x1b1   : > { %v2447_v37 = vpop.permute.xlu1 %2446 }
 0x1b2   : > { %2480 = vst.msk [vmem:[#allocation2 + $0x78] sm:$0xff] %vm2464_vm12, %v2447_v37  ;;  %v2990_v38 = vpop.permute.xlu0 %2989 }
 0x1b3   : > { %3024 = vst.msk [vmem:[#allocation2 + $0x70] sm:$0xff] %vm3009_vm13, %v2990_v38 }
 0x1b5   : > { %v2992_v40 = vpop.permute.xlu1 %2991 }
 0x1b6   : > { %3025 = vst.msk [vmem:[#allocation2 + $0x78] sm:$0xff] %vm3009_vm13, %v2992_v40  ;;  %v3311_v41 = vpop.permute.xlu0 %3310 }
 0x1b7   : > { %3345 = vst.msk [vmem:[#allocation2 + $0x70] sm:$0xff] %vm3330_vm14, %v3311_v41 }
 0x1b9   : > { %v3313_v42 = vpop.permute.xlu1 %3312 }
 0x1ba   : > { %3346 = vst.msk [vmem:[#allocation2 + $0x78] sm:$0xff] %vm3330_vm14, %v3313_v42 }
 0x1be   : > { %v4727_v43 = vpop.f32.mrb[4].mxu0  ;;  %v3361_v45 = vld [vmem:[#allocation2 + $0x70] sm:$0xff] }
 0x1bf   : > { %v3486_v44 = vpop.f32.mrb[5].mxu0  ;;  %4749 = vmatprep.mubr.msk.bf16.mxu1 %vm3383_vm0, %v3361_v45  ;;  %v3801_v59 = vmul.f32 %v4727_v43, %v4727_v43 }
 0x1c0   : > { %v3760_v46 = vadd.f32 %v3759_v53, %v3486_v44  ;;  %v3799_v47 = vmul.f32 %v3486_v44, %v3486_v44  ;;  %v4728_v48 = vpop.f32.mrb[6].mxu0 }
 0x1c1   : > { %v4619_v49 = vpack.c.bf16 %v4728_v48, %v4727_v43  ;;  %v3489_v50 = vpop.f32.mrb[7].mxu0  ;;  %v3362_v57 = vld [vmem:[#allocation2 + $0x78] sm:$0xff]  ;;  %v3802_v63 = vmul.f32 %v4728_v48, %v4728_v48 }
 0x1c2   : > { %v3830_v51 = vadd.f32 %v3829_v0, %v3799_v47  ;;  %v4614_v52 = vpack.c.bf16 %v3489_v50, %v3486_v44  ;;  %v3761_v55 = vadd.f32 %v3760_v46, %v3489_v50  ;;  %v3800_v56 = vmul.f32 %v3489_v50, %v3489_v50  ;;  %4750 = vmatmul.mubr.msk.bf16.gmra.mrb[12].mxu1 %vm3383_vm0, %v3362_v57 }
 0x1c3   : > { %4683 = vst [vmem:[%s6191_s9 + $0x18] sm:$0xff] %v4619_v49  }
 0x1c4   : > { %4682 = vst [vmem:[%s6191_s9 + $0x10] sm:$0xff] %v4614_v52   ;;  %v3762_v61 = vadd.f32 %v4727_v43, %v3761_v55  ;;  %v3831_v62 = vadd.f32 %v3830_v51, %v3800_v56 }
 0x1c6   : > { %v3832_v1 = vadd.f32 %v3831_v62, %v3801_v59  ;;  %v3763_v2 = vadd.f32 %v4728_v48, %v3762_v61 }
 0x1c8   : > { %v3833_v4 = vadd.f32 %v3832_v1, %v3802_v63 }
 0x1e2   : > { %v4731_v5 = vpop.f32.mrb[8].mxu0 }
 0x1e3   : > { %v3502_v6 = vpop.f32.mrb[9].mxu0  ;;  %v3805_v13 = vmul.f32 %v4731_v5, %v4731_v5 }
 0x1e4   : > { %v3764_v7 = vadd.f32 %v3763_v2, %v3502_v6  ;;  %v3803_v54 = vmul.f32 %v3502_v6, %v3502_v6  ;;  %v4732_v60 = vpop.f32.mrb[10].mxu0 }
 0x1e5   : > { %v4629_v3 = vpack.c.bf16 %v4732_v60, %v4731_v5  ;;  %v3505_v8 = vpop.f32.mrb[11].mxu0  ;;  %v3806_v15 = vmul.f32 %v4732_v60, %v4732_v60 }
 0x1e6   : > { %v3834_v9 = vadd.f32 %v3833_v4, %v3803_v54  ;;  %v4624_v10 = vpack.c.bf16 %v3505_v8, %v3502_v6  ;;  %v3765_v11 = vadd.f32 %v3764_v7, %v3505_v8  ;;  %v3804_v26 = vmul.f32 %v3505_v8, %v3505_v8 }
 0x1e7   : > { %4685 = vst [vmem:[%s6191_s9 + $0x28] sm:$0xff] %v4629_v3  }
 0x1e8   : > { %4684 = vst [vmem:[%s6191_s9 + $0x20] sm:$0xff] %v4624_v10   ;;  %v3766_v58 = vadd.f32 %v4731_v5, %v3765_v11  ;;  %v3835_v14 = vadd.f32 %v3834_v9, %v3804_v26 }
 0x1ea   : > { %v3836_v16 = vadd.f32 %v3835_v14, %v3805_v13  ;;  %v3767_v12 = vadd.f32 %v4732_v60, %v3766_v58 }
 0x1ec   : > { %v3837_v17 = vadd.f32 %v3836_v16, %v3806_v15 }
 0x206   : > { %v4735_v18 = vpop.f32.mrb[12].mxu0 }
 0x207   : > { %v3518_v19 = vpop.f32.mrb[13].mxu0  ;;  %v3809_v30 = vmul.f32 %v4735_v18, %v4735_v18 }
 0x208   : > { %v3768_v20 = vadd.f32 %v3767_v12, %v3518_v19  ;;  %v3807_v21 = vmul.f32 %v3518_v19, %v3518_v19  ;;  %v4736_v22 = vpop.f32.mrb[14].mxu0 }
 0x209   : > { %v4639_v23 = vpack.c.bf16 %v4736_v22, %v4735_v18  ;;  %v3521_v24 = vpop.f32.mrb[15].mxu0  ;;  %v3810_v32 = vmul.f32 %v4736_v22, %v4736_v22 }
 0x20a   : > { %v3838_v25 = vadd.f32 %v3837_v17, %v3807_v21  ;;  %v4634_v27 = vpack.c.bf16 %v3521_v24, %v3518_v19  ;;  %v3769_v28 = vadd.f32 %v3768_v20, %v3521_v24  ;;  %v3808_v29 = vmul.f32 %v3521_v24, %v3521_v24 }
 0x20b   : > { %4687 = vst [vmem:[%s6191_s9 + $0x38] sm:$0xff] %v4639_v23  }
 0x20c   : > { %4686 = vst [vmem:[%s6191_s9 + $0x30] sm:$0xff] %v4634_v27   ;;  %v3770_v31 = vadd.f32 %v4735_v18, %v3769_v28  ;;  %v3839_v33 = vadd.f32 %v3838_v25, %v3808_v29 }
 0x20e   : > { %v3840_v53 = vadd.f32 %v3839_v33, %v3809_v30  ;;  %v3771_v39 = vadd.f32 %v4736_v22, %v3770_v31 }
 0x210   : > { %v3841_v0 = vadd.f32 %v3840_v53, %v3810_v32 }
 0x22b   : > { %v4739_v34 = vpop.f32.mrb[0].mxu1 }
 0x22c   : > { %v3534_v35 = vpop.f32.mrb[1].mxu1  ;;  %v3813_v46 = vmul.f32 %v4739_v34, %v4739_v34 }
 0x22d   : > { %v3772_v36 = vadd.f32 %v3771_v39, %v3534_v35  ;;  %v3811_v37 = vmul.f32 %v3534_v35, %v3534_v35  ;;  %v4740_v38 = vpop.f32.mrb[2].mxu1 }
 0x22e   : > { %v4649_v40 = vpack.c.bf16 %v4740_v38, %v4739_v34  ;;  %v3537_v41 = vpop.f32.mrb[3].mxu1  ;;  %v3814_v49 = vmul.f32 %v4740_v38, %v4740_v38 }
 0x22f   : > { %v3842_v42 = vadd.f32 %v3841_v0, %v3811_v37  ;;  %v4644_v43 = vpack.c.bf16 %v3537_v41, %v3534_v35  ;;  %v3773_v44 = vadd.f32 %v3772_v36, %v3537_v41  ;;  %v3812_v45 = vmul.f32 %v3537_v41, %v3537_v41 }
 0x230   : > { %4689 = vst [vmem:[%s6191_s9 + $0x48] sm:$0xff] %v4649_v40  }
 0x231   : > { %4688 = vst [vmem:[%s6191_s9 + $0x40] sm:$0xff] %v4644_v43   ;;  %v3774_v47 = vadd.f32 %v4739_v34, %v3773_v44  ;;  %v3843_v48 = vadd.f32 %v3842_v42, %v3812_v45 }
 0x233   : > { %v3844_v50 = vadd.f32 %v3843_v48, %v3813_v46  ;;  %v3775_v51 = vadd.f32 %v4740_v38, %v3774_v47 }
 0x235   : > { %v3845_v52 = vadd.f32 %v3844_v50, %v3814_v49 }
 0x24f   : > { %v4743_v55 = vpop.f32.mrb[4].mxu1 }
 0x250   : > { %v3550_v56 = vpop.f32.mrb[5].mxu1  ;;  %v3817_v6 = vmul.f32 %v4743_v55, %v4743_v55 }
 0x251   : > { %v3776_v57 = vadd.f32 %v3775_v51, %v3550_v56  ;;  %v3815_v59 = vmul.f32 %v3550_v56, %v3550_v56  ;;  %v4744_v61 = vpop.f32.mrb[6].mxu1 }
 0x252   : > { %v4659_v62 = vpack.c.bf16 %v4744_v61, %v4743_v55  ;;  %v3553_v63 = vpop.f32.mrb[7].mxu1  ;;  %v3818_v60 = vmul.f32 %v4744_v61, %v4744_v61 }
 0x253   : > { %v3846_v1 = vadd.f32 %v3845_v52, %v3815_v59  ;;  %v4654_v2 = vpack.c.bf16 %v3553_v63, %v3550_v56  ;;  %v3777_v4 = vadd.f32 %v3776_v57, %v3553_v63  ;;  %v3816_v5 = vmul.f32 %v3553_v63, %v3553_v63 }
 0x254   : > { %4691 = vst [vmem:[%s6191_s9 + $0x58] sm:$0xff] %v4659_v62  }
 0x255   : > { %4690 = vst [vmem:[%s6191_s9 + $0x50] sm:$0xff] %v4654_v2   ;;  %v3778_v7 = vadd.f32 %v4743_v55, %v3777_v4  ;;  %v3847_v54 = vadd.f32 %v3846_v1, %v3816_v5 }
 0x257   : > { %v3848_v3 = vadd.f32 %v3847_v54, %v3817_v6  ;;  %v3779_v8 = vadd.f32 %v4744_v61, %v3778_v7 }
 0x259   : > { %v3849_v9 = vadd.f32 %v3848_v3, %v3818_v60 }
 0x273   : > { %v4747_v10 = vpop.f32.mrb[8].mxu1 }
 0x274   : > { %v3566_v11 = vpop.f32.mrb[9].mxu1  ;;  %v3821_v19 = vmul.f32 %v4747_v10, %v4747_v10 }
 0x275   : > { %v3780_v26 = vadd.f32 %v3779_v8, %v3566_v11  ;;  %v3819_v13 = vmul.f32 %v3566_v11, %v3566_v11  ;;  %v4748_v58 = vpop.f32.mrb[10].mxu1 }
 0x276   : > { %v4669_v14 = vpack.c.bf16 %v4748_v58, %v4747_v10  ;;  %v3569_v15 = vpop.f32.mrb[11].mxu1  ;;  %v3822_v22 = vmul.f32 %v4748_v58, %v4748_v58 }
 0x277   : > { %v3850_v16 = vadd.f32 %v3849_v9, %v3819_v13  ;;  %v4664_v12 = vpack.c.bf16 %v3569_v15, %v3566_v11  ;;  %v3781_v17 = vadd.f32 %v3780_v26, %v3569_v15  ;;  %v3820_v18 = vmul.f32 %v3569_v15, %v3569_v15 }
 0x278   : > { %4693 = vst [vmem:[%s6191_s9 + $0x68] sm:$0xff] %v4669_v14  }
 0x279   : > { %4692 = vst [vmem:[%s6191_s9 + $0x60] sm:$0xff] %v4664_v12   ;;  %v3782_v20 = vadd.f32 %v4747_v10, %v3781_v17  ;;  %v3851_v21 = vadd.f32 %v3850_v16, %v3820_v18 }
 0x27b   : > { %v3852_v23 = vadd.f32 %v3851_v21, %v3821_v19  ;;  %v3783_v24 = vadd.f32 %v4748_v58, %v3782_v20 }
 0x27d   : > { %v3853_v25 = vadd.f32 %v3852_v23, %v3822_v22 }
 0x295   : > { %v4751_v27 = vpop.f32.mrb[12].mxu1 }
 0x296   : > { %v3582_v28 = vpop.f32.mrb[13].mxu1  ;;  %v3825_v35 = vmul.f32 %v4751_v27, %v4751_v27 }
 0x297   : > { %v3784_v29 = vadd.f32 %v3783_v24, %v3582_v28  ;;  %v3823_v30 = vmul.f32 %v3582_v28, %v3582_v28  ;;  %v4752_v31 = vpop.f32.mrb[14].mxu1 }
 0x298   : > { %v4679_v33 = vpack.c.bf16 %v4752_v31, %v4751_v27  ;;  %v3585_v32 = vpop.f32.mrb[15].mxu1 }
 0x299   : > { %v3854_v53 = vadd.f32 %v3853_v25, %v3823_v30  ;;  %v4674_v39 = vpack.c.bf16 %v3585_v32, %v3582_v28  ;;  %v3785_v0 = vadd.f32 %v3784_v29, %v3585_v32  ;;  %v3824_v34 = vmul.f32 %v3585_v32, %v3585_v32 }
 0x29a   : > { %4695 = vst [vmem:[%s6191_s9 + $0x78] sm:$0xff] %v4679_v33  }
 0x29b   : > { %4694 = vst [vmem:[%s6191_s9 + $0x70] sm:$0xff] %v4674_v39   ;;  %v3786_v36 = vadd.f32 %v4751_v27, %v3785_v0  ;;  %v3855_v37 = vadd.f32 %v3854_v53, %v3824_v34 }
 0x29c   : > { %4900 = shalt.err (!%p4897_p5)
}
 0x29d   : > { %s4901_s8 = scalar_lea.hbm %s6225_s24, 2048  ;;  %s4905_s13 = scalar_lea.hbm %s6354_s2, 4096 }
 0x29e   : > { %p4902_p6 = scmp.ne.s32.totalorder %s6225_s24, %s4901_s8  ;;  %p4906_p10 = scmp.lt.u32.totalorder %s6225_s24, %s6354_s2 }
 0x29f   : > { %p4907_p11 = scmp.lt.u32.totalorder %s4905_s13, %s4901_s8  ;;  %p4909_p13 = scmp.lt.u32.totalorder %s4901_s8, %s6225_s24 }
 0x2a0   : > { %p4903_p7 = pnand %p4902_p6, %p5106_p4 }
 0x2a1   : > { %p4908_p12 = por %p4907_p11, %p4906_p10 }
 0x2a2   : > { %p4904_p9 = pneg %p4903_p7 }
 0x2a3   : > { %p4910_p0 = por %p4909_p13, %p4908_p12 }
 0x2a5   : > { %p4911_p1 = pnand %p4910_p0, %p4904_p9 }
 0x2a7   : > { %4914 = shalt.err (!%p4911_p1)
}
 0x2a8   : > { %s5036_s30 = smov 64   ;;  %v3826_v38 = vmul.f32 %v4752_v31, %v4752_v31  ;;  %v3787_v40 = vadd.f32 %v4752_v31, %v3786_v36  ;;  %v3856_v41 = vadd.f32 %v3855_v37, %v3825_v35  ;;  %s6258_s6 = sand.u32 1, %s4055_s21  }
 0x2a9   : > { %4762 = dma.vmem_to_hbm [thread:$0]  (%p5106_p4), %s6227_s12, 2048, %s6225_s24, %s3866_s29, %s5036_s30, %s5036_s30, %s5030_s11  }
 0x2aa   : > { %v3788_v42 = vrot.slane %v3787_v40, 4  ;;  %v3857_v43 = vadd.f32 %v3856_v41, %v3826_v38  ;;  %s4564_s26 = sshll.u32 %s5017_s18, 4  ;;  %s218_s8 = scalar_lea.vmem [#allocation5], %s6183_s7 }
 0x2ab   : > { %s3906_s11 = sshll.u32 %s218_s8, 4  ;;  %s224_s12 = scalar_lea.vmem [#allocation7], %s6183_s7  ;;  %s6270_s11 = int_to_ptr.vmem [resolvable:$true] %s3906_s11 }
 0x2ac   : > { %v3789_v44 = vadd.f32 %v3788_v42, %v3787_v40  ;;  %v3858_v45 = vrot.slane %v3857_v43, 4  ;;  %s3920_s24 = sshll.u32 %s224_s12, 4  ;;  %s6268_s10 = scalar_lea.hbm %s6355_s3, %s4564_s26  ;;  %s6277_s24 = int_to_ptr.vmem [resolvable:$true] %s3920_s24 }
 0x2ad   : > { %s6275_s13 = scalar_lea.hbm %s6356_s4, %s4564_s26  ;;  %s3871_s14 = scalar_lea.sflag [#allocation6], %s6258_s6 }
 0x2ae   : > { %v3859_v46 = vadd.f32 %v3858_v45, %v3857_v43  ;;  %v3790_v47 = vrot.slane %v3789_v44, 2  ;;  %s4915_s5 = scalar_lea.vmem %s6270_s11, 16  ;;  %s5037_s30 = smov [#allocation5]  }
 0x2af   : > { %p4916_p2 = scmp.ne.s32.totalorder %s6270_s11, %s4915_s5  ;;  %s4919_s29 = sshll.u32 %s5037_s30, 4  ;;  %s4920_s29 = int_to_ptr.vmem [resolvable:$false] %s4919_s29 }
 0x2b0   : > { %v3791_v48 = vadd.f32 %v3790_v47, %v3789_v44  ;;  %v3860_v49 = vrot.slane %v3859_v46, 2  ;;  %s4921_s9 = scalar_lea.vmem %s4920_s29, 32  ;;  %p4922_p6 = scmp.lt.s32.totalorder %s6270_s11, %s4920_s29 }
 0x2b1   : > { %p4917_p3 = pnand %p4916_p2, %p5106_p4  ;;  %p4923_p7 = scmp.lt.s32.totalorder %s4921_s9, %s4915_s5 }
 0x2b2   : > { %v3792_v50 = vrot.slane %v3791_v48, 1  ;;  %v3861_v51 = vadd.f32 %v3860_v49, %v3859_v46 }
 0x2b3   : > { %p4918_p5 = pneg %p4917_p3  ;;  %p4924_p9 = por %p4923_p7, %p4922_p6 }
 0x2b4   : > { %v3793_v52 = vadd.f32 %v3792_v50, %v3791_v48  ;;  %v3862_v55 = vrot.slane %v3861_v51, 1 }
 0x2b5   : > { %p4925_p10 = pnand %p4924_p9, %p4918_p5 }
 0x2b6   : > { %3794 = vst [vmem:[%s218_s8] sm:$0x1] %v3793_v52  ;;  %v3863_v56 = vadd.f32 %v3862_v55, %v3861_v51 }
 0x2b7   : > { %4928 = shalt.err (!%p4925_p10)
}
 0x2b8   : > { %s4929_s26 = scalar_lea.hbm %s6268_s10, 16  ;;  %s4933_s21 = scalar_lea.hbm %s6355_s3, 32 }
 0x2b9   : > { %p4930_p11 = scmp.ne.s32.totalorder %s6268_s10, %s4929_s26  ;;  %p4934_p0 = scmp.lt.u32.totalorder %s6268_s10, %s6355_s3 }
 0x2ba   : > { %p4935_p1 = scmp.lt.u32.totalorder %s4933_s21, %s4929_s26  ;;  %p4937_p3 = scmp.lt.u32.totalorder %s4929_s26, %s6268_s10 }
 0x2bb   : > { %p4931_p12 = pnand %p4930_p11, %p5106_p4 }
 0x2bc   : > { %p4936_p2 = por %p4935_p1, %p4934_p0 }
 0x2bd   : > { %p4932_p13 = pneg %p4931_p12 }
 0x2be   : > { %p4938_p5 = por %p4937_p3, %p4936_p2 }
 0x2c0   : > { %p4939_p6 = pnand %p4938_p5, %p4932_p13 }
 0x2c2   : > { %4942 = shalt.err (!%p4939_p6)
}
 0x2c3   : > { %4763 = dma.vmem_to_hbm [thread:$0]  (%p5106_p4), %s6270_s11, 16, %s6268_s10, %s3871_s14   ;;  %3864 = vst [vmem:[%s224_s12] sm:$0x1] %v3863_v56 }
 0x2c4   : > { %s4943_s5 = scalar_lea.vmem %s6277_s24, 16  ;;  %s5038_s9 = smov [#allocation7]  }
 0x2c5   : > { %p4944_p7 = scmp.ne.s32.totalorder %s6277_s24, %s4943_s5  ;;  %s4947_s26 = sshll.u32 %s5038_s9, 4  ;;  %s4948_s26 = int_to_ptr.vmem [resolvable:$false] %s4947_s26 }
 0x2c6   : > { %s4949_s8 = scalar_lea.vmem %s4948_s26, 32  ;;  %p4950_p11 = scmp.lt.s32.totalorder %s6277_s24, %s4948_s26 }
 0x2c7   : > { %p4945_p9 = pnand %p4944_p7, %p5106_p4  ;;  %p4951_p12 = scmp.lt.s32.totalorder %s4949_s8, %s4943_s5 }
 0x2c9   : > { %p4946_p10 = pneg %p4945_p9  ;;  %p4952_p13 = por %p4951_p12, %p4950_p11 }
 0x2cb   : > { %p4953_p0 = pnand %p4952_p13, %p4946_p10 }
 0x2cd   : > { %4956 = shalt.err (!%p4953_p0)
}
 0x2ce   : > { %s4957_s7 = scalar_lea.hbm %s6275_s13, 16  ;;  %s4961_s10 = scalar_lea.hbm %s6356_s4, 32 }
 0x2cf   : > { %p4958_p1 = scmp.ne.s32.totalorder %s6275_s13, %s4957_s7  ;;  %p4962_p5 = scmp.lt.u32.totalorder %s6275_s13, %s6356_s4 }
 0x2d0   : > { %p4963_p6 = scmp.lt.u32.totalorder %s4961_s10, %s4957_s7  ;;  %p4965_p9 = scmp.lt.u32.totalorder %s4957_s7, %s6275_s13 }
 0x2d1   : > { %p4959_p2 = pnand %p4958_p1, %p5106_p4 }
 0x2d2   : > { %p4964_p7 = por %p4963_p6, %p4962_p5 }
 0x2d3   : > { %p4960_p3 = pneg %p4959_p2 }
 0x2d4   : > { %p4966_p10 = por %p4965_p9, %p4964_p7 }
 0x2d6   : > { %p4967_p11 = pnand %p4966_p10, %p4960_p3 }
 0x2d8   : > { %4970 = shalt.err (!%p4967_p11)
}
 0x2d9   : > { %4764 = dma.vmem_to_hbm [thread:$0]  (%p5106_p4), %s6277_s24, 16, %s6275_s13, %s3871_s14  }
 0x2da PF: > { %p4778_p12 = scmp.ge.s32.totalorder %s5025_s20, 2  ;;  %s3932_s30 = sand.u32 1, %s5005_s15  }
 0x2db   : > { %s3933_s29 = scalar_lea.sflag [#allocation4], %s3932_s30 }
 0x2dc   : > { %p4769_p13 = pnand %p4778_p12, %p5115_p8 }
 0x2de   : > { %4996 = dma.done.wait (!%p4769_p13), %s3933_s29, 2048  }
 0x2df   : > { %4998 = vsyncadd (!%p4769_p13), %s3933_s29, 4294965248  ;;  %s3941_s5 = sand.u32 1, %s4056_s22  }
 0x2e0   : > { %s3942_s25 = scalar_lea.sflag [#allocation6], %s3941_s5 }
 0x2e1   : > { %5000 = dma.done.wait (!%p4769_p13), %s3942_s25, 32  }
 0x2e2   : > { %5002 = vsyncadd (!%p4769_p13), %s3942_s25, 4294967264  ;;  %s21_s20 = sadd.s32 1, %s5025_s20   ;;  %s6363_s15 = smov %s5009_s16 }
 0x2e3   : > { %p18_p4 = scmp.ge.s32.totalorder %s21_s20, 4   ;;  %s6364_s16 = smov %s5013_s17 }
 0x2e4   : > { %s6365_s17 = smov %s5121_s28  ;;  %s6366_s18 = smov %s5021_s19 }
 0x2e5   : > { %s6367_s19 = smov %s6369_s23  ;;  %20 = sbr.rel (!%p18_p4) target bundleno = 6 (0x6), region = 98 }
 0x2ec   :  { %3954 = vsyncpa [#allocation4], 1 }
 0x2ed   :  { %3956 = vsyncpa [#allocation4 + $0x1], 1 }
 0x2ee   :  { %3957 = vsyncpa [#allocation6], 1 }
 0x2ef   :  { %3959 = vsyncpa [#allocation6 + $0x1], 1 }

</bundles_post_ra>
